<compile_context>
chip_gen: v7x
topology: tpu7x:2x2x1
jax: 0.10.0
libtpu: 0.0.40
codegen_flags: <defaults>
</compile_context>

<pallas_src>
import functools

import jax
import jax.numpy as jnp
from jax.experimental import pallas as pl
from jax.experimental.pallas import tpu as pltpu

# Keep XLA-side matmuls (reference + init-time packing) in full f32 so the
# pure-JAX reference matches the f32 MXU math inside the kernel.
jax.config.update("jax_default_matmul_precision", "highest")


def _round_up(x, m):
    return (x + m - 1) // m * m


# ----------------------------- Pallas kernel --------------------------------
def _sentiment_lstm_kernel(ids_ref, w_ref, fc_ref, out_ref, *, batch, seq_len):
    """ids_ref: (T*B, 1) int32 token ids, time-major (row t*B+b = x_ids[b, t]).
    w_ref: (VPAD + H, 8H) f32 slab:
        rows [0, V)        : embedding @ [W_ih_f | W_ih_b]   (gate order i,f,o,g)
        rows [V, VPAD-1)   : zero padding
        row  VPAD-1        : [b_f | b_b]  (b_ih + b_hh per direction)
        rows [VPAD, VPAD+H): [W_hh_f | W_hh_b]
    fc_ref: (2H+1, O) f32: rows [0,H)=Wfc_fwd, [H,2H)=Wfc_bwd, row 2H = b_fc.
    out_ref: (B, O) f32."""
    B, T = batch, seq_len
    H = w_ref.shape[1] // 8
    v_pad = w_ref.shape[0] - H          # bias row lives at index v_pad - 1

    # --- Embedding gather + input projection + bias for BOTH directions and
    # ALL time steps, hoisted out of the recurrence as ONE MXU push.
    # TODO(synk): one-hot gather gives zero rows for out-of-range token ids
    # instead of jnp.take's clamping; ids are always in [0, V) here.
    ids = ids_ref[...]                                               # (T*B, 1)
    col = jax.lax.broadcasted_iota(jnp.int32, (T * B, v_pad), 1)
    onehot = jnp.where((col == ids) | (col == v_pad - 1), 1.0, 0.0)  # +bias col
    xproj = jnp.dot(onehot, w_ref[0:v_pad, :],
                    preferred_element_type=jnp.float32)              # (T*B, 8H)

    # Loop-invariant recurrent weights (one aligned 128-lane tile / direction).
    whh = w_ref[v_pad:v_pad + H, :]
    whh_f = whh[:, 0:4 * H]
    whh_b = whh[:, 4 * H:8 * H]

    def step(xg, h, c, w, first):
        # xg already contains x_t @ W_ih + b; only the recurrent term is added.
        if first:
            gates = xg                                   # h == c == 0 initially
        else:
            gates = xg + jnp.dot(h, w, preferred_element_type=jnp.float32)
        # Gate order [i, f, o, g]: one sigmoid pass + one tanh pass.
        sig = jax.nn.sigmoid(gates[:, 0:3 * H])
        g = jnp.tanh(gates[:, 3 * H:4 * H])
        i = sig[:, 0:H]
        f = sig[:, H:2 * H]
        o = sig[:, 2 * H:3 * H]
        c_new = i * g if first else f * c + i * g
        h_new = o * jnp.tanh(c_new)
        return h_new, c_new

    h_f = c_f = h_b = c_b = None
    # Fully unrolled static recurrence: forward reads xproj rows t*B:(t+1)*B,
    # backward reads rows for time T-1-t -- no flipped copy of x anywhere.
    for t in range(T):
        xg_f = xproj[t * B:(t + 1) * B, 0:4 * H]
        xg_b = xproj[(T - 1 - t) * B:(T - t) * B, 4 * H:8 * H]
        h_f, c_f = step(xg_f, h_f, c_f, whh_f, first=(t == 0))
        h_b, c_b = step(xg_b, h_b, c_b, whh_b, first=(t == 0))

    # Final FC split per direction (no lane concat); dropout is identity (eval).
    out = (jnp.dot(h_f, fc_ref[0:H, :], preferred_element_type=jnp.float32)
           + jnp.dot(h_b, fc_ref[H:2 * H, :], preferred_element_type=jnp.float32)
           + fc_ref[2 * H:2 * H + 1, :])
    out_ref[...] = out.astype(out_ref.dtype)


# ------------------------------ wrapper --------------------------------------
def sentiment_lstm_forward(x_ids, packed):
    """x_ids: (B, T) int32 token ids -> (B, output_dim) f32 logits."""
    B, T = x_ids.shape
    w_slab = packed["w_slab"]
    fc_slab = packed["fc_slab"]
    O = fc_slab.shape[1]

    # Only per-call wrapper op: flatten ids to time-major (64 bytes, negligible).
    ids_tm = x_ids.T.reshape(T * B, 1).astype(jnp.int32)

    kernel = functools.partial(_sentiment_lstm_kernel, batch=B, seq_len=T)
    return pl.pallas_call(
        kernel,
        out_shape=jax.ShapeDtypeStruct((B, O), jnp.float32),
        # No grid: everything is tiny, lives whole in VMEM, one DMA per operand.
        in_specs=[pl.BlockSpec(memory_space=pltpu.MemorySpace.VMEM)] * 3,
        out_specs=pl.BlockSpec(memory_space=pltpu.MemorySpace.VMEM),
    )(ids_tm, w_slab, fc_slab)


# --------------------- one-time init-time operand packing --------------------
def _reorder_gates(w):
    """Last-dim gate order: PyTorch [i, f, g, o] -> kernel [i, f, o, g]."""
    H = w.shape[-1] // 4
    return jnp.concatenate([w[..., :2 * H], w[..., 3 * H:], w[..., 2 * H:3 * H]],
                           axis=-1)


def pack_params(params):
    """Fuse module params into the 3 kernel operands. Called ONCE at init."""
    hi = jax.lax.Precision.HIGHEST
    emb = params["embedding"]                                    # (V, E)
    V = emb.shape[0]
    H = params["whh_f"].shape[0]

    wih = jnp.concatenate([_reorder_gates(params["wih_f"]),
                           _reorder_gates(params["wih_b"])], axis=1)   # (E, 8H)
    bias = jnp.concatenate([_reorder_gates(params["b_f"]),
                            _reorder_gates(params["b_b"])], axis=1)    # (1, 8H)
    whh = jnp.concatenate([_reorder_gates(params["whh_f"]),
                           _reorder_gates(params["whh_b"])], axis=1)   # (H, 8H)

    emb_proj = jnp.dot(emb, wih, precision=hi)                         # (V, 8H)
    v_pad = _round_up(V + 1, 8)
    pad = jnp.zeros((v_pad - 1 - V, 8 * H), jnp.float32)
    w_slab = jnp.concatenate([emb_proj, pad, bias, whh], axis=0)  # (v_pad+H, 8H)

    fc_slab = jnp.concatenate([params["wfc"], params["bfc"]], axis=0)  # (2H+1, O)
    return {"w_slab": w_slab, "fc_slab": fc_slab}


# ---------------- pure-JAX reference (for correctness check) ----------------
def _lstm_dir_ref(x_tm, w_ih, w_hh, b, B, H):
    def step(carry, x_t):
        h, c = carry
        gates = x_t @ w_ih + h @ w_hh + b[0]
        i, f, g, o = jnp.split(gates, 4, axis=-1)
        i, f, o = jax.nn.sigmoid(i), jax.nn.sigmoid(f), jax.nn.sigmoid(o)
        g = jnp.tanh(g)
        c = f * c + i * g
        h = o * jnp.tanh(c)
        return (h, c), None

    init = (jnp.zeros((B, H), jnp.float32), jnp.zeros((B, H), jnp.float32))
    (h, _), _ = jax.lax.scan(step, init, x_tm)
    return h


def sentiment_lstm_ref(x_ids, params):
    x = jnp.take(params["embedding"], x_ids, axis=0)
    x_tm = jnp.swapaxes(x, 0, 1)
    B = x_ids.shape[0]
    H = params["whh_f"].shape[0]
    h_f = _lstm_dir_ref(x_tm, params["wih_f"], params["whh_f"], params["b_f"], B, H)
    h_b = _lstm_dir_ref(jnp.flip(x_tm, axis=0),
                        params["wih_b"], params["whh_b"], params["b_b"], B, H)
    hidden = jnp.concatenate([h_f, h_b], axis=-1)
    return hidden @ params["wfc"] + params["bfc"][0]


def init_params(key, vocab_size, embed_dim, hidden_dim, output_dim):
    ks = jax.random.split(key, 10)
    s = 0.1
    p = {
        "embedding": jax.random.normal(ks[0], (vocab_size, embed_dim), jnp.float32) * s,
        # LSTM weights stored transposed vs. PyTorch: (in, 4H), gate order i,f,g,o
        "wih_f": jax.random.normal(ks[1], (embed_dim, 4 * hidden_dim), jnp.float32) * s,
        "whh_f": jax.random.normal(ks[2], (hidden_dim, 4 * hidden_dim), jnp.float32) * s,
        # b = b_ih + b_hh (PyTorch adds both); kept 2-D (1, 4H)
        "b_f": jax.random.normal(ks[3], (1, 4 * hidden_dim), jnp.float32) * s,
        "wih_b": jax.random.normal(ks[4], (embed_dim, 4 * hidden_dim), jnp.float32) * s,
        "whh_b": jax.random.normal(ks[5], (hidden_dim, 4 * hidden_dim), jnp.float32) * s,
        "b_b": jax.random.normal(ks[6], (1, 4 * hidden_dim), jnp.float32) * s,
        "wfc": jax.random.normal(ks[7], (2 * hidden_dim, output_dim), jnp.float32) * s,
        "bfc": jax.random.normal(ks[8], (1, output_dim), jnp.float32) * s,
    }
    return p


if __name__ == "__main__":
    vocab_size, embed_dim, hidden_dim, output_dim = 50, 16, 32, 2
    B, T = 2, 8

    key = jax.random.PRNGKey(0)
    k_param, k_ids = jax.random.split(key)
    params = init_params(k_param, vocab_size, embed_dim, hidden_dim, output_dim)
    x_ids = jax.random.randint(k_ids, (B, T), 0, vocab_size, dtype=jnp.int32)

    packed = pack_params(params)   # one-time init-time weight fusion/packing

    out = jax.jit(sentiment_lstm_forward)(x_ids, packed)
    out = jax.block_until_ready(out)

    ref = sentiment_lstm_ref(x_ids, params)
    assert out.shape == (B, output_dim)
    assert jnp.allclose(out, ref, atol=1e-4, rtol=1e-4), (out, ref)

    print("KERNEL_OK")
</pallas_src>

<mosaic_0001>
module attributes {stable_mosaic.version = 11 : i64} {
  func.func @_sentiment_lstm_kernel(%arg0: memref<16x1xi32, #tpu.memory_space<vmem>>, %arg1: memref<88x256xf32, #tpu.memory_space<vmem>>, %arg2: memref<65x2xf32, #tpu.memory_space<vmem>>, %arg3: memref<2x2xf32, #tpu.memory_space<vmem>>) attributes {dimension_semantics = [], scalar_prefetch = 0 : i64, scratch_operands = 0 : i64, tpu.core_type = #tpu.core_type<tc>} {
    %c0 = arith.constant 0 : index
    %c0_0 = arith.constant 0 : index
    %0 = vector.load %arg0[%c0, %c0_0] : memref<16x1xi32, #tpu.memory_space<vmem>>, vector<16x1xi32>
    %1 = tpu.iota {dimensions = array<i32: 1>} : vector<16x56xi32>
    %2 = vector.broadcast %0 : vector<16x1xi32> to vector<16x56xi32>
    %3 = arith.cmpi eq, %1, %2 : vector<16x56xi32>
    %c55_i32 = arith.constant 55 : i32
    %4 = vector.broadcast %c55_i32 : i32 to vector<16x56xi32>
    %5 = arith.cmpi eq, %1, %4 : vector<16x56xi32>
    %6 = arith.ori %3, %5 : vector<16x56xi1>
    %cst = arith.constant 1.000000e+00 : f32
    %cst_1 = arith.constant 0.000000e+00 : f32
    %7 = vector.broadcast %cst : f32 to vector<16x56xf32>
    %8 = vector.broadcast %cst_1 : f32 to vector<16x56xf32>
    %9 = arith.select %6, %7, %8 : vector<16x56xi1>, vector<16x56xf32>
    %c0_2 = arith.constant 0 : index
    %c0_3 = arith.constant 0 : index
    %10 = vector.load %arg1[%c0_2, %c0_3] : memref<88x256xf32, #tpu.memory_space<vmem>>, vector<56x256xf32>
    %cst_4 = arith.constant dense<0.000000e+00> : vector<16x256xf32>
    %11 = tpu.matmul %9, %10, %cst_4 {dimension_numbers = #tpu.dot_dimension_numbers<[1], [0], [0], [1], [0, 0, 1, 1], [], []>, precision = #tpu.contract_precision<fp32>} : vector<16x56xf32>, vector<56x256xf32>, vector<16x256xf32> -> vector<16x256xf32>
    %c56 = arith.constant 56 : index
    %c0_5 = arith.constant 0 : index
    %12 = vector.load %arg1[%c56, %c0_5] : memref<88x256xf32, #tpu.memory_space<vmem>>, vector<32x256xf32>
    %13 = vector.extract_strided_slice %12 {offsets = [0, 0], sizes = [32, 128], strides = [1, 1]} : vector<32x256xf32> to vector<32x128xf32>
    %14 = vector.extract_strided_slice %12 {offsets = [0, 128], sizes = [32, 128], strides = [1, 1]} : vector<32x256xf32> to vector<32x128xf32>
    %15 = vector.extract_strided_slice %11 {offsets = [0, 0], sizes = [2, 128], strides = [1, 1]} : vector<16x256xf32> to vector<2x128xf32>
    %16 = vector.extract_strided_slice %11 {offsets = [14, 128], sizes = [2, 128], strides = [1, 1]} : vector<16x256xf32> to vector<2x128xf32>
    %17 = vector.extract_strided_slice %15 {offsets = [0, 0], sizes = [2, 96], strides = [1, 1]} : vector<2x128xf32> to vector<2x96xf32>
    %18 = arith.negf %17 : vector<2x96xf32>
    %19 = math.exp %18 : vector<2x96xf32>
    %cst_6 = arith.constant 1.000000e+00 : f32
    %20 = vector.broadcast %cst_6 : f32 to vector<2x96xf32>
    %21 = arith.addf %20, %19 : vector<2x96xf32>
    %22 = arith.divf %20, %21 : vector<2x96xf32>
    %23 = vector.extract_strided_slice %15 {offsets = [0, 96], sizes = [2, 32], strides = [1, 1]} : vector<2x128xf32> to vector<2x32xf32>
    %24 = math.tanh %23 : vector<2x32xf32>
    %25 = vector.extract_strided_slice %22 {offsets = [0, 0], sizes = [2, 32], strides = [1, 1]} : vector<2x96xf32> to vector<2x32xf32>
    %26 = vector.extract_strided_slice %22 {offsets = [0, 64], sizes = [2, 32], strides = [1, 1]} : vector<2x96xf32> to vector<2x32xf32>
    %27 = arith.mulf %25, %24 : vector<2x32xf32>
    %28 = math.tanh %27 : vector<2x32xf32>
    %29 = arith.mulf %26, %28 : vector<2x32xf32>
    %30 = vector.extract_strided_slice %16 {offsets = [0, 0], sizes = [2, 96], strides = [1, 1]} : vector<2x128xf32> to vector<2x96xf32>
    %31 = arith.negf %30 : vector<2x96xf32>
    %32 = math.exp %31 : vector<2x96xf32>
    %cst_7 = arith.constant 1.000000e+00 : f32
    %33 = vector.broadcast %cst_7 : f32 to vector<2x96xf32>
    %34 = arith.addf %33, %32 : vector<2x96xf32>
    %35 = arith.divf %33, %34 : vector<2x96xf32>
    %36 = vector.extract_strided_slice %16 {offsets = [0, 96], sizes = [2, 32], strides = [1, 1]} : vector<2x128xf32> to vector<2x32xf32>
    %37 = math.tanh %36 : vector<2x32xf32>
    %38 = vector.extract_strided_slice %35 {offsets = [0, 0], sizes = [2, 32], strides = [1, 1]} : vector<2x96xf32> to vector<2x32xf32>
    %39 = vector.extract_strided_slice %35 {offsets = [0, 64], sizes = [2, 32], strides = [1, 1]} : vector<2x96xf32> to vector<2x32xf32>
    %40 = arith.mulf %38, %37 : vector<2x32xf32>
    %41 = math.tanh %40 : vector<2x32xf32>
    %42 = arith.mulf %39, %41 : vector<2x32xf32>
    %43 = vector.extract_strided_slice %11 {offsets = [2, 0], sizes = [2, 128], strides = [1, 1]} : vector<16x256xf32> to vector<2x128xf32>
    %44 = vector.extract_strided_slice %11 {offsets = [12, 128], sizes = [2, 128], strides = [1, 1]} : vector<16x256xf32> to vector<2x128xf32>
    %cst_8 = arith.constant dense<0.000000e+00> : vector<2x128xf32>
    %45 = tpu.matmul %29, %13, %cst_8 {dimension_numbers = #tpu.dot_dimension_numbers<[1], [0], [0], [1], [0, 0, 1, 1], [], []>, precision = #tpu.contract_precision<fp32>} : vector<2x32xf32>, vector<32x128xf32>, vector<2x128xf32> -> vector<2x128xf32>
    %46 = arith.addf %43, %45 : vector<2x128xf32>
    %47 = vector.extract_strided_slice %46 {offsets = [0, 0], sizes = [2, 96], strides = [1, 1]} : vector<2x128xf32> to vector<2x96xf32>
    %48 = arith.negf %47 : vector<2x96xf32>
    %49 = math.exp %48 : vector<2x96xf32>
    %cst_9 = arith.constant 1.000000e+00 : f32
    %50 = vector.broadcast %cst_9 : f32 to vector<2x96xf32>
    %51 = arith.addf %50, %49 : vector<2x96xf32>
    %52 = arith.divf %50, %51 : vector<2x96xf32>
    %53 = vector.extract_strided_slice %46 {offsets = [0, 96], sizes = [2, 32], strides = [1, 1]} : vector<2x128xf32> to vector<2x32xf32>
    %54 = math.tanh %53 : vector<2x32xf32>
    %55 = vector.extract_strided_slice %52 {offsets = [0, 0], sizes = [2, 32], strides = [1, 1]} : vector<2x96xf32> to vector<2x32xf32>
    %56 = vector.extract_strided_slice %52 {offsets = [0, 32], sizes = [2, 32], strides = [1, 1]} : vector<2x96xf32> to vector<2x32xf32>
    %57 = vector.extract_strided_slice %52 {offsets = [0, 64], sizes = [2, 32], strides = [1, 1]} : vector<2x96xf32> to vector<2x32xf32>
    %58 = arith.mulf %56, %27 : vector<2x32xf32>
    %59 = arith.mulf %55, %54 : vector<2x32xf32>
    %60 = arith.addf %58, %59 : vector<2x32xf32>
    %61 = math.tanh %60 : vector<2x32xf32>
    %62 = arith.mulf %57, %61 : vector<2x32xf32>
    %cst_10 = arith.constant dense<0.000000e+00> : vector<2x128xf32>
    %63 = tpu.matmul %42, %14, %cst_10 {dimension_numbers = #tpu.dot_dimension_numbers<[1], [0], [0], [1], [0, 0, 1, 1], [], []>, precision = #tpu.contract_precision<fp32>} : vector<2x32xf32>, vector<32x128xf32>, vector<2x128xf32> -> vector<2x128xf32>
    %64 = arith.addf %44, %63 : vector<2x128xf32>
    %65 = vector.extract_strided_slice %64 {offsets = [0, 0], sizes = [2, 96], strides = [1, 1]} : vector<2x128xf32> to vector<2x96xf32>
    %66 = arith.negf %65 : vector<2x96xf32>
    %67 = math.exp %66 : vector<2x96xf32>
    %cst_11 = arith.constant 1.000000e+00 : f32
    %68 = vector.broadcast %cst_11 : f32 to vector<2x96xf32>
    %69 = arith.addf %68, %67 : vector<2x96xf32>
    %70 = arith.divf %68, %69 : vector<2x96xf32>
    %71 = vector.extract_strided_slice %64 {offsets = [0, 96], sizes = [2, 32], strides = [1, 1]} : vector<2x128xf32> to vector<2x32xf32>
    %72 = math.tanh %71 : vector<2x32xf32>
    %73 = vector.extract_strided_slice %70 {offsets = [0, 0], sizes = [2, 32], strides = [1, 1]} : vector<2x96xf32> to vector<2x32xf32>
    %74 = vector.extract_strided_slice %70 {offsets = [0, 32], sizes = [2, 32], strides = [1, 1]} : vector<2x96xf32> to vector<2x32xf32>
    %75 = vector.extract_strided_slice %70 {offsets = [0, 64], sizes = [2, 32], strides = [1, 1]} : vector<2x96xf32> to vector<2x32xf32>
    %76 = arith.mulf %74, %40 : vector<2x32xf32>
    %77 = arith.mulf %73, %72 : vector<2x32xf32>
    %78 = arith.addf %76, %77 : vector<2x32xf32>
    %79 = math.tanh %78 : vector<2x32xf32>
    %80 = arith.mulf %75, %79 : vector<2x32xf32>
    %81 = vector.extract_strided_slice %11 {offsets = [4, 0], sizes = [2, 128], strides = [1, 1]} : vector<16x256xf32> to vector<2x128xf32>
    %82 = vector.extract_strided_slice %11 {offsets = [10, 128], sizes = [2, 128], strides = [1, 1]} : vector<16x256xf32> to vector<2x128xf32>
    %cst_12 = arith.constant dense<0.000000e+00> : vector<2x128xf32>
    %83 = tpu.matmul %62, %13, %cst_12 {dimension_numbers = #tpu.dot_dimension_numbers<[1], [0], [0], [1], [0, 0, 1, 1], [], []>, precision = #tpu.contract_precision<fp32>} : vector<2x32xf32>, vector<32x128xf32>, vector<2x128xf32> -> vector<2x128xf32>
    %84 = arith.addf %81, %83 : vector<2x128xf32>
    %85 = vector.extract_strided_slice %84 {offsets = [0, 0], sizes = [2, 96], strides = [1, 1]} : vector<2x128xf32> to vector<2x96xf32>
    %86 = arith.negf %85 : vector<2x96xf32>
    %87 = math.exp %86 : vector<2x96xf32>
    %cst_13 = arith.constant 1.000000e+00 : f32
    %88 = vector.broadcast %cst_13 : f32 to vector<2x96xf32>
    %89 = arith.addf %88, %87 : vector<2x96xf32>
    %90 = arith.divf %88, %89 : vector<2x96xf32>
    %91 = vector.extract_strided_slice %84 {offsets = [0, 96], sizes = [2, 32], strides = [1, 1]} : vector<2x128xf32> to vector<2x32xf32>
    %92 = math.tanh %91 : vector<2x32xf32>
    %93 = vector.extract_strided_slice %90 {offsets = [0, 0], sizes = [2, 32], strides = [1, 1]} : vector<2x96xf32> to vector<2x32xf32>
    %94 = vector.extract_strided_slice %90 {offsets = [0, 32], sizes = [2, 32], strides = [1, 1]} : vector<2x96xf32> to vector<2x32xf32>
    %95 = vector.extract_strided_slice %90 {offsets = [0, 64], sizes = [2, 32], strides = [1, 1]} : vector<2x96xf32> to vector<2x32xf32>
    %96 = arith.mulf %94, %60 : vector<2x32xf32>
    %97 = arith.mulf %93, %92 : vector<2x32xf32>
    %98 = arith.addf %96, %97 : vector<2x32xf32>
    %99 = math.tanh %98 : vector<2x32xf32>
    %100 = arith.mulf %95, %99 : vector<2x32xf32>
    %cst_14 = arith.constant dense<0.000000e+00> : vector<2x128xf32>
    %101 = tpu.matmul %80, %14, %cst_14 {dimension_numbers = #tpu.dot_dimension_numbers<[1], [0], [0], [1], [0, 0, 1, 1], [], []>, precision = #tpu.contract_precision<fp32>} : vector<2x32xf32>, vector<32x128xf32>, vector<2x128xf32> -> vector<2x128xf32>
    %102 = arith.addf %82, %101 : vector<2x128xf32>
    %103 = vector.extract_strided_slice %102 {offsets = [0, 0], sizes = [2, 96], strides = [1, 1]} : vector<2x128xf32> to vector<2x96xf32>
    %104 = arith.negf %103 : vector<2x96xf32>
    %105 = math.exp %104 : vector<2x96xf32>
    %cst_15 = arith.constant 1.000000e+00 : f32
    %106 = vector.broadcast %cst_15 : f32 to vector<2x96xf32>
    %107 = arith.addf %106, %105 : vector<2x96xf32>
    %108 = arith.divf %106, %107 : vector<2x96xf32>
    %109 = vector.extract_strided_slice %102 {offsets = [0, 96], sizes = [2, 32], strides = [1, 1]} : vector<2x128xf32> to vector<2x32xf32>
    %110 = math.tanh %109 : vector<2x32xf32>
    %111 = vector.extract_strided_slice %108 {offsets = [0, 0], sizes = [2, 32], strides = [1, 1]} : vector<2x96xf32> to vector<2x32xf32>
    %112 = vector.extract_strided_slice %108 {offsets = [0, 32], sizes = [2, 32], strides = [1, 1]} : vector<2x96xf32> to vector<2x32xf32>
    %113 = vector.extract_strided_slice %108 {offsets = [0, 64], sizes = [2, 32], strides = [1, 1]} : vector<2x96xf32> to vector<2x32xf32>
    %114 = arith.mulf %112, %78 : vector<2x32xf32>
    %115 = arith.mulf %111, %110 : vector<2x32xf32>
    %116 = arith.addf %114, %115 : vector<2x32xf32>
    %117 = math.tanh %116 : vector<2x32xf32>
    %118 = arith.mulf %113, %117 : vector<2x32xf32>
    %119 = vector.extract_strided_slice %11 {offsets = [6, 0], sizes = [2, 128], strides = [1, 1]} : vector<16x256xf32> to vector<2x128xf32>
    %120 = vector.extract_strided_slice %11 {offsets = [8, 128], sizes = [2, 128], strides = [1, 1]} : vector<16x256xf32> to vector<2x128xf32>
    %cst_16 = arith.constant dense<0.000000e+00> : vector<2x128xf32>
    %121 = tpu.matmul %100, %13, %cst_16 {dimension_numbers = #tpu.dot_dimension_numbers<[1], [0], [0], [1], [0, 0, 1, 1], [], []>, precision = #tpu.contract_precision<fp32>} : vector<2x32xf32>, vector<32x128xf32>, vector<2x128xf32> -> vector<2x128xf32>
    %122 = arith.addf %119, %121 : vector<2x128xf32>
    %123 = vector.extract_strided_slice %122 {offsets = [0, 0], sizes = [2, 96], strides = [1, 1]} : vector<2x128xf32> to vector<2x96xf32>
    %124 = arith.negf %123 : vector<2x96xf32>
    %125 = math.exp %124 : vector<2x96xf32>
    %cst_17 = arith.constant 1.000000e+00 : f32
    %126 = vector.broadcast %cst_17 : f32 to vector<2x96xf32>
    %127 = arith.addf %126, %125 : vector<2x96xf32>
    %128 = arith.divf %126, %127 : vector<2x96xf32>
    %129 = vector.extract_strided_slice %122 {offsets = [0, 96], sizes = [2, 32], strides = [1, 1]} : vector<2x128xf32> to vector<2x32xf32>
    %130 = math.tanh %129 : vector<2x32xf32>
    %131 = vector.extract_strided_slice %128 {offsets = [0, 0], sizes = [2, 32], strides = [1, 1]} : vector<2x96xf32> to vector<2x32xf32>
    %132 = vector.extract_strided_slice %128 {offsets = [0, 32], sizes = [2, 32], strides = [1, 1]} : vector<2x96xf32> to vector<2x32xf32>
    %133 = vector.extract_strided_slice %128 {offsets = [0, 64], sizes = [2, 32], strides = [1, 1]} : vector<2x96xf32> to vector<2x32xf32>
    %134 = arith.mulf %132, %98 : vector<2x32xf32>
    %135 = arith.mulf %131, %130 : vector<2x32xf32>
    %136 = arith.addf %134, %135 : vector<2x32xf32>
    %137 = math.tanh %136 : vector<2x32xf32>
    %138 = arith.mulf %133, %137 : vector<2x32xf32>
    %cst_18 = arith.constant dense<0.000000e+00> : vector<2x128xf32>
    %139 = tpu.matmul %118, %14, %cst_18 {dimension_numbers = #tpu.dot_dimension_numbers<[1], [0], [0], [1], [0, 0, 1, 1], [], []>, precision = #tpu.contract_precision<fp32>} : vector<2x32xf32>, vector<32x128xf32>, vector<2x128xf32> -> vector<2x128xf32>
    %140 = arith.addf %120, %139 : vector<2x128xf32>
    %141 = vector.extract_strided_slice %140 {offsets = [0, 0], sizes = [2, 96], strides = [1, 1]} : vector<2x128xf32> to vector<2x96xf32>
    %142 = arith.negf %141 : vector<2x96xf32>
    %143 = math.exp %142 : vector<2x96xf32>
    %cst_19 = arith.constant 1.000000e+00 : f32
    %144 = vector.broadcast %cst_19 : f32 to vector<2x96xf32>
    %145 = arith.addf %144, %143 : vector<2x96xf32>
    %146 = arith.divf %144, %145 : vector<2x96xf32>
    %147 = vector.extract_strided_slice %140 {offsets = [0, 96], sizes = [2, 32], strides = [1, 1]} : vector<2x128xf32> to vector<2x32xf32>
    %148 = math.tanh %147 : vector<2x32xf32>
    %149 = vector.extract_strided_slice %146 {offsets = [0, 0], sizes = [2, 32], strides = [1, 1]} : vector<2x96xf32> to vector<2x32xf32>
    %150 = vector.extract_strided_slice %146 {offsets = [0, 32], sizes = [2, 32], strides = [1, 1]} : vector<2x96xf32> to vector<2x32xf32>
    %151 = vector.extract_strided_slice %146 {offsets = [0, 64], sizes = [2, 32], strides = [1, 1]} : vector<2x96xf32> to vector<2x32xf32>
    %152 = arith.mulf %150, %116 : vector<2x32xf32>
    %153 = arith.mulf %149, %148 : vector<2x32xf32>
    %154 = arith.addf %152, %153 : vector<2x32xf32>
    %155 = math.tanh %154 : vector<2x32xf32>
    %156 = arith.mulf %151, %155 : vector<2x32xf32>
    %157 = vector.extract_strided_slice %11 {offsets = [8, 0], sizes = [2, 128], strides = [1, 1]} : vector<16x256xf32> to vector<2x128xf32>
    %158 = vector.extract_strided_slice %11 {offsets = [6, 128], sizes = [2, 128], strides = [1, 1]} : vector<16x256xf32> to vector<2x128xf32>
    %cst_20 = arith.constant dense<0.000000e+00> : vector<2x128xf32>
    %159 = tpu.matmul %138, %13, %cst_20 {dimension_numbers = #tpu.dot_dimension_numbers<[1], [0], [0], [1], [0, 0, 1, 1], [], []>, precision = #tpu.contract_precision<fp32>} : vector<2x32xf32>, vector<32x128xf32>, vector<2x128xf32> -> vector<2x128xf32>
    %160 = arith.addf %157, %159 : vector<2x128xf32>
    %161 = vector.extract_strided_slice %160 {offsets = [0, 0], sizes = [2, 96], strides = [1, 1]} : vector<2x128xf32> to vector<2x96xf32>
    %162 = arith.negf %161 : vector<2x96xf32>
    %163 = math.exp %162 : vector<2x96xf32>
    %cst_21 = arith.constant 1.000000e+00 : f32
    %164 = vector.broadcast %cst_21 : f32 to vector<2x96xf32>
    %165 = arith.addf %164, %163 : vector<2x96xf32>
    %166 = arith.divf %164, %165 : vector<2x96xf32>
    %167 = vector.extract_strided_slice %160 {offsets = [0, 96], sizes = [2, 32], strides = [1, 1]} : vector<2x128xf32> to vector<2x32xf32>
    %168 = math.tanh %167 : vector<2x32xf32>
    %169 = vector.extract_strided_slice %166 {offsets = [0, 0], sizes = [2, 32], strides = [1, 1]} : vector<2x96xf32> to vector<2x32xf32>
    %170 = vector.extract_strided_slice %166 {offsets = [0, 32], sizes = [2, 32], strides = [1, 1]} : vector<2x96xf32> to vector<2x32xf32>
    %171 = vector.extract_strided_slice %166 {offsets = [0, 64], sizes = [2, 32], strides = [1, 1]} : vector<2x96xf32> to vector<2x32xf32>
    %172 = arith.mulf %170, %136 : vector<2x32xf32>
    %173 = arith.mulf %169, %168 : vector<2x32xf32>
    %174 = arith.addf %172, %173 : vector<2x32xf32>
    %175 = math.tanh %174 : vector<2x32xf32>
    %176 = arith.mulf %171, %175 : vector<2x32xf32>
    %cst_22 = arith.constant dense<0.000000e+00> : vector<2x128xf32>
    %177 = tpu.matmul %156, %14, %cst_22 {dimension_numbers = #tpu.dot_dimension_numbers<[1], [0], [0], [1], [0, 0, 1, 1], [], []>, precision = #tpu.contract_precision<fp32>} : vector<2x32xf32>, vector<32x128xf32>, vector<2x128xf32> -> vector<2x128xf32>
    %178 = arith.addf %158, %177 : vector<2x128xf32>
    %179 = vector.extract_strided_slice %178 {offsets = [0, 0], sizes = [2, 96], strides = [1, 1]} : vector<2x128xf32> to vector<2x96xf32>
    %180 = arith.negf %179 : vector<2x96xf32>
    %181 = math.exp %180 : vector<2x96xf32>
    %cst_23 = arith.constant 1.000000e+00 : f32
    %182 = vector.broadcast %cst_23 : f32 to vector<2x96xf32>
    %183 = arith.addf %182, %181 : vector<2x96xf32>
    %184 = arith.divf %182, %183 : vector<2x96xf32>
    %185 = vector.extract_strided_slice %178 {offsets = [0, 96], sizes = [2, 32], strides = [1, 1]} : vector<2x128xf32> to vector<2x32xf32>
    %186 = math.tanh %185 : vector<2x32xf32>
    %187 = vector.extract_strided_slice %184 {offsets = [0, 0], sizes = [2, 32], strides = [1, 1]} : vector<2x96xf32> to vector<2x32xf32>
    %188 = vector.extract_strided_slice %184 {offsets = [0, 32], sizes = [2, 32], strides = [1, 1]} : vector<2x96xf32> to vector<2x32xf32>
    %189 = vector.extract_strided_slice %184 {offsets = [0, 64], sizes = [2, 32], strides = [1, 1]} : vector<2x96xf32> to vector<2x32xf32>
    %190 = arith.mulf %188, %154 : vector<2x32xf32>
    %191 = arith.mulf %187, %186 : vector<2x32xf32>
    %192 = arith.addf %190, %191 : vector<2x32xf32>
    %193 = math.tanh %192 : vector<2x32xf32>
    %194 = arith.mulf %189, %193 : vector<2x32xf32>
    %195 = vector.extract_strided_slice %11 {offsets = [10, 0], sizes = [2, 128], strides = [1, 1]} : vector<16x256xf32> to vector<2x128xf32>
    %196 = vector.extract_strided_slice %11 {offsets = [4, 128], sizes = [2, 128], strides = [1, 1]} : vector<16x256xf32> to vector<2x128xf32>
    %cst_24 = arith.constant dense<0.000000e+00> : vector<2x128xf32>
    %197 = tpu.matmul %176, %13, %cst_24 {dimension_numbers = #tpu.dot_dimension_numbers<[1], [0], [0], [1], [0, 0, 1, 1], [], []>, precision = #tpu.contract_precision<fp32>} : vector<2x32xf32>, vector<32x128xf32>, vector<2x128xf32> -> vector<2x128xf32>
    %198 = arith.addf %195, %197 : vector<2x128xf32>
    %199 = vector.extract_strided_slice %198 {offsets = [0, 0], sizes = [2, 96], strides = [1, 1]} : vector<2x128xf32> to vector<2x96xf32>
    %200 = arith.negf %199 : vector<2x96xf32>
    %201 = math.exp %200 : vector<2x96xf32>
    %cst_25 = arith.constant 1.000000e+00 : f32
    %202 = vector.broadcast %cst_25 : f32 to vector<2x96xf32>
    %203 = arith.addf %202, %201 : vector<2x96xf32>
    %204 = arith.divf %202, %203 : vector<2x96xf32>
    %205 = vector.extract_strided_slice %198 {offsets = [0, 96], sizes = [2, 32], strides = [1, 1]} : vector<2x128xf32> to vector<2x32xf32>
    %206 = math.tanh %205 : vector<2x32xf32>
    %207 = vector.extract_strided_slice %204 {offsets = [0, 0], sizes = [2, 32], strides = [1, 1]} : vector<2x96xf32> to vector<2x32xf32>
    %208 = vector.extract_strided_slice %204 {offsets = [0, 32], sizes = [2, 32], strides = [1, 1]} : vector<2x96xf32> to vector<2x32xf32>
    %209 = vector.extract_strided_slice %204 {offsets = [0, 64], sizes = [2, 32], strides = [1, 1]} : vector<2x96xf32> to vector<2x32xf32>
    %210 = arith.mulf %208, %174 : vector<2x32xf32>
    %211 = arith.mulf %207, %206 : vector<2x32xf32>
    %212 = arith.addf %210, %211 : vector<2x32xf32>
    %213 = math.tanh %212 : vector<2x32xf32>
    %214 = arith.mulf %209, %213 : vector<2x32xf32>
    %cst_26 = arith.constant dense<0.000000e+00> : vector<2x128xf32>
    %215 = tpu.matmul %194, %14, %cst_26 {dimension_numbers = #tpu.dot_dimension_numbers<[1], [0], [0], [1], [0, 0, 1, 1], [], []>, precision = #tpu.contract_precision<fp32>} : vector<2x32xf32>, vector<32x128xf32>, vector<2x128xf32> -> vector<2x128xf32>
    %216 = arith.addf %196, %215 : vector<2x128xf32>
    %217 = vector.extract_strided_slice %216 {offsets = [0, 0], sizes = [2, 96], strides = [1, 1]} : vector<2x128xf32> to vector<2x96xf32>
    %218 = arith.negf %217 : vector<2x96xf32>
    %219 = math.exp %218 : vector<2x96xf32>
    %cst_27 = arith.constant 1.000000e+00 : f32
    %220 = vector.broadcast %cst_27 : f32 to vector<2x96xf32>
    %221 = arith.addf %220, %219 : vector<2x96xf32>
    %222 = arith.divf %220, %221 : vector<2x96xf32>
    %223 = vector.extract_strided_slice %216 {offsets = [0, 96], sizes = [2, 32], strides = [1, 1]} : vector<2x128xf32> to vector<2x32xf32>
    %224 = math.tanh %223 : vector<2x32xf32>
    %225 = vector.extract_strided_slice %222 {offsets = [0, 0], sizes = [2, 32], strides = [1, 1]} : vector<2x96xf32> to vector<2x32xf32>
    %226 = vector.extract_strided_slice %222 {offsets = [0, 32], sizes = [2, 32], strides = [1, 1]} : vector<2x96xf32> to vector<2x32xf32>
    %227 = vector.extract_strided_slice %222 {offsets = [0, 64], sizes = [2, 32], strides = [1, 1]} : vector<2x96xf32> to vector<2x32xf32>
    %228 = arith.mulf %226, %192 : vector<2x32xf32>
    %229 = arith.mulf %225, %224 : vector<2x32xf32>
    %230 = arith.addf %228, %229 : vector<2x32xf32>
    %231 = math.tanh %230 : vector<2x32xf32>
    %232 = arith.mulf %227, %231 : vector<2x32xf32>
    %233 = vector.extract_strided_slice %11 {offsets = [12, 0], sizes = [2, 128], strides = [1, 1]} : vector<16x256xf32> to vector<2x128xf32>
    %234 = vector.extract_strided_slice %11 {offsets = [2, 128], sizes = [2, 128], strides = [1, 1]} : vector<16x256xf32> to vector<2x128xf32>
    %cst_28 = arith.constant dense<0.000000e+00> : vector<2x128xf32>
    %235 = tpu.matmul %214, %13, %cst_28 {dimension_numbers = #tpu.dot_dimension_numbers<[1], [0], [0], [1], [0, 0, 1, 1], [], []>, precision = #tpu.contract_precision<fp32>} : vector<2x32xf32>, vector<32x128xf32>, vector<2x128xf32> -> vector<2x128xf32>
    %236 = arith.addf %233, %235 : vector<2x128xf32>
    %237 = vector.extract_strided_slice %236 {offsets = [0, 0], sizes = [2, 96], strides = [1, 1]} : vector<2x128xf32> to vector<2x96xf32>
    %238 = arith.negf %237 : vector<2x96xf32>
    %239 = math.exp %238 : vector<2x96xf32>
    %cst_29 = arith.constant 1.000000e+00 : f32
    %240 = vector.broadcast %cst_29 : f32 to vector<2x96xf32>
    %241 = arith.addf %240, %239 : vector<2x96xf32>
    %242 = arith.divf %240, %241 : vector<2x96xf32>
    %243 = vector.extract_strided_slice %236 {offsets = [0, 96], sizes = [2, 32], strides = [1, 1]} : vector<2x128xf32> to vector<2x32xf32>
    %244 = math.tanh %243 : vector<2x32xf32>
    %245 = vector.extract_strided_slice %242 {offsets = [0, 0], sizes = [2, 32], strides = [1, 1]} : vector<2x96xf32> to vector<2x32xf32>
    %246 = vector.extract_strided_slice %242 {offsets = [0, 32], sizes = [2, 32], strides = [1, 1]} : vector<2x96xf32> to vector<2x32xf32>
    %247 = vector.extract_strided_slice %242 {offsets = [0, 64], sizes = [2, 32], strides = [1, 1]} : vector<2x96xf32> to vector<2x32xf32>
    %248 = arith.mulf %246, %212 : vector<2x32xf32>
    %249 = arith.mulf %245, %244 : vector<2x32xf32>
    %250 = arith.addf %248, %249 : vector<2x32xf32>
    %251 = math.tanh %250 : vector<2x32xf32>
    %252 = arith.mulf %247, %251 : vector<2x32xf32>
    %cst_30 = arith.constant dense<0.000000e+00> : vector<2x128xf32>
    %253 = tpu.matmul %232, %14, %cst_30 {dimension_numbers = #tpu.dot_dimension_numbers<[1], [0], [0], [1], [0, 0, 1, 1], [], []>, precision = #tpu.contract_precision<fp32>} : vector<2x32xf32>, vector<32x128xf32>, vector<2x128xf32> -> vector<2x128xf32>
    %254 = arith.addf %234, %253 : vector<2x128xf32>
    %255 = vector.extract_strided_slice %254 {offsets = [0, 0], sizes = [2, 96], strides = [1, 1]} : vector<2x128xf32> to vector<2x96xf32>
    %256 = arith.negf %255 : vector<2x96xf32>
    %257 = math.exp %256 : vector<2x96xf32>
    %cst_31 = arith.constant 1.000000e+00 : f32
    %258 = vector.broadcast %cst_31 : f32 to vector<2x96xf32>
    %259 = arith.addf %258, %257 : vector<2x96xf32>
    %260 = arith.divf %258, %259 : vector<2x96xf32>
    %261 = vector.extract_strided_slice %254 {offsets = [0, 96], sizes = [2, 32], strides = [1, 1]} : vector<2x128xf32> to vector<2x32xf32>
    %262 = math.tanh %261 : vector<2x32xf32>
    %263 = vector.extract_strided_slice %260 {offsets = [0, 0], sizes = [2, 32], strides = [1, 1]} : vector<2x96xf32> to vector<2x32xf32>
    %264 = vector.extract_strided_slice %260 {offsets = [0, 32], sizes = [2, 32], strides = [1, 1]} : vector<2x96xf32> to vector<2x32xf32>
    %265 = vector.extract_strided_slice %260 {offsets = [0, 64], sizes = [2, 32], strides = [1, 1]} : vector<2x96xf32> to vector<2x32xf32>
    %266 = arith.mulf %264, %230 : vector<2x32xf32>
    %267 = arith.mulf %263, %262 : vector<2x32xf32>
    %268 = arith.addf %266, %267 : vector<2x32xf32>
    %269 = math.tanh %268 : vector<2x32xf32>
    %270 = arith.mulf %265, %269 : vector<2x32xf32>
    %271 = vector.extract_strided_slice %11 {offsets = [14, 0], sizes = [2, 128], strides = [1, 1]} : vector<16x256xf32> to vector<2x128xf32>
    %272 = vector.extract_strided_slice %11 {offsets = [0, 128], sizes = [2, 128], strides = [1, 1]} : vector<16x256xf32> to vector<2x128xf32>
    %cst_32 = arith.constant dense<0.000000e+00> : vector<2x128xf32>
    %273 = tpu.matmul %252, %13, %cst_32 {dimension_numbers = #tpu.dot_dimension_numbers<[1], [0], [0], [1], [0, 0, 1, 1], [], []>, precision = #tpu.contract_precision<fp32>} : vector<2x32xf32>, vector<32x128xf32>, vector<2x128xf32> -> vector<2x128xf32>
    %274 = arith.addf %271, %273 : vector<2x128xf32>
    %275 = vector.extract_strided_slice %274 {offsets = [0, 0], sizes = [2, 96], strides = [1, 1]} : vector<2x128xf32> to vector<2x96xf32>
    %276 = arith.negf %275 : vector<2x96xf32>
    %277 = math.exp %276 : vector<2x96xf32>
    %cst_33 = arith.constant 1.000000e+00 : f32
    %278 = vector.broadcast %cst_33 : f32 to vector<2x96xf32>
    %279 = arith.addf %278, %277 : vector<2x96xf32>
    %280 = arith.divf %278, %279 : vector<2x96xf32>
    %281 = vector.extract_strided_slice %274 {offsets = [0, 96], sizes = [2, 32], strides = [1, 1]} : vector<2x128xf32> to vector<2x32xf32>
    %282 = math.tanh %281 : vector<2x32xf32>
    %283 = vector.extract_strided_slice %280 {offsets = [0, 0], sizes = [2, 32], strides = [1, 1]} : vector<2x96xf32> to vector<2x32xf32>
    %284 = vector.extract_strided_slice %280 {offsets = [0, 32], sizes = [2, 32], strides = [1, 1]} : vector<2x96xf32> to vector<2x32xf32>
    %285 = vector.extract_strided_slice %280 {offsets = [0, 64], sizes = [2, 32], strides = [1, 1]} : vector<2x96xf32> to vector<2x32xf32>
    %286 = arith.mulf %284, %250 : vector<2x32xf32>
    %287 = arith.mulf %283, %282 : vector<2x32xf32>
    %288 = arith.addf %286, %287 : vector<2x32xf32>
    %289 = math.tanh %288 : vector<2x32xf32>
    %290 = arith.mulf %285, %289 : vector<2x32xf32>
    %cst_34 = arith.constant dense<0.000000e+00> : vector<2x128xf32>
    %291 = tpu.matmul %270, %14, %cst_34 {dimension_numbers = #tpu.dot_dimension_numbers<[1], [0], [0], [1], [0, 0, 1, 1], [], []>, precision = #tpu.contract_precision<fp32>} : vector<2x32xf32>, vector<32x128xf32>, vector<2x128xf32> -> vector<2x128xf32>
    %292 = arith.addf %272, %291 : vector<2x128xf32>
    %293 = vector.extract_strided_slice %292 {offsets = [0, 0], sizes = [2, 96], strides = [1, 1]} : vector<2x128xf32> to vector<2x96xf32>
    %294 = arith.negf %293 : vector<2x96xf32>
    %295 = math.exp %294 : vector<2x96xf32>
    %cst_35 = arith.constant 1.000000e+00 : f32
    %296 = vector.broadcast %cst_35 : f32 to vector<2x96xf32>
    %297 = arith.addf %296, %295 : vector<2x96xf32>
    %298 = arith.divf %296, %297 : vector<2x96xf32>
    %299 = vector.extract_strided_slice %292 {offsets = [0, 96], sizes = [2, 32], strides = [1, 1]} : vector<2x128xf32> to vector<2x32xf32>
    %300 = math.tanh %299 : vector<2x32xf32>
    %301 = vector.extract_strided_slice %298 {offsets = [0, 0], sizes = [2, 32], strides = [1, 1]} : vector<2x96xf32> to vector<2x32xf32>
    %302 = vector.extract_strided_slice %298 {offsets = [0, 32], sizes = [2, 32], strides = [1, 1]} : vector<2x96xf32> to vector<2x32xf32>
    %303 = vector.extract_strided_slice %298 {offsets = [0, 64], sizes = [2, 32], strides = [1, 1]} : vector<2x96xf32> to vector<2x32xf32>
    %304 = arith.mulf %302, %268 : vector<2x32xf32>
    %305 = arith.mulf %301, %300 : vector<2x32xf32>
    %306 = arith.addf %304, %305 : vector<2x32xf32>
    %307 = math.tanh %306 : vector<2x32xf32>
    %308 = arith.mulf %303, %307 : vector<2x32xf32>
    %c0_36 = arith.constant 0 : index
    %c0_37 = arith.constant 0 : index
    %309 = vector.load %arg2[%c0_36, %c0_37] : memref<65x2xf32, #tpu.memory_space<vmem>>, vector<32x2xf32>
    %cst_38 = arith.constant dense<0.000000e+00> : vector<2x2xf32>
    %310 = tpu.matmul %290, %309, %cst_38 {dimension_numbers = #tpu.dot_dimension_numbers<[1], [0], [0], [1], [0, 0, 1, 1], [], []>, precision = #tpu.contract_precision<fp32>} : vector<2x32xf32>, vector<32x2xf32>, vector<2x2xf32> -> vector<2x2xf32>
    %c32 = arith.constant 32 : index
    %c0_39 = arith.constant 0 : index
    %311 = vector.load %arg2[%c32, %c0_39] : memref<65x2xf32, #tpu.memory_space<vmem>>, vector<32x2xf32>
    %cst_40 = arith.constant dense<0.000000e+00> : vector<2x2xf32>
    %312 = tpu.matmul %308, %311, %cst_40 {dimension_numbers = #tpu.dot_dimension_numbers<[1], [0], [0], [1], [0, 0, 1, 1], [], []>, precision = #tpu.contract_precision<fp32>} : vector<2x32xf32>, vector<32x2xf32>, vector<2x2xf32> -> vector<2x2xf32>
    %313 = arith.addf %310, %312 : vector<2x2xf32>
    %c64 = arith.constant 64 : index
    %c0_41 = arith.constant 0 : index
    %314 = vector.load %arg2[%c64, %c0_41] : memref<65x2xf32, #tpu.memory_space<vmem>>, vector<1x2xf32>
    %315 = vector.broadcast %314 : vector<1x2xf32> to vector<2x2xf32>
    %316 = arith.addf %313, %315 : vector<2x2xf32>
    %c0_42 = arith.constant 0 : index
    %c0_43 = arith.constant 0 : index
    %317 = vector.load %arg3[%c0_42, %c0_43] : memref<2x2xf32, #tpu.memory_space<vmem>>, vector<2x2xf32>
    tpu.vector_store %arg3[%c0_42, %c0_43], %316 {strides = array<i32>} : memref<2x2xf32, #tpu.memory_space<vmem>>, vector<2x2xf32>,
    return
  }
}

</mosaic_0001>

<bundles_post_ra>
// kernel: sentiment_lstm_forward.1
= control target key start
LH: loop header
LB: loop body
LE: loop exit
PB: predicated region body
PF: predicated region fallthrough
CT: control target
= control target key end

     0   :  { %8 = vsyncpa [#allocation3], 0  ;;  %s12710_s0 = inlined_call_operand.vmem [shape: s32[16,1], index: 0, kind: input, shape index: {}]   ;;  %s12711_s1 = inlined_call_operand.hbm [shape: f32[88,256], index: 1, kind: input, shape index: {}]   ;;  %s12712_s2 = inlined_call_operand.vmem [shape: f32[65,2], index: 2, kind: input, shape index: {}]   ;;  %s12713_s3 = inlined_call_operand.hbm [shape: f32[2,2], index: 3, kind: output, shape index: {}]  }
   0x1   :  { %9 = vsyncpa [#allocation4], 0  ;;  %s11618_s12 = smov [#allocation2]   ;;  %s11570_s16 = scalar_lea.hbm %s12711_s1, 2816 }
   0x2   :  { %s17_s13 = sshll.u32 %s11618_s12, 4  ;;  %p11571_p0 = scmp.ne.s32.totalorder %s12711_s1, %s11570_s16  ;;  %s18_s13 = int_to_ptr.vmem [resolvable:$true] %s17_s13 }
   0x3   :  { %p11574_p1 = scmp.lt.u32.totalorder %s11570_s16, %s12711_s1 }
   0x5   :  { %p11576_p2 = pnand %p11574_p1, %p11571_p0 }
   0x7   :  { %11579 = shalt.err (!%p11576_p2)
}
   0x8   :  { %s11580_s21 = scalar_lea.vmem %s18_s13, 2816  ;;  %p11585_p4 = scmp.lt.s32.totalorder %s18_s13, %s18_s13 }
   0x9   :  { %p11581_p3 = scmp.ne.s32.totalorder %s18_s13, %s11580_s21  ;;  %p11586_p5 = scmp.lt.s32.totalorder %s11580_s21, %s11580_s21 }
   0xb   :  { %p11587_p6 = por %p11586_p5, %p11585_p4 }
   0xd   :  { %p11588_p7 = pnand %p11587_p6, %p11581_p3 }
   0xf   :  { %11591 = shalt.err (!%p11588_p7)
}
  0x10   :  { %s11619_s22 = smov 256   ;;  %s11620_s23 = smov 16  }
  0x11   :  { %23 = dma.hbm_to_vmem [thread:$0]  %s12711_s1, 2816, %s18_s13, [#allocation3], %s11619_s22, %s11619_s22, %s11620_s23  }
  0x12   :  { %11614 = dma.done.wait [#allocation3], 2816  }
  0x13   :  { %11615 = vsyncadd [#allocation3], 4294964480  ;;  %v11621_v0 = vmov 0   ;;  %v11622_v1 = vmov 0.0   ;;  %v29_v2 = vld [vmem:[%s12710_s0] sm:$0xff]  ;;  %v30_v3 = vld [vmem:[%s12710_s0 + $0x8] sm:$0xff] }
  0x14   :  { %11441 = vset.pattern.permute.xlu0 %v11621_v0  ;;  %145 = vmatprep.mubr.f32.mxu0 %v11622_v1  ;;  %v47_v4 = vld [vmem:[#allocation2 + $0x8] sm:$0xff]  ;;  %v49_v5 = vld [vmem:[#allocation2 + $0x18] sm:$0xff]  ;;  %v46_v7 = vld [vmem:[#allocation2] sm:$0xff]  ;;  %vm60_vm1 = vcmask 457728   ;;  %s11623_s0 = smov 32   ;;  %s11624_s1 = smov 64  }
  0x15   :  { %34 = vperm.xlu0 %11441, %v29_v2   ;;  %v67_v6 = vand.u32 4294901760, %v47_v4  ;;  %v48_v8 = vld [vmem:[#allocation2 + $0x10] sm:$0xff]  ;;  %v71_v9 = vand.u32 4294901760, %v49_v5  ;;  %v69_v10 = vand.u32 4294901760, %v46_v7  ;;  %v51_v12 = vld [vmem:[#allocation2 + $0x28] sm:$0xff]  ;;  %v53_v13 = vld [vmem:[#allocation2 + $0x38] sm:$0xff] }
  0x16   :  { %v73_v11 = vand.u32 4294901760, %v48_v8  ;;  %v50_v14 = vld [vmem:[#allocation2 + $0x20] sm:$0xff]  ;;  %v75_v16 = vand.u32 4294901760, %v51_v12  ;;  %v79_v17 = vand.u32 4294901760, %v53_v13  ;;  %v52_v18 = vld [vmem:[#allocation2 + $0x30] sm:$0xff]  ;;  %v55_v20 = vld [vmem:[#allocation2 + $0x48] sm:$0xff] }
  0x17   :  { %v11667_v15 = vsub.f32 %v47_v4, %v67_v6  ;;  %v77_v19 = vand.u32 4294901760, %v50_v14  ;;  %v57_v21 = vld [vmem:[#allocation2 + $0x58] sm:$0xff]  ;;  %v11669_v22 = vpack.c.bf16 %v71_v9, %v67_v6  ;;  %v11671_v23 = vsub.f32 %v49_v5, %v71_v9  ;;  %v54_v26 = vld [vmem:[#allocation2 + $0x40] sm:$0xff]  ;;  %v56_v27 = vld [vmem:[#allocation2 + $0x50] sm:$0xff]  ;;  %s11627_s21 = smov [#allocation5]  }
  0x18   :  { %v11673_v24 = vpack.c.bf16 %v73_v11, %v69_v10  ;;  %v11675_v25 = vsub.f32 %v46_v7, %v69_v10  ;;  %v11677_v28 = vsub.f32 %v48_v8, %v73_v11  ;;  %v11679_v29 = vpack.c.bf16 %v79_v17, %v75_v16  ;;  %v11689_v38 = vld [vmem:[#allocation2 + $0x68] sm:$0xff]  ;;  %v11709_v48 = vld [vmem:[#allocation2 + $0x60] sm:$0xff]  ;;  %s9085_s22 = sshll.u32 %s11627_s21, 4  ;;  %s9086_s22 = int_to_ptr.vmem [resolvable:$true] %s9085_s22 }
  0x19   :  { %37 = vperm.xlu0 %11441, %v30_v3   ;;  %v11681_v30 = vsub.f32 %v51_v12, %v75_v16  ;;  %v11683_v31 = vsub.f32 %v53_v13, %v79_v17  ;;  %10654 = vmatprep.subr.bf16.mxu0 %v11669_v22  ;;  %v81_v32 = vand.u32 4294901760, %v52_v18  ;;  %v11686_v33 = vsub.f32 %v50_v14, %v77_v19  ;;  %s11592_s23 = scalar_lea.vmem %s9086_s22, 32  ;;  %p11597_p9 = scmp.lt.s32.totalorder %s9086_s22, %s9086_s22 }
  0x1a   :  { %v83_v34 = vand.u32 4294901760, %v55_v20  ;;  %v87_v35 = vand.u32 4294901760, %v57_v21  ;;  %10656 = vmatpush1.bf16.msra.mxu0 %v11673_v24  ;;  %v85_v36 = vand.u32 4294901760, %v54_v26  ;;  %v89_v37 = vand.u32 4294901760, %v56_v27  ;;  %p11593_p8 = scmp.ne.s32.totalorder %s9086_s22, %s11592_s23  ;;  %p11598_p10 = scmp.lt.s32.totalorder %s11592_s23, %s11592_s23 }
  0x1b   :  { %v170_v39 = vand.u32 4294901760, %v11667_v15  ;;  %v182_v40 = vand.u32 4294901760, %v11671_v23  ;;  %10658 = vmatprep.subr.bf16.mxu0 %v11679_v29  ;;  %v11694_v41 = vpack.c.bf16 %v81_v32, %v77_v19  ;;  %v11696_v42 = vsub.f32 %v52_v18, %v81_v32 }
  0x1c   :  { %v11698_v43 = vpack.c.bf16 %v87_v35, %v83_v34  ;;  %v11700_v44 = vsub.f32 %v55_v20, %v83_v34  ;;  %v11702_v45 = vsub.f32 %v57_v21, %v87_v35  ;;  %v11704_v46 = vsub.f32 %v54_v26, %v85_v36  ;;  %p11599_p11 = por %p11598_p10, %p11597_p9 }
  0x1d   :  { %v11707_v47 = vand.u32 4294901760, %v11689_v38  ;;  %v11711_v49 = vpack.c.bf16 %v89_v37, %v85_v36  ;;  %v11713_v50 = vsub.f32 %v56_v27, %v89_v37  ;;  %v171_v51 = vsub.f32 %v11667_v15, %v170_v39 }
  0x1e   :  { %v183_v52 = vsub.f32 %v11671_v23, %v182_v40  ;;  %10660 = vmatpush1.bf16.msra.mxu0 %v11694_v41  ;;  %v176_v53 = vand.u32 4294901760, %v11675_v25  ;;  %v188_v54 = vand.u32 4294901760, %v11677_v28  ;;  %v194_v55 = vand.u32 4294901760, %v11681_v30  ;;  %p11600_p12 = pnand %p11599_p11, %p11593_p8 }
  0x1f   :  { %v206_v56 = vand.u32 4294901760, %v11683_v31  ;;  %10662 = vmatprep.subr.bf16.mxu0 %v11698_v43  ;;  %v11728_v57 = vand.u32 4294901760, %v11709_v48  ;;  %v172_v58 = vand.u32 4294901760, %v171_v51  ;;  %v200_v60 = vand.u32 4294901760, %v11686_v33 }
  0x20   :  { %v184_v59 = vand.u32 4294901760, %v183_v52  ;;  %v177_v61 = vsub.f32 %v11675_v25, %v176_v53  ;;  %v189_v62 = vsub.f32 %v11677_v28, %v188_v54  ;;  %v195_v63 = vsub.f32 %v11681_v30, %v194_v55 }
  0x21   :  { %v207_v0 = vsub.f32 %v11683_v31, %v206_v56  ;;  %v201_v3 = vsub.f32 %v11686_v33, %v200_v60  ;;  %v212_v4 = vand.u32 4294901760, %v11696_v42  ;;  %v218_v5 = vand.u32 4294901760, %v11700_v44 }
  0x22   :  { %v10665_v2 = vpack.c.bf16 %v184_v59, %v172_v58  ;;  %10664 = vmatpush1.bf16.msra.mxu0 %v11711_v49  ;;  %v178_v6 = vand.u32 4294901760, %v177_v61  ;;  %v190_v7 = vand.u32 4294901760, %v189_v62  ;;  %v196_v8 = vand.u32 4294901760, %v195_v63 }
  0x23   :  { %v208_v9 = vand.u32 4294901760, %v207_v0  ;;  %92 = vmatprep.subr.mxu0 %v11707_v47  ;;  %v202_v10 = vand.u32 4294901760, %v201_v3  ;;  %v213_v11 = vsub.f32 %v11696_v42, %v212_v4  ;;  %v219_v12 = vsub.f32 %v11700_v44, %v218_v5 }
  0x24   :  { %v230_v13 = vand.u32 4294901760, %v11702_v45  ;;  %v10667_v14 = vpack.c.bf16 %v190_v7, %v178_v6  ;;  %v224_v17 = vand.u32 4294901760, %v11704_v46  ;;  %v236_v18 = vand.u32 4294901760, %v11713_v50 }
  0x25   :  { %v10669_v16 = vpack.c.bf16 %v208_v9, %v196_v8  ;;  %v214_v19 = vand.u32 4294901760, %v213_v11  ;;  %v220_v20 = vand.u32 4294901760, %v219_v12  ;;  %v10677_v52 = vpack.c.bf16 %v11671_v23, %v11667_v15 }
  0x26   :  { %v231_v21 = vsub.f32 %v11702_v45, %v230_v13  ;;  %94 = vmatpush1.msra.mxu0 %v11728_v57  ;;  %v225_v26 = vsub.f32 %v11704_v46, %v224_v17  ;;  %v237_v27 = vsub.f32 %v11713_v50, %v236_v18  ;;  %v10679_v58 = vpack.c.bf16 %v11677_v28, %v11675_v25 }
  0x27   :  { %10666 = vmatprep.subr.bf16.mxu0 %v10665_v2  ;;  %v10671_v32 = vpack.c.bf16 %v214_v19, %v202_v10  ;;  %v10681_v59 = vpack.c.bf16 %v11683_v31, %v11681_v30  ;;  %v10683_v61 = vpack.c.bf16 %v11696_v42, %v11686_v33  ;;  %v10685_v62 = vpack.c.bf16 %v11702_v45, %v11700_v44 }
  0x28   :  { %v232_v34 = vand.u32 4294901760, %v231_v21  ;;  %v226_v35 = vand.u32 4294901760, %v225_v26  ;;  %v238_v36 = vand.u32 4294901760, %v237_v27  ;;  %v10687_v63 = vpack.c.bf16 %v11713_v50, %v11704_v46  ;;  %v737_v27 = vld [vmem:[#allocation2 + $0x70] sm:$0xff] }
  0x29   :  { %v11765_v0 = vpack.c.bf16 %v182_v40, %v170_v39  ;;  %v11767_v2 = vpack.c.bf16 %v188_v54, %v176_v53  ;;  %v11769_v25 = vpack.c.bf16 %v206_v56, %v194_v55  ;;  %v11771_v28 = vpack.c.bf16 %v212_v4, %v200_v60 }
  0x2a   :  { %v10673_v37 = vpack.c.bf16 %v232_v34, %v220_v20  ;;  %v10675_v51 = vpack.c.bf16 %v238_v36, %v226_v35  ;;  %v11773_v30 = vpack.c.bf16 %v230_v13, %v218_v5  ;;  %v11775_v31 = vpack.c.bf16 %v236_v18, %v224_v17 }
  0x2b   :  { %v31_v33 = vlaneseq  ;;  %v241_v50 = vsub.f32 %v11689_v38, %v11707_v47  ;;  %v247_v56 = vsub.f32 %v11709_v48, %v11728_v57  ;;  %v788_v34 = vand.u32 4294901760, %v737_v27 }
  0x2c   :  { %vm11626_vm6 = vmmov 0   ;;  %vm784_vm7 = vcmask 261120   ;;  %vm9077_vm8 = vcmask 9216  }
  0x2d   :  { %v32_v42 = vand.u32 127, %v31_v33  ;;  %v242_v4 = vand.u32 4294901760, %v241_v50  ;;  %v248_v6 = vand.u32 4294901760, %v247_v56  ;;  %9605 = vmatprep.mubr.msk.f32.mxu1 %vm11626_vm6, %v11622_v1 }
  0x2f   :  { %vm41_vm0 = vcmp.eq.s32.totalorder %v32_v42, 55  ;;  %v243_v38 = vsub.f32 %v241_v50, %v242_v4  ;;  %v249_v8 = vsub.f32 %v247_v56, %v248_v6 }
  0x31   :  { %v244_v9 = vand.u32 4294901760, %v243_v38  ;;  %v250_v48 = vand.u32 4294901760, %v249_v8 }
  0x94   :  { %v35_v44 = vpop.permute.xlu0 %34 }
  0x95   :  { %vm39_vm2 = vcmp.eq.s32.totalorder %v32_v42, %v35_v44 }
  0x96   :  { %vm42_vm3 = vmor %vm39_vm2, %vm41_vm0 }
  0x97   :  { %v11778_v15 = vsel %vm42_vm3, 1.0, %v11622_v1 }
  0x98   :  { %v62_v23 = vsel %vm60_vm1, %v11778_v15, 0  ;;  %v38_v39 = vpop.permute.xlu0 %37 }
  0x99   :  { %v147_v40 = vsub.f32 %v62_v23, %v62_v23  ;;  %vm40_vm4 = vcmp.eq.s32.totalorder %v32_v42, %v38_v39 }
  0x9a   :  { %vm43_vm5 = vmor %vm40_vm4, %vm41_vm0 }
  0x9b   :  { %v11783_v45 = vsel %vm43_vm5, 1.0, %v11622_v1  ;;  %v148_v46 = vand.u32 4294901760, %v147_v40 }
  0x9c   :  { %v65_v53 = vsel %vm60_vm1, %v11783_v45, 0 }
  0x9d   :  { %v158_v54 = vsub.f32 %v65_v53, %v65_v53  ;;  %v149_v55 = vsub.f32 %v147_v40, %v148_v46 }
  0x9f   :  { %v150_v60 = vand.u32 4294901760, %v149_v55  ;;  %v159_v3 = vand.u32 4294901760, %v158_v54 }
  0xa1   :  { %151 = vmatmul.mubr.f32.vlgmr.msra.gmra.mrb[0].mxu0 %v150_v60  ;;  %v160_v5 = vsub.f32 %v158_v54, %v159_v3 }
  0xa2   :  { %10668 = vmatpush1.bf16.msra.mxu0 %v10667_v14  ;;  %156 = vmatprep.mubr.f32.mxu0 %v11622_v1 }
  0xa3   :  { %10670 = vmatprep.subr.bf16.mxu0 %v10669_v16  ;;  %v161_v7 = vand.u32 4294901760, %v160_v5 }
  0xa5   :  { %162 = vmatmul.mubr.f32.gmra.mrb[2].mxu0 %v161_v7 }
  0xa6   :  { %10672 = vmatpush1.bf16.msra.mxu0 %v10671_v32  ;;  %302 = vmatprep.mubr.f32.mxu0 %v11622_v1  ;;  %v739_v32 = vld [vmem:[#allocation2 + $0x80] sm:$0xff] }
  0xa7   :  { %10674 = vmatprep.subr.bf16.mxu0 %v10673_v37  ;;  %v791_v35 = vand.u32 4294901760, %v739_v32  ;;  %v868_v37 = vsub.f32 %v737_v27, %v788_v34 }
  0xa9   :  { %v11858_v36 = vpack.c.bf16 %v791_v35, %v788_v34 }
  0xaa   :  { %10676 = vmatpush1.bf16.msra.mxu0 %v10675_v51  ;;  %v875_v51 = vsub.f32 %v739_v32, %v791_v35 }
  0xab   :  { %245 = vmatprep.subr.mxu0 %v244_v9 }
  0xae   :  { %251 = vmatpush1.msra.mxu0 %v250_v48 }
  0xaf   :  { %9094 = vmatmul.mubr.msk.f32.vlgmr.msra.gmra.mrb[0].mxu0 %vm60_vm1, %v11778_v15  ;;  %10678 = vmatprep.subr.bf16.mxu0 %v10677_v52  ;;  %v11625_v52 = vmov 0.0|0.0  }
  0xb0   :  { %10680 = vmatpush1.bf16.msra.mxu0 %v10679_v58  ;;  %309 = vmatprep.mubr.f32.mxu0 %v11622_v1  ;;  %v741_v58 = vld [vmem:[#allocation2 + $0x90] sm:$0xff] }
  0xb1   :  { %10682 = vmatprep.subr.bf16.mxu0 %v10681_v59  ;;  %10725 = vmatprep.subr.bf16.mxu1 %v11625_v52  ;;  %v743_v59 = vld [vmem:[#allocation2 + $0xa0] sm:$0xff] }
  0xb2   :  { %10727 = vmatpush3.bf16.msra.mxu1 %v11858_v36 }
  0xb3   :  { %9095 = vmatmul.mubr.msk.f32.gmra.mrb[2].mxu0 %vm60_vm1, %v11783_v45  ;;  %10728 = vmatprep.subr.bf16.mxu1 %v11625_v52 }
  0xb4   :  { %10684 = vmatpush1.bf16.msra.mxu0 %v10683_v61  ;;  %409 = vmatprep.mubr.f32.mxu0 %v11622_v1  ;;  %v794_v61 = vand.u32 4294901760, %v741_v58 }
  0xb5   :  { %10686 = vmatprep.subr.bf16.mxu0 %v10685_v62  ;;  %v797_v62 = vand.u32 4294901760, %v743_v59 }
  0xb8   :  { %10688 = vmatpush1.bf16.msra.mxu0 %v10687_v63  ;;  %v869_v63 = vand.u32 4294901760, %v868_v37 }
  0xb9   :  { %355 = vmatprep.subr.mxu0 %v241_v50 }
  0xbc   :  { %358 = vmatpush1.msra.mxu0 %v247_v56 }
  0xbd   :  { %412 = vmatmul.mubr.f32.vlgmr.msra.gmra.mrb[0].mxu0 %v147_v40  ;;  %10690 = vmatprep.subr.bf16.mxu0 %v11669_v22 }
  0xbe   :  { %10692 = vmatpush1.bf16.msra.mxu0 %v11673_v24  ;;  %417 = vmatprep.mubr.f32.mxu0 %v11622_v1 }
  0xbf   :  { %10694 = vmatprep.subr.bf16.mxu0 %v11679_v29 }
  0xc1   :  { %420 = vmatmul.mubr.f32.gmra.mrb[2].mxu0 %v158_v54 }
  0xc2   :  { %10696 = vmatpush1.bf16.msra.mxu0 %v11694_v41  ;;  %504 = vmatprep.mubr.f32.mxu0 %v11622_v1 }
  0xc3   :  { %10698 = vmatprep.subr.bf16.mxu0 %v11698_v43 }
  0xc6   :  { %10700 = vmatpush1.bf16.msra.mxu0 %v11711_v49 }
  0xc7   :  { %451 = vmatprep.subr.mxu0 %v11707_v47 }
  0xca   :  { %453 = vmatpush1.msra.mxu0 %v11728_v57 }
  0xcb   :  { %508 = vmatmul.mubr.f32.vlgmr.msra.gmra.mrb[0].mxu0 %v148_v46  ;;  %10702 = vmatprep.subr.bf16.mxu0 %v11765_v0  ;;  %v876_v0 = vand.u32 4294901760, %v875_v51 }
  0xcc   :  { %10704 = vmatpush1.bf16.msra.mxu0 %v11767_v2  ;;  %513 = vmatprep.mubr.f32.mxu0 %v11622_v1  ;;  %v11866_v2 = vpack.c.bf16 %v797_v62, %v794_v61 }
  0xcd   :  { %10706 = vmatprep.subr.bf16.mxu0 %v11769_v25  ;;  %v870_v25 = vsub.f32 %v868_v37, %v869_v63  ;;  %v11886_v5 = vpack.c.bf16 %v876_v0, %v869_v63 }
  0xce   :  { %10730 = vmatpush3.bf16.msra.mxu1 %v11866_v2 }
  0xcf   :  { %517 = vmatmul.mubr.f32.gmra.mrb[2].mxu0 %v159_v3  ;;  %v871_v33 = vand.u32 4294901760, %v870_v25  ;;  %10731 = vmatprep.subr.bf16.mxu1 %v11625_v52  ;;  %v11881_v3 = vpack.c.bf16 %v875_v51, %v868_v37 }
  0xd0   :  { %10708 = vmatpush1.bf16.msra.mxu0 %v11771_v28  ;;  %629 = vmatprep.mubr.f32.mxu0 %v11622_v1  ;;  %v877_v28 = vsub.f32 %v875_v51, %v876_v0 }
  0xd1   :  { %10710 = vmatprep.subr.bf16.mxu0 %v11773_v30  ;;  %v882_v30 = vsub.f32 %v741_v58, %v794_v61 }
  0xd2   :  { %v878_v42 = vand.u32 4294901760, %v877_v28 }
  0xd3   :  { %v883_v44 = vand.u32 4294901760, %v882_v30 }
  0xd4   :  { %10712 = vmatpush1.bf16.msra.mxu0 %v11775_v31  ;;  %v889_v31 = vsub.f32 %v743_v59, %v797_v62  ;;  %v11872_v23 = vpack.c.bf16 %v878_v42, %v871_v33 }
  0xd5   :  { %574 = vmatprep.subr.mxu0 %v242_v4  ;;  %v884_v40 = vsub.f32 %v882_v30, %v883_v44 }
  0xd6   :  { %v11884_v4 = vpack.c.bf16 %v889_v31, %v882_v30 }
  0xd7   :  { %v885_v50 = vand.u32 4294901760, %v884_v40 }
  0xd8   :  { %578 = vmatpush1.msra.mxu0 %v248_v6 }
  0xd9   :  { %9096 = vmatmul.mubr.msk.f32.vlgmr.msra.gmra.mrb[0].mxu0 %vm60_vm1, %v11778_v15  ;;  %10714 = vmatprep.subr.bf16.mxu0 %v11669_v22 }
  0xda   :  { %10716 = vmatpush1.bf16.msra.mxu0 %v11673_v24  ;;  %636 = vmatprep.mubr.f32.mxu0 %v11622_v1 }
  0xdb   :  { %10718 = vmatprep.subr.bf16.mxu0 %v11679_v29 }
  0xdd   :  { %9097 = vmatmul.mubr.msk.f32.gmra.mrb[2].mxu0 %vm60_vm1, %v11783_v45 }
  0xde   :  { %10720 = vmatpush1.bf16.msra.mxu0 %v11694_v41  ;;  %722 = vmatprep.mubr.f32.mxu0 %v11622_v1 }
  0xdf   :  { %10722 = vmatprep.subr.bf16.mxu0 %v11698_v43 }
  0xe2   :  { %10724 = vmatpush1.bf16.msra.mxu0 %v11711_v49 }
  0xe3   :  { %669 = vmatprep.subr.mxu0 %v11707_v47 }
  0xe6   :  { %671 = vmatpush1.msra.mxu0 %v11728_v57 }
  0xe7   :  { %9098 = vmatmul.mubr.msk.f32.vlgmr.msra.gmra.mrb[0].mxu0 %vm60_vm1, %v11778_v15  ;;  %10797 = vmatprep.subr.bf16.mxu0 %v11625_v52  ;;  %v890_v15 = vand.u32 4294901760, %v889_v31 }
  0xe8   :  { %729 = vmatprep.mubr.f32.mxu0 %v11622_v1  ;;  %10799 = vmatpush3.bf16.msra.mxu0 %v11858_v36 }
  0xe9   :  { %10800 = vmatprep.subr.bf16.mxu0 %v11625_v52  ;;  %v11888_v6 = vpack.c.bf16 %v890_v15, %v883_v44 }
  0xeb   :  { %9099 = vmatmul.mubr.msk.f32.gmra.mrb[2].mxu0 %vm60_vm1, %v11783_v45  ;;  %v891_v45 = vsub.f32 %v889_v31, %v890_v15 }
  0xec   :  { %10802 = vmatpush3.bf16.msra.mxu0 %v11866_v2  ;;  %9737 = vmatprep.mubr.msk.f32.mxu0 %vm11626_vm6, %v11622_v1 }
  0xed   :  { %10803 = vmatprep.subr.bf16.mxu0 %v11625_v52  ;;  %v892_v53 = vand.u32 4294901760, %v891_v45 }
  0xef   :  { %v11879_v54 = vpack.c.bf16 %v892_v53, %v885_v50 }
 0x1ba   :  { %v11836_v22 = vpop.f32.mrb[0].mxu0 }
 0x1bb   :  { %11442 = vtanh.f32 %v11836_v22  ;;  %v11839_v24 = vpop.f32.mrb[1].mxu0  ;;  %v9100_v49 = vmul.f32 -1.442695, %v11836_v22 }
 0x1be   :  { %v11841_v29 = vpop.f32.mrb[2].mxu0 }
 0x1bf   :  { %v11843_v41 = vpop.f32.mrb[3].mxu0 }
 0x1c0   :  { %11444 = vtanh.f32 %v11843_v41  ;;  %v9101_v57 = vmul.f32 -1.442695, %v11843_v41 }
 0x1c1   :  { %11446 = vpow2.f32 %v9100_v49  ;;  %v738_v49 = vld [vmem:[#allocation2 + $0x78] sm:$0xff] }
 0x1c2   :  { %11448 = vpow2.f32 %v9101_v57  ;;  %v740_v57 = vld [vmem:[#allocation2 + $0x88] sm:$0xff] }
 0x1c5   :  { %v11443_v43 = vpop.eup %11442 }
 0x1c6   :  { %753 = vrot.lane.b32.xlu1 %v11443_v43, %s11623_s0 }
 0x1ca   :  { %v11445_v47 = vpop.eup %11444 }
 0x1cb   :  { %771 = vrot.lane.b32.xlu1 %v11445_v47, %s11623_s0  ;;  %v11447_v10 = vpop.eup %11446 }
 0x1cc   :  { %v748_v11 = vadd.f32 1.0, %v11447_v10  ;;  %v11449_v12 = vpop.eup %11448 }
 0x1cd   :  { %v766_v13 = vadd.f32 1.0, %v11449_v12  ;;  %v1315_v12 = vand.u32 4294901760, %v740_v57 }
 0x1ce   :  { %11450 = vrcp.f32 %v748_v11  ;;  %v1312_v11 = vand.u32 4294901760, %v738_v49 }
 0x1cf   :  { %11452 = vrcp.f32 %v766_v13  ;;  %v742_v13 = vld [vmem:[#allocation2 + $0x98] sm:$0xff] }
 0x1d0   :  { %v11923_v58 = vpack.c.bf16 %v1315_v12, %v1312_v11 }
 0x1d8   :  { %v11451_v14 = vpop.eup %11450 }
 0x1d9   :  { %v11453_v18 = vpop.eup %11452 }
 0x238   :  { %v754_v16 = vpop.permute.xlu1 %753 }
 0x239   :  { %v11850_v17 = vmul.f32 %v11451_v14, %v754_v16 }
 0x23b   :  { %11454 = vtanh.f32 %v11850_v17 }
 0x23d   :  { %v772_v19 = vpop.permute.xlu1 %771 }
 0x23e   :  { %v11853_v20 = vmul.f32 %v11453_v18, %v772_v19 }
 0x240   :  { %11456 = vtanh.f32 %v11853_v20 }
 0x245   :  { %v11455_v21 = vpop.eup %11454 }
 0x246   :  { %759 = vrot.lane.b32.xlu0 %v11455_v21, %s11624_s1  ;;  %v1392_v21 = vsub.f32 %v738_v49, %v1312_v11 }
 0x248   :  { %v1393_v32 = vand.u32 4294901760, %v1392_v21 }
 0x24a   :  { %v11457_v26 = vpop.eup %11456  ;;  %v1394_v59 = vsub.f32 %v1392_v21, %v1393_v32 }
 0x24b   :  { %777 = vrot.lane.b32.xlu1 %v11457_v26, %s11624_s1  ;;  %v1399_v26 = vsub.f32 %v740_v57, %v1315_v12 }
 0x24c   :  { %v1395_v28 = vand.u32 4294901760, %v1394_v59 }
 0x24d   :  { %v1400_v34 = vand.u32 4294901760, %v1399_v26 }
 0x24f   :  { %v1401_v61 = vsub.f32 %v1399_v26, %v1400_v34  ;;  %v11961_v53 = vpack.c.bf16 %v1400_v34, %v1393_v32 }
 0x251   :  { %v1402_v30 = vand.u32 4294901760, %v1401_v61 }
 0x253   :  { %v11934_v44 = vpack.c.bf16 %v1402_v30, %v1395_v28 }
 0x2b8   :  { %v760_v39 = vpop.permute.xlu0 %759 }
 0x2b9   :  { %v762_v46 = vmul.f32 %v11451_v14, %v760_v39  ;;  %v744_v14 = vld [vmem:[#allocation2 + $0xa8] sm:$0xff] }
 0x2ba   :  { %v1321_v19 = vand.u32 4294901760, %v744_v14 }
 0x2bb   :  { %782 = vrot.lane.b32.xlu0 %v762_v46, %s11624_s1  ;;  %v11944_v46 = vpack.c.bf16 %v1399_v26, %v1392_v21 }
 0x2bc   :  { %v1413_v37 = vsub.f32 %v744_v14, %v1321_v19 }
 0x2bd   :  { %v778_v55 = vpop.permute.xlu1 %777 }
 0x2be   :  { %v780_v56 = vmul.f32 %v11453_v18, %v778_v55  ;;  %v1318_v18 = vand.u32 4294901760, %v742_v13  ;;  %v1414_v63 = vand.u32 4294901760, %v1413_v37 }
 0x2c0   :  { %v1306_v60 = vrot.slane %v780_v56, 6  ;;  %v1406_v35 = vsub.f32 %v742_v13, %v1318_v18  ;;  %v11927_v25 = vpack.c.bf16 %v1321_v19, %v1318_v18  ;;  %v1415_v33 = vsub.f32 %v1413_v37, %v1414_v63 }
 0x2c2   :  { %1307 = vrot.lane.b32.xlu1 %v1306_v60, %s11624_s1  ;;  %v1407_v62 = vand.u32 4294901760, %v1406_v35  ;;  %v1416_v39 = vand.u32 4294901760, %v1415_v33  ;;  %v11949_v50 = vpack.c.bf16 %v1413_v37, %v1406_v35 }
 0x2c4   :  { %v1408_v31 = vsub.f32 %v1406_v35, %v1407_v62  ;;  %v11965_v55 = vpack.c.bf16 %v1414_v63, %v1407_v62 }
 0x2c6   :  { %v1409_v15 = vand.u32 4294901760, %v1408_v31 }
 0x2c8   :  { %v11938_v45 = vpack.c.bf16 %v1416_v39, %v1409_v15 }
 0x32d   :  { %v783_v7 = vpop.permute.xlu0 %782 }
 0x32e   :  { %v785_v38 = vsel %vm784_vm7, %v783_v7, 0 }
 0x32f   :  { %v856_v8 = vand.u32 4294901760, %v785_v38 }
 0x331   :  { %v857_v9 = vsub.f32 %v785_v38, %v856_v8 }
 0x333   :  { %v858_v48 = vand.u32 4294901760, %v857_v9 }
 0x334   :  { %v1308_v10 = vpop.permute.xlu1 %1307 }
 0x335   :  { %v859_v43 = vsub.f32 %v857_v9, %v858_v48  ;;  %v1309_v16 = vsel %vm784_vm7, %v1308_v10, 0 }
 0x336   :  { %v11915_v27 = vand.u32 4294901760, %v1309_v16 }
 0x337   :  { %v860_v47 = vand.u32 4294901760, %v859_v43 }
 0x338   :  { %v1381_v51 = vsub.f32 %v1309_v16, %v11915_v27 }
 0x339   :  { %9606 = vmatmul.mubr.f32.vlgmr.msra.gmra.mrb[0].mxu1 %v860_v47 }
 0x33a   :  { %10733 = vmatpush3.bf16.msra.mxu1 %v11872_v23  ;;  %9616 = vmatprep.mubr.msk.f32.mxu1 %vm11626_vm6, %v11622_v1  ;;  %v1382_v0 = vand.u32 4294901760, %v1381_v51 }
 0x33b   :  { %10734 = vmatprep.subr.bf16.mxu1 %v11625_v52 }
 0x33c   :  { %v1383_v42 = vsub.f32 %v1381_v51, %v1382_v0 }
 0x33e   :  { %10736 = vmatpush3.bf16.msra.mxu1 %v11879_v54  ;;  %v1384_v40 = vand.u32 4294901760, %v1383_v42 }
 0x33f   :  { %10737 = vmatprep.subr.bf16.mxu1 %v11625_v52 }
 0x341   :  { %9617 = vmatmul.mubr.f32.vlgmr.msra.gmra.mrb[0].mxu1 %v856_v8 }
 0x342   :  { %10739 = vmatpush3.bf16.msra.mxu1 %v11881_v3  ;;  %9627 = vmatprep.mubr.msk.f32.mxu1 %vm11626_vm6, %v11622_v1 }
 0x343   :  { %10740 = vmatprep.subr.bf16.mxu1 %v11625_v52 }
 0x346   :  { %10742 = vmatpush3.bf16.msra.mxu1 %v11884_v4 }
 0x347   :  { %10743 = vmatprep.subr.bf16.mxu1 %v11625_v52 }
 0x349   :  { %9628 = vmatmul.mubr.f32.vlgmr.msra.gmra.mrb[0].mxu1 %v857_v9  ;;  %v1284_v9 = vrot.slane %v11850_v17, 6 }
 0x34a   :  { %10745 = vmatpush3.bf16.msra.mxu1 %v11858_v36  ;;  %9638 = vmatprep.mubr.msk.f32.mxu1 %vm11626_vm6, %v11622_v1 }
 0x34b   :  { %10746 = vmatprep.subr.bf16.mxu1 %v11625_v52 }
 0x34e   :  { %10748 = vmatpush3.bf16.msra.mxu1 %v11866_v2 }
 0x34f   :  { %10749 = vmatprep.subr.bf16.mxu1 %v11625_v52 }
 0x351   :  { %9639 = vmatmul.mubr.f32.vlgmr.msra.gmra.mrb[0].mxu1 %v858_v48  ;;  %v1808_v48 = vrot.slane %v11853_v20, 2 }
 0x352   :  { %10751 = vmatpush3.bf16.msra.mxu1 %v11886_v5  ;;  %9649 = vmatprep.mubr.msk.f32.mxu1 %vm11626_vm6, %v11622_v1 }
 0x353   :  { %10752 = vmatprep.subr.bf16.mxu1 %v11625_v52 }
 0x356   :  { %10754 = vmatpush3.bf16.msra.mxu1 %v11888_v6 }
 0x357   :  { %10755 = vmatprep.subr.bf16.mxu1 %v11625_v52 }
 0x359   :  { %9650 = vmatmul.mubr.f32.vlgmr.msra.gmra.mrb[0].mxu1 %v856_v8 }
 0x35a   :  { %10757 = vmatpush3.bf16.msra.mxu1 %v11858_v36  ;;  %9660 = vmatprep.mubr.msk.f32.mxu1 %vm11626_vm6, %v11622_v1 }
 0x35b   :  { %10758 = vmatprep.subr.bf16.mxu1 %v11625_v52 }
 0x35e   :  { %10760 = vmatpush3.bf16.msra.mxu1 %v11866_v2 }
 0x35f   :  { %10761 = vmatprep.subr.bf16.mxu1 %v11625_v52 }
 0x361   :  { %9661 = vmatmul.mubr.f32.vlgmr.msra.gmra.mrb[0].mxu1 %v856_v8 }
 0x362   :  { %10763 = vmatpush3.bf16.msra.mxu1 %v11923_v58  ;;  %9671 = vmatprep.mubr.msk.f32.mxu1 %vm11626_vm6, %v11622_v1 }
 0x363   :  { %10764 = vmatprep.subr.bf16.mxu1 %v11625_v52 }
 0x366   :  { %10766 = vmatpush3.bf16.msra.mxu1 %v11927_v25 }
 0x367   :  { %10767 = vmatprep.subr.bf16.mxu1 %v11625_v52 }
 0x369   :  { %9672 = vmatmul.mubr.f32.vlgmr.msra.gmra.mrb[2].mxu1 %v1384_v40 }
 0x36a   :  { %10769 = vmatpush3.bf16.msra.mxu1 %v11934_v44  ;;  %9682 = vmatprep.mubr.msk.f32.mxu1 %vm11626_vm6, %v11622_v1 }
 0x36b   :  { %10770 = vmatprep.subr.bf16.mxu1 %v11625_v52 }
 0x36e   :  { %10772 = vmatpush3.bf16.msra.mxu1 %v11938_v45 }
 0x36f   :  { %10773 = vmatprep.subr.bf16.mxu1 %v11625_v52 }
 0x371   :  { %9683 = vmatmul.mubr.f32.vlgmr.msra.gmra.mrb[2].mxu1 %v11915_v27 }
 0x372   :  { %10775 = vmatpush3.bf16.msra.mxu1 %v11944_v46  ;;  %9693 = vmatprep.mubr.msk.f32.mxu1 %vm11626_vm6, %v11622_v1 }
 0x373   :  { %10776 = vmatprep.subr.bf16.mxu1 %v11625_v52 }
 0x376   :  { %10778 = vmatpush3.bf16.msra.mxu1 %v11949_v50 }
 0x377   :  { %10779 = vmatprep.subr.bf16.mxu1 %v11625_v52 }
 0x379   :  { %9694 = vmatmul.mubr.f32.vlgmr.msra.gmra.mrb[2].mxu1 %v1381_v51 }
 0x37a   :  { %10781 = vmatpush3.bf16.msra.mxu1 %v11923_v58  ;;  %9704 = vmatprep.mubr.msk.f32.mxu1 %vm11626_vm6, %v11622_v1 }
 0x37b   :  { %10782 = vmatprep.subr.bf16.mxu1 %v11625_v52 }
 0x37e   :  { %10784 = vmatpush3.bf16.msra.mxu1 %v11927_v25 }
 0x37f   :  { %10785 = vmatprep.subr.bf16.mxu1 %v11625_v52 }
 0x381   :  { %9705 = vmatmul.mubr.f32.vlgmr.msra.gmra.mrb[2].mxu1 %v1382_v0 }
 0x382   :  { %10787 = vmatpush3.bf16.msra.mxu1 %v11961_v53  ;;  %9715 = vmatprep.mubr.msk.f32.mxu1 %vm11626_vm6, %v11622_v1 }
 0x383   :  { %10788 = vmatprep.subr.bf16.mxu1 %v11625_v52 }
 0x386   :  { %10790 = vmatpush3.bf16.msra.mxu1 %v11965_v55 }
 0x387   :  { %10791 = vmatprep.subr.bf16.mxu1 %v11625_v52 }
 0x389   :  { %9716 = vmatmul.mubr.f32.vlgmr.msra.gmra.mrb[2].mxu1 %v11915_v27 }
 0x38a   :  { %10793 = vmatpush3.bf16.msra.mxu1 %v11923_v58  ;;  %9726 = vmatprep.mubr.msk.f32.mxu1 %vm11626_vm6, %v11622_v1 }
 0x38b   :  { %10794 = vmatprep.subr.bf16.mxu1 %v11625_v52 }
 0x38e   :  { %10796 = vmatpush3.bf16.msra.mxu1 %v11927_v25 }
 0x38f   :  { %10833 = vmatprep.subr.bf16.mxu1 %v11625_v52 }
 0x391   :  { %9727 = vmatmul.mubr.f32.vlgmr.msra.gmra.mrb[2].mxu1 %v11915_v27 }
 0x392   :  { %10835 = vmatpush3.bf16.msra.mxu1 %v11923_v58  ;;  %9803 = vmatprep.mubr.msk.f32.mxu1 %vm11626_vm6, %v11622_v1 }
 0x393   :  { %10836 = vmatprep.subr.bf16.mxu1 %v11625_v52 }
 0x396   :  { %10838 = vmatpush3.bf16.msra.mxu1 %v11927_v25 }
 0x397   :  { %10839 = vmatprep.subr.bf16.mxu1 %v11625_v52 }
 0x434   :  { %v1268_v56 = vpop.f32.mrb[0].mxu1 }
 0x435   :  { %v1273_v60 = vrot.slane %v1268_v56, 6  ;;  %v9662_v7 = vpop.f32.mrb[1].mxu1 }
 0x437   :  { %v1275_v38 = vadd.f32 %v1273_v60, %v11836_v22 }
 0x439   :  { %11458 = vtanh.f32 %v1275_v38  ;;  %v9102_v11 = vmul.f32 -1.442695, %v1275_v38 }
 0x443   :  { %v11459_v8 = vpop.eup %11458 }
 0x444   :  { %1290 = vrot.lane.b32.xlu0 %v11459_v8, %s11623_s0 }
 0x448   :  { %1285 = vrot.lane.b32.xlu0 %v1284_v9, %s11623_s0 }
 0x44c   :  { %1809 = vrot.lane.b32.xlu0 %v1808_v48, %s11623_s0 }
 0x464   :  { %v1792_v43 = vpop.f32.mrb[2].mxu1 }
 0x465   :  { %v1797_v47 = vrot.slane %v1792_v43, 4  ;;  %v9728_v49 = vpop.f32.mrb[3].mxu1 }
 0x467   :  { %v1799_v57 = vadd.f32 %v1797_v47, %v11843_v41 }
 0x469   :  { %11460 = vtanh.f32 %v1799_v57  ;;  %v9103_v20 = vmul.f32 -1.442695, %v1799_v57 }
 0x46a   :  { %11462 = vpow2.f32 %v9102_v11 }
 0x473   :  { %v11461_v10 = vpop.eup %11460 }
 0x474   :  { %1814 = vrot.lane.b32.xlu1 %v11461_v10, %s11623_s0  ;;  %v11463_v12 = vpop.eup %11462 }
 0x475   :  { %v1279_v13 = vadd.f32 1.0, %v11463_v12 }
 0x477   :  { %11464 = vrcp.f32 %v1279_v13 }
 0x478   :  { %11466 = vpow2.f32 %v9103_v20 }
 0x481   :  { %v11465_v17 = vpop.eup %11464 }
 0x482   :  { %v11467_v18 = vpop.eup %11466 }
 0x483   :  { %v1803_v19 = vadd.f32 1.0, %v11467_v18 }
 0x485   :  { %11468 = vrcp.f32 %v1803_v19 }
 0x48f   :  { %v11469_v21 = vpop.eup %11468 }
 0x4b6   :  { %v1291_v14 = vpop.permute.xlu0 %1290 }
 0x4b7   :  { %v1293_v16 = vmul.f32 %v11465_v17, %v1291_v14 }
 0x4b9   :  { %1295 = vrot.lane.b32.xlu1 %v1293_v16, %s11623_s0 }
 0x4ba   :  { %v1286_v32 = vpop.permute.xlu0 %1285 }
 0x4bb   :  { %v1288_v34 = vmul.f32 %v11465_v17, %v1286_v32 }
 0x4be   :  { %v1810_v59 = vpop.permute.xlu0 %1809 }
 0x4bf   :  { %v1812_v61 = vmul.f32 %v11469_v21, %v1810_v59 }
 0x4e6   :  { %v1815_v26 = vpop.permute.xlu1 %1814 }
 0x4e7   :  { %v1817_v27 = vmul.f32 %v11469_v21, %v1815_v26 }
 0x4e9   :  { %1819 = vrot.lane.b32.xlu1 %v1817_v27, %s11623_s0 }
 0x52b   :  { %v1296_v35 = vpop.permute.xlu1 %1295 }
 0x52c   :  { %v11996_v37 = vadd.f32 %v1296_v35, %v1288_v34 }
 0x52e   :  { %11470 = vtanh.f32 %v11996_v37 }
 0x538   :  { %v11471_v51 = vpop.eup %11470 }
 0x539   :  { %1301 = vrot.lane.b32.xlu0 %v11471_v51, %s11623_s0 }
 0x55b   :  { %v1820_v62 = vpop.permute.xlu1 %1819 }
 0x55c   :  { %v12000_v63 = vadd.f32 %v1820_v62, %v1812_v61 }
 0x55e   :  { %11472 = vtanh.f32 %v12000_v63 }
 0x568   :  { %v11473_v0 = vpop.eup %11472 }
 0x569   :  { %1825 = vrot.lane.b32.xlu1 %v11473_v0, %s11623_s0 }
 0x5ab   :  { %v1302_v28 = vpop.permute.xlu0 %1301 }
 0x5ac   :  { %v1304_v30 = vmul.f32 %v11465_v17, %v1302_v28 }
 0x5ae   :  { %v1830_v31 = vrot.slane %v1304_v30, 2 }
 0x5b0   :  { %1831 = vrot.lane.b32.xlu0 %v1830_v31, %s11624_s1  ;;  %v2332_v31 = vrot.slane %v11996_v37, 6 }
 0x5db   :  { %v1826_v33 = vpop.permute.xlu1 %1825 }
 0x5dc   :  { %v1828_v42 = vmul.f32 %v11469_v21, %v1826_v33 }
 0x5de   :  { %v2352_v15 = vrot.slane %v1828_v42, 4 }
 0x5e0   :  { %2353 = vrot.lane.b32.xlu1 %v2352_v15, %s11624_s1 }
 0x622   :  { %v1832_v39 = vpop.permute.xlu0 %1831 }
 0x623   :  { %v1833_v40 = vsel %vm784_vm7, %v1832_v39, 0 }
 0x624   :  { %v1904_v56 = vand.u32 4294901760, %v1833_v40 }
 0x626   :  { %v1905_v60 = vsub.f32 %v1833_v40, %v1904_v56  ;;  %v2854_v40 = vrot.slane %v12000_v63, 2 }
 0x628   :  { %v1906_v7 = vand.u32 4294901760, %v1905_v60 }
 0x62a   :  { %v1907_v38 = vsub.f32 %v1905_v60, %v1906_v7 }
 0x62c   :  { %v1908_v8 = vand.u32 4294901760, %v1907_v38 }
 0x62e   :  { %9738 = vmatmul.mubr.f32.vlgmr.msra.gmra.mrb[4].mxu0 %v1908_v8 }
 0x62f   :  { %10805 = vmatpush3.bf16.msra.mxu0 %v11872_v23  ;;  %9748 = vmatprep.mubr.msk.f32.mxu0 %vm11626_vm6, %v11622_v1 }
 0x630   :  { %10806 = vmatprep.subr.bf16.mxu0 %v11625_v52 }
 0x633   :  { %10808 = vmatpush3.bf16.msra.mxu0 %v11879_v54 }
 0x634   :  { %10809 = vmatprep.subr.bf16.mxu0 %v11625_v52 }
 0x636   :  { %9749 = vmatmul.mubr.f32.vlgmr.msra.gmra.mrb[4].mxu0 %v1904_v56 }
 0x637   :  { %10811 = vmatpush3.bf16.msra.mxu0 %v11881_v3  ;;  %9759 = vmatprep.mubr.msk.f32.mxu0 %vm11626_vm6, %v11622_v1 }
 0x638   :  { %10812 = vmatprep.subr.bf16.mxu0 %v11625_v52 }
 0x63b   :  { %10814 = vmatpush3.bf16.msra.mxu0 %v11884_v4 }
 0x63c   :  { %10815 = vmatprep.subr.bf16.mxu0 %v11625_v52 }
 0x63e   :  { %9760 = vmatmul.mubr.f32.vlgmr.msra.gmra.mrb[4].mxu0 %v1905_v60 }
 0x63f   :  { %10817 = vmatpush3.bf16.msra.mxu0 %v11858_v36  ;;  %9770 = vmatprep.mubr.msk.f32.mxu0 %vm11626_vm6, %v11622_v1 }
 0x640   :  { %10818 = vmatprep.subr.bf16.mxu0 %v11625_v52 }
 0x643   :  { %10820 = vmatpush3.bf16.msra.mxu0 %v11866_v2 }
 0x644   :  { %10821 = vmatprep.subr.bf16.mxu0 %v11625_v52 }
 0x646   :  { %9771 = vmatmul.mubr.f32.vlgmr.msra.gmra.mrb[4].mxu0 %v1906_v7 }
 0x647   :  { %10823 = vmatpush3.bf16.msra.mxu0 %v11886_v5  ;;  %9781 = vmatprep.mubr.msk.f32.mxu0 %vm11626_vm6, %v11622_v1 }
 0x648   :  { %10824 = vmatprep.subr.bf16.mxu0 %v11625_v52 }
 0x64b   :  { %10826 = vmatpush3.bf16.msra.mxu0 %v11888_v6 }
 0x64c   :  { %10827 = vmatprep.subr.bf16.mxu0 %v11625_v52 }
 0x64e   :  { %9782 = vmatmul.mubr.f32.vlgmr.msra.gmra.mrb[4].mxu0 %v1904_v56 }
 0x64f   :  { %10829 = vmatpush3.bf16.msra.mxu0 %v11858_v36  ;;  %9792 = vmatprep.mubr.msk.f32.mxu0 %vm11626_vm6, %v11622_v1 }
 0x650   :  { %10830 = vmatprep.subr.bf16.mxu0 %v11625_v52 }
 0x652   :  { %v2354_v9 = vpop.permute.xlu1 %2353 }
 0x653   :  { %v2355_v48 = vsel %vm784_vm7, %v2354_v9, 0  ;;  %10832 = vmatpush3.bf16.msra.mxu0 %v11866_v2 }
 0x654   :  { %v2426_v43 = vand.u32 4294901760, %v2355_v48  ;;  %10869 = vmatprep.subr.bf16.mxu0 %v11625_v52 }
 0x656   :  { %v2427_v47 = vsub.f32 %v2355_v48, %v2426_v43  ;;  %9793 = vmatmul.mubr.f32.vlgmr.msra.gmra.mrb[4].mxu0 %v1904_v56 }
 0x657   :  { %10871 = vmatpush3.bf16.msra.mxu0 %v11858_v36  ;;  %9869 = vmatprep.mubr.msk.f32.mxu0 %vm11626_vm6, %v11622_v1 }
 0x658   :  { %v2428_v49 = vand.u32 4294901760, %v2427_v47  ;;  %10872 = vmatprep.subr.bf16.mxu0 %v11625_v52 }
 0x65a   :  { %v2429_v57 = vsub.f32 %v2427_v47, %v2428_v49 }
 0x65b   :  { %10874 = vmatpush3.bf16.msra.mxu0 %v11866_v2 }
 0x65c   :  { %v2430_v10 = vand.u32 4294901760, %v2429_v57  ;;  %10875 = vmatprep.subr.bf16.mxu0 %v11625_v52 }
 0x65e   :  { %9804 = vmatmul.mubr.f32.vlgmr.msra.gmra.mrb[4].mxu1 %v2430_v10 }
 0x65f   :  { %10841 = vmatpush3.bf16.msra.mxu1 %v11934_v44  ;;  %9814 = vmatprep.mubr.msk.f32.mxu1 %vm11626_vm6, %v11622_v1 }
 0x660   :  { %10842 = vmatprep.subr.bf16.mxu1 %v11625_v52 }
 0x663   :  { %10844 = vmatpush3.bf16.msra.mxu1 %v11938_v45 }
 0x664   :  { %10845 = vmatprep.subr.bf16.mxu1 %v11625_v52 }
 0x666   :  { %9815 = vmatmul.mubr.f32.vlgmr.msra.gmra.mrb[4].mxu1 %v2426_v43 }
 0x667   :  { %10847 = vmatpush3.bf16.msra.mxu1 %v11944_v46  ;;  %9825 = vmatprep.mubr.msk.f32.mxu1 %vm11626_vm6, %v11622_v1 }
 0x668   :  { %10848 = vmatprep.subr.bf16.mxu1 %v11625_v52 }
 0x66b   :  { %10850 = vmatpush3.bf16.msra.mxu1 %v11949_v50 }
 0x66c   :  { %10851 = vmatprep.subr.bf16.mxu1 %v11625_v52 }
 0x66e   :  { %9826 = vmatmul.mubr.f32.vlgmr.msra.gmra.mrb[4].mxu1 %v2427_v47 }
 0x66f   :  { %10853 = vmatpush3.bf16.msra.mxu1 %v11923_v58  ;;  %9836 = vmatprep.mubr.msk.f32.mxu1 %vm11626_vm6, %v11622_v1 }
 0x670   :  { %10854 = vmatprep.subr.bf16.mxu1 %v11625_v52 }
 0x673   :  { %10856 = vmatpush3.bf16.msra.mxu1 %v11927_v25 }
 0x674   :  { %10857 = vmatprep.subr.bf16.mxu1 %v11625_v52 }
 0x676   :  { %9837 = vmatmul.mubr.f32.vlgmr.msra.gmra.mrb[4].mxu1 %v2428_v49 }
 0x677   :  { %10859 = vmatpush3.bf16.msra.mxu1 %v11961_v53  ;;  %9847 = vmatprep.mubr.msk.f32.mxu1 %vm11626_vm6, %v11622_v1 }
 0x678   :  { %10860 = vmatprep.subr.bf16.mxu1 %v11625_v52 }
 0x67b   :  { %10862 = vmatpush3.bf16.msra.mxu1 %v11965_v55 }
 0x67c   :  { %10863 = vmatprep.subr.bf16.mxu1 %v11625_v52 }
 0x67e   :  { %9848 = vmatmul.mubr.f32.vlgmr.msra.gmra.mrb[4].mxu1 %v2426_v43 }
 0x67f   :  { %10865 = vmatpush3.bf16.msra.mxu1 %v11923_v58  ;;  %9858 = vmatprep.mubr.msk.f32.mxu1 %vm11626_vm6, %v11622_v1 }
 0x680   :  { %10866 = vmatprep.subr.bf16.mxu1 %v11625_v52 }
 0x683   :  { %10868 = vmatpush3.bf16.msra.mxu1 %v11927_v25 }
 0x684   :  { %10905 = vmatprep.subr.bf16.mxu1 %v11625_v52 }
 0x686   :  { %9859 = vmatmul.mubr.f32.vlgmr.msra.gmra.mrb[4].mxu1 %v2426_v43 }
 0x687   :  { %10907 = vmatpush3.bf16.msra.mxu1 %v11923_v58  ;;  %9935 = vmatprep.mubr.msk.f32.mxu1 %vm11626_vm6, %v11622_v1 }
 0x688   :  { %10908 = vmatprep.subr.bf16.mxu1 %v11625_v52 }
 0x68b   :  { %10910 = vmatpush3.bf16.msra.mxu1 %v11927_v25 }
 0x68c   :  { %10911 = vmatprep.subr.bf16.mxu1 %v11625_v52 }
 0x729   :  { %v2316_v11 = vpop.f32.mrb[4].mxu0 }
 0x72a   :  { %v2321_v12 = vrot.slane %v2316_v11, 4  ;;  %v9794_v13 = vpop.f32.mrb[5].mxu0 }
 0x72c   :  { %v2323_v17 = vadd.f32 %v2321_v12, %v11836_v22 }
 0x72e   :  { %11474 = vtanh.f32 %v2323_v17  ;;  %v9104_v26 = vmul.f32 -1.442695, %v2323_v17 }
 0x738   :  { %v11475_v14 = vpop.eup %11474 }
 0x739   :  { %2336 = vrot.lane.b32.xlu0 %v11475_v14, %s11623_s0 }
 0x759   :  { %v2838_v16 = vpop.f32.mrb[4].mxu1 }
 0x75a   :  { %v2843_v20 = vrot.slane %v2838_v16, 6  ;;  %v9860_v18 = vpop.f32.mrb[5].mxu1 }
 0x75c   :  { %v2845_v19 = vadd.f32 %v2843_v20, %v11843_v41 }
 0x75e   :  { %11476 = vtanh.f32 %v2845_v19  ;;  %v9105_v59 = vmul.f32 -1.442695, %v2845_v19 }
 0x75f   :  { %11478 = vpow2.f32 %v9104_v26 }
 0x768   :  { %v11477_v21 = vpop.eup %11476 }
 0x769   :  { %2858 = vrot.lane.b32.xlu1 %v11477_v21, %s11623_s0  ;;  %v11479_v27 = vpop.eup %11478 }
 0x76a   :  { %v2327_v32 = vadd.f32 1.0, %v11479_v27 }
 0x76c   :  { %11480 = vrcp.f32 %v2327_v32 }
 0x76d   :  { %11482 = vpow2.f32 %v9105_v59 }
 0x776   :  { %v11481_v34 = vpop.eup %11480 }
 0x777   :  { %v11483_v61 = vpop.eup %11482  ;;  %v2334_v33 = vmul.f32 %v11481_v34, %v2332_v31 }
 0x778   :  { %v2849_v62 = vadd.f32 1.0, %v11483_v61 }
 0x77a   :  { %11484 = vrcp.f32 %v2849_v62 }
 0x784   :  { %v11485_v0 = vpop.eup %11484 }
 0x785   :  { %v2856_v56 = vmul.f32 %v11485_v0, %v2854_v40 }
 0x7ab   :  { %v2337_v35 = vpop.permute.xlu0 %2336 }
 0x7ac   :  { %v2339_v51 = vmul.f32 %v11481_v34, %v2337_v35 }
 0x7ae   :  { %2341 = vrot.lane.b32.xlu0 %v2339_v51, %s11623_s0 }
 0x7db   :  { %v2859_v28 = vpop.permute.xlu1 %2858 }
 0x7dc   :  { %v2861_v30 = vmul.f32 %v11485_v0, %v2859_v28 }
 0x7de   :  { %2863 = vrot.lane.b32.xlu1 %v2861_v30, %s11623_s0 }
 0x820   :  { %v2342_v42 = vpop.permute.xlu0 %2341 }
 0x821   :  { %v12087_v15 = vadd.f32 %v2342_v42, %v2334_v33 }
 0x823   :  { %11486 = vtanh.f32 %v12087_v15 }
 0x82d   :  { %v11487_v39 = vpop.eup %11486 }
 0x82e   :  { %2347 = vrot.lane.b32.xlu0 %v11487_v39, %s11623_s0 }
 0x850   :  { %v2864_v60 = vpop.permute.xlu1 %2863 }
 0x851   :  { %v12092_v7 = vadd.f32 %v2864_v60, %v2856_v56 }
 0x853   :  { %11488 = vtanh.f32 %v12092_v7 }
 0x85d   :  { %v11489_v38 = vpop.eup %11488 }
 0x85e   :  { %2869 = vrot.lane.b32.xlu1 %v11489_v38, %s11623_s0 }
 0x8a0   :  { %v2348_v37 = vpop.permute.xlu0 %2347 }
 0x8a1   :  { %v2350_v8 = vmul.f32 %v11481_v34, %v2348_v37 }
 0x8a3   :  { %v2874_v9 = vrot.slane %v2350_v8, 4 }
 0x8a5   :  { %2875 = vrot.lane.b32.xlu0 %v2874_v9, %s11624_s1 }
 0x8d0   :  { %v2870_v48 = vpop.permute.xlu1 %2869 }
 0x8d1   :  { %v2872_v43 = vmul.f32 %v11485_v0, %v2870_v48 }
 0x8d3   :  { %v3396_v47 = vrot.slane %v2872_v43, 2 }
 0x8d5   :  { %3397 = vrot.lane.b32.xlu1 %v3396_v47, %s11624_s1 }
 0x917   :  { %v2876_v63 = vpop.permute.xlu0 %2875 }
 0x918   :  { %v2877_v49 = vsel %vm784_vm7, %v2876_v63, 0 }
 0x919   :  { %v2948_v57 = vand.u32 4294901760, %v2877_v49 }
 0x91b   :  { %v2949_v10 = vsub.f32 %v2877_v49, %v2948_v57 }
 0x91d   :  { %v2950_v11 = vand.u32 4294901760, %v2949_v10 }
 0x91f   :  { %v2951_v12 = vsub.f32 %v2949_v10, %v2950_v11 }
 0x921   :  { %v2952_v13 = vand.u32 4294901760, %v2951_v12 }
 0x923   :  { %9870 = vmatmul.mubr.f32.vlgmr.msra.gmra.mrb[6].mxu0 %v2952_v13 }
 0x924   :  { %10877 = vmatpush3.bf16.msra.mxu0 %v11872_v23  ;;  %9880 = vmatprep.mubr.msk.f32.mxu0 %vm11626_vm6, %v11622_v1 }
 0x925   :  { %10878 = vmatprep.subr.bf16.mxu0 %v11625_v52 }
 0x928   :  { %10880 = vmatpush3.bf16.msra.mxu0 %v11879_v54 }
 0x929   :  { %10881 = vmatprep.subr.bf16.mxu0 %v11625_v52 }
 0x92b   :  { %9881 = vmatmul.mubr.f32.vlgmr.msra.gmra.mrb[6].mxu0 %v2948_v57 }
 0x92c   :  { %10883 = vmatpush3.bf16.msra.mxu0 %v11881_v3  ;;  %9891 = vmatprep.mubr.msk.f32.mxu0 %vm11626_vm6, %v11622_v1 }
 0x92d   :  { %10884 = vmatprep.subr.bf16.mxu0 %v11625_v52 }
 0x930   :  { %10886 = vmatpush3.bf16.msra.mxu0 %v11884_v4 }
 0x931   :  { %10887 = vmatprep.subr.bf16.mxu0 %v11625_v52 }
 0x933   :  { %9892 = vmatmul.mubr.f32.vlgmr.msra.gmra.mrb[6].mxu0 %v2949_v10 }
 0x934   :  { %10889 = vmatpush3.bf16.msra.mxu0 %v11858_v36  ;;  %9902 = vmatprep.mubr.msk.f32.mxu0 %vm11626_vm6, %v11622_v1 }
 0x935   :  { %10890 = vmatprep.subr.bf16.mxu0 %v11625_v52 }
 0x938   :  { %10892 = vmatpush3.bf16.msra.mxu0 %v11866_v2 }
 0x939   :  { %10893 = vmatprep.subr.bf16.mxu0 %v11625_v52 }
 0x93b   :  { %9903 = vmatmul.mubr.f32.vlgmr.msra.gmra.mrb[6].mxu0 %v2950_v11 }
 0x93c   :  { %10895 = vmatpush3.bf16.msra.mxu0 %v11886_v5  ;;  %9913 = vmatprep.mubr.msk.f32.mxu0 %vm11626_vm6, %v11622_v1 }
 0x93d   :  { %10896 = vmatprep.subr.bf16.mxu0 %v11625_v52 }
 0x940   :  { %10898 = vmatpush3.bf16.msra.mxu0 %v11888_v6 }
 0x941   :  { %10899 = vmatprep.subr.bf16.mxu0 %v11625_v52 }
 0x943   :  { %9914 = vmatmul.mubr.f32.vlgmr.msra.gmra.mrb[6].mxu0 %v2948_v57 }
 0x944   :  { %10901 = vmatpush3.bf16.msra.mxu0 %v11858_v36  ;;  %9924 = vmatprep.mubr.msk.f32.mxu0 %vm11626_vm6, %v11622_v1 }
 0x945   :  { %10902 = vmatprep.subr.bf16.mxu0 %v11625_v52 }
 0x947   :  { %v3398_v17 = vpop.permute.xlu1 %3397 }
 0x948   :  { %v3399_v14 = vsel %vm784_vm7, %v3398_v17, 0  ;;  %10904 = vmatpush3.bf16.msra.mxu0 %v11866_v2 }
 0x949   :  { %v3470_v16 = vand.u32 4294901760, %v3399_v14  ;;  %10935 = vmatprep.subr.bf16.mxu0 %v11625_v52 }
 0x94b   :  { %v3471_v20 = vsub.f32 %v3399_v14, %v3470_v16  ;;  %9925 = vmatmul.mubr.f32.vlgmr.msra.gmra.mrb[6].mxu0 %v2948_v57  ;;  %v3376_v14 = vrot.slane %v12087_v15, 6 }
 0x94c   :  { %10937 = vmatpush3.bf16.msra.mxu0 %v11923_v58  ;;  %9990 = vmatprep.mubr.msk.f32.mxu0 %vm11626_vm6, %v11622_v1 }
 0x94d   :  { %v3472_v18 = vand.u32 4294901760, %v3471_v20  ;;  %10938 = vmatprep.subr.bf16.mxu0 %v11625_v52 }
 0x94f   :  { %v3473_v19 = vsub.f32 %v3471_v20, %v3472_v18 }
 0x950   :  { %10940 = vmatpush3.bf16.msra.mxu0 %v11927_v25 }
 0x951   :  { %v3474_v21 = vand.u32 4294901760, %v3473_v19  ;;  %10947 = vmatprep.subr.bf16.mxu0 %v11625_v52 }
 0x953   :  { %9936 = vmatmul.mubr.f32.vlgmr.msra.gmra.mrb[6].mxu1 %v3474_v21  ;;  %9991 = vmatmul.mubr.f32.vlgmr.msra.gmra.mrb[8].mxu0 %v3470_v16  ;;  %v3895_v21 = vrot.slane %v12092_v7, 2 }
 0x954   :  { %10913 = vmatpush3.bf16.msra.mxu1 %v11934_v44  ;;  %9946 = vmatprep.mubr.msk.f32.mxu1 %vm11626_vm6, %v11622_v1 }
 0x955   :  { %10914 = vmatprep.subr.bf16.mxu1 %v11625_v52  ;;  %10949 = vmatpush3.bf16.msra.mxu0 %v11872_v23 }
 0x956   :  { %10950 = vmatprep.subr.bf16.mxu0 %v11625_v52  ;;  %10012 = vmatprep.mubr.msk.f32.mxu0 %vm11626_vm6, %v11622_v1 }
 0x958   :  { %10916 = vmatpush3.bf16.msra.mxu1 %v11938_v45 }
 0x959   :  { %10917 = vmatprep.subr.bf16.mxu1 %v11625_v52  ;;  %10952 = vmatpush3.bf16.msra.mxu0 %v11879_v54 }
 0x95a   :  { %10959 = vmatprep.subr.bf16.mxu0 %v11625_v52 }
 0x95b   :  { %9947 = vmatmul.mubr.f32.vlgmr.msra.gmra.mrb[8].mxu1 %v3470_v16 }
 0x95c   :  { %10919 = vmatpush3.bf16.msra.mxu1 %v11944_v46  ;;  %9957 = vmatprep.mubr.msk.f32.mxu1 %vm11626_vm6, %v11622_v1 }
 0x95d   :  { %10920 = vmatprep.subr.bf16.mxu1 %v11625_v52 }
 0x960   :  { %10922 = vmatpush3.bf16.msra.mxu1 %v11949_v50 }
 0x961   :  { %10923 = vmatprep.subr.bf16.mxu1 %v11625_v52 }
 0x963   :  { %9958 = vmatmul.mubr.f32.vlgmr.msra.gmra.mrb[10].mxu1 %v3471_v20 }
 0x964   :  { %10925 = vmatpush3.bf16.msra.mxu1 %v11923_v58  ;;  %9968 = vmatprep.mubr.msk.f32.mxu1 %vm11626_vm6, %v11622_v1 }
 0x965   :  { %10926 = vmatprep.subr.bf16.mxu1 %v11625_v52 }
 0x968   :  { %10928 = vmatpush3.bf16.msra.mxu1 %v11927_v25 }
 0x969   :  { %10929 = vmatprep.subr.bf16.mxu1 %v11625_v52 }
 0x96b   :  { %9969 = vmatmul.mubr.f32.vlgmr.msra.gmra.mrb[12].mxu1 %v3472_v18 }
 0x96c   :  { %10931 = vmatpush3.bf16.msra.mxu1 %v11961_v53  ;;  %9979 = vmatprep.mubr.msk.f32.mxu1 %vm11626_vm6, %v11622_v1 }
 0x96d   :  { %10932 = vmatprep.subr.bf16.mxu1 %v11625_v52 }
 0x970   :  { %10934 = vmatpush3.bf16.msra.mxu1 %v11965_v55 }
 0x971   :  { %10941 = vmatprep.subr.bf16.mxu1 %v11625_v52 }
 0x973   :  { %9980 = vmatmul.mubr.f32.vlgmr.msra.gmra.mrb[14].mxu1 %v3470_v16 }
 0x974   :  { %10943 = vmatpush3.bf16.msra.mxu1 %v11858_v36  ;;  %10001 = vmatprep.mubr.msk.f32.mxu1 %vm11626_vm6, %v11622_v1 }
 0x975   :  { %10944 = vmatprep.subr.bf16.mxu1 %v11625_v52 }
 0x978   :  { %10946 = vmatpush3.bf16.msra.mxu1 %v11866_v2 }
 0x979   :  { %10953 = vmatprep.subr.bf16.mxu1 %v11625_v52 }
 0xa1e   :  { %v3360_v26 = vpop.f32.mrb[6].mxu0 }
 0xa1f   :  { %v3365_v27 = vrot.slane %v3360_v26, 2  ;;  %v9926_v32 = vpop.f32.mrb[7].mxu0 }
 0xa21   :  { %v3367_v34 = vadd.f32 %v3365_v27, %v11836_v22 }
 0xa23   :  { %11490 = vtanh.f32 %v3367_v34  ;;  %v9106_v48 = vmul.f32 -1.442695, %v3367_v34 }
 0xa26   :  { %v3476_v35 = vpop.f32.mrb[6].mxu1  ;;  %v3882_v51 = vpop.f32.mrb[8].mxu0 }
 0xa27   :  { %v9937_v59 = vpop.f32.mrb[7].mxu1  ;;  %v9992_v61 = vpop.f32.mrb[9].mxu0 }
 0xa2d   :  { %v11491_v62 = vpop.eup %11490 }
 0xa2e   :  { %v3567_v0 = vpop.f32.mrb[8].mxu1  ;;  %3380 = vrot.lane.b32.xlu0 %v11491_v62, %s11623_s0 }
 0xa2f   :  { %v3568_v28 = vadd.f32 %v3567_v0, %v3476_v35  ;;  %v9948_v30 = vpop.f32.mrb[9].mxu1 }
 0xa36   :  { %v3647_v31 = vpop.f32.mrb[10].mxu1 }
 0xa37   :  { %v3648_v33 = vadd.f32 %v3647_v31, %v3568_v28  ;;  %v9959_v42 = vpop.f32.mrb[11].mxu1 }
 0xa3e   :  { %v3724_v39 = vpop.f32.mrb[12].mxu1 }
 0xa3f   :  { %v3725_v40 = vadd.f32 %v3724_v39, %v3648_v33  ;;  %v9970_v56 = vpop.f32.mrb[13].mxu1 }
 0xa46   :  { %v3807_v60 = vpop.f32.mrb[14].mxu1 }
 0xa47   :  { %v3808_v38 = vadd.f32 %v3807_v60, %v3725_v40  ;;  %v9981_v22 = vpop.f32.mrb[15].mxu1 }
 0xa49   :  { %v3883_v37 = vadd.f32 %v3882_v51, %v3808_v38 }
 0xa4b   :  { %v3886_v8 = vadd.f32 %v3883_v37, %v11843_v41 }
 0xa4d   :  { %11492 = vtanh.f32 %v3886_v8  ;;  %v9107_v10 = vmul.f32 -1.442695, %v3886_v8 }
 0xa4e   :  { %11494 = vpow2.f32 %v9106_v48 }
 0xa57   :  { %v11493_v9 = vpop.eup %11492 }
 0xa58   :  { %3899 = vrot.lane.b32.xlu1 %v11493_v9, %s11623_s0  ;;  %v11495_v43 = vpop.eup %11494 }
 0xa59   :  { %v3371_v47 = vadd.f32 1.0, %v11495_v43 }
 0xa5b   :  { %11496 = vrcp.f32 %v3371_v47 }
 0xa5c   :  { %11498 = vpow2.f32 %v9107_v10 }
 0xa65   :  { %v11497_v63 = vpop.eup %11496 }
 0xa66   :  { %v11499_v11 = vpop.eup %11498  ;;  %v3378_v16 = vmul.f32 %v11497_v63, %v3376_v14 }
 0xa67   :  { %v3890_v12 = vadd.f32 1.0, %v11499_v11 }
 0xa69   :  { %11500 = vrcp.f32 %v3890_v12 }
 0xa73   :  { %v11501_v41 = vpop.eup %11500 }
 0xa74   :  { %v3897_v26 = vmul.f32 %v11501_v41, %v3895_v21 }
 0xaa0   :  { %v3381_v49 = vpop.permute.xlu0 %3380 }
 0xaa1   :  { %v3383_v57 = vmul.f32 %v11497_v63, %v3381_v49 }
 0xaa3   :  { %3385 = vrot.lane.b32.xlu0 %v3383_v57, %s11623_s0 }
 0xaca   :  { %v3900_v13 = vpop.permute.xlu1 %3899 }
 0xacb   :  { %v3902_v17 = vmul.f32 %v11501_v41, %v3900_v13 }
 0xacd   :  { %3904 = vrot.lane.b32.xlu1 %v3902_v17, %s11623_s0 }
 0xb15   :  { %v3386_v20 = vpop.permute.xlu0 %3385 }
 0xb16   :  { %v12179_v18 = vadd.f32 %v3386_v20, %v3378_v16 }
 0xb18   :  { %11502 = vtanh.f32 %v12179_v18 }
 0xb22   :  { %v11503_v19 = vpop.eup %11502 }
 0xb23   :  { %3391 = vrot.lane.b32.xlu0 %v11503_v19, %s11623_s0 }
 0xb3f   :  { %v3905_v27 = vpop.permute.xlu1 %3904 }
 0xb40   :  { %v12184_v32 = vadd.f32 %v3905_v27, %v3897_v26 }
 0xb42   :  { %11504 = vtanh.f32 %v12184_v32 }
 0xb4c   :  { %v11505_v34 = vpop.eup %11504 }
 0xb4d   :  { %3910 = vrot.lane.b32.xlu1 %v11505_v34, %s11623_s0 }
 0xb95   :  { %v3392_v15 = vpop.permute.xlu0 %3391 }
 0xb96   :  { %v3394_v35 = vmul.f32 %v11497_v63, %v3392_v15 }
 0xb98   :  { %v3915_v51 = vrot.slane %v3394_v35, 6 }
 0xb9a   :  { %3916 = vrot.lane.b32.xlu0 %v3915_v51, %s11624_s1 }
 0xbbf   :  { %v3911_v59 = vpop.permute.xlu1 %3910 }
 0xbc0   :  { %v3913_v61 = vmul.f32 %v11501_v41, %v3911_v59 }
 0xbc2   :  { %4434 = vrot.lane.b32.xlu1 %v3913_v61, %s11624_s1 }
 0xc0c   :  { %v3917_v62 = vpop.permute.xlu0 %3916 }
 0xc0d   :  { %v3918_v7 = vsel %vm784_vm7, %v3917_v62, 0 }
 0xc0e   :  { %v3989_v0 = vand.u32 4294901760, %v3918_v7 }
 0xc10   :  { %v3990_v28 = vsub.f32 %v3918_v7, %v3989_v0  ;;  %10013 = vmatmul.mubr.f32.vlgmr.msra.gmra.mrb[10].mxu0 %v3989_v0 }
 0xc11   :  { %10961 = vmatpush3.bf16.msra.mxu0 %v11858_v36  ;;  %10034 = vmatprep.mubr.msk.f32.mxu0 %vm11626_vm6, %v11622_v1 }
 0xc12   :  { %v3991_v30 = vand.u32 4294901760, %v3990_v28  ;;  %10962 = vmatprep.subr.bf16.mxu0 %v11625_v52 }
 0xc14   :  { %v3992_v31 = vsub.f32 %v3990_v28, %v3991_v30 }
 0xc15   :  { %10964 = vmatpush3.bf16.msra.mxu0 %v11866_v2 }
 0xc16   :  { %v3993_v33 = vand.u32 4294901760, %v3992_v31  ;;  %10971 = vmatprep.subr.bf16.mxu0 %v11625_v52 }
 0xc18   :  { %10035 = vmatmul.mubr.f32.vlgmr.msra.gmra.mrb[12].mxu0 %v3991_v30  ;;  %10002 = vmatmul.mubr.f32.vlgmr.msra.gmra.mrb[16].mxu1 %v3993_v33 }
 0xc19   :  { %10955 = vmatpush3.bf16.msra.mxu1 %v11881_v3  ;;  %10973 = vmatpush3.bf16.msra.mxu0 %v11858_v36 }
 0xc1a   :  { %10956 = vmatprep.subr.bf16.mxu1 %v11625_v52  ;;  %10974 = vmatprep.subr.bf16.mxu0 %v11625_v52 }
 0xc1b   :  { %10023 = vmatprep.mubr.msk.f32.mxu1 %vm11626_vm6, %v11622_v1  ;;  %10056 = vmatprep.mubr.msk.f32.mxu0 %vm11626_vm6, %v11622_v1 }
 0xc1d   :  { %10958 = vmatpush3.bf16.msra.mxu1 %v11884_v4  ;;  %10976 = vmatpush3.bf16.msra.mxu0 %v11866_v2 }
 0xc1e   :  { %10965 = vmatprep.subr.bf16.mxu1 %v11625_v52  ;;  %11013 = vmatprep.subr.bf16.mxu0 %v11625_v52 }
 0xc20   :  { %10024 = vmatmul.mubr.f32.vlgmr.msra.gmra.mrb[18].mxu1 %v3990_v28  ;;  %10057 = vmatmul.mubr.f32.vlgmr.msra.gmra.mrb[14].mxu0 %v3989_v0 }
 0xc21   :  { %10967 = vmatpush3.bf16.msra.mxu1 %v11886_v5  ;;  %10045 = vmatprep.mubr.msk.f32.mxu1 %vm11626_vm6, %v11622_v1 }
 0xc22   :  { %10968 = vmatprep.subr.bf16.mxu1 %v11625_v52  ;;  %11015 = vmatpush3.bf16.msra.mxu0 %v11858_v36 }
 0xc23   :  { %11016 = vmatprep.subr.bf16.mxu0 %v11625_v52  ;;  %10133 = vmatprep.mubr.msk.f32.mxu0 %vm11626_vm6, %v11622_v1 }
 0xc25   :  { %10970 = vmatpush3.bf16.msra.mxu1 %v11888_v6 }
 0xc26   :  { %10977 = vmatprep.subr.bf16.mxu1 %v11625_v52  ;;  %11018 = vmatpush3.bf16.msra.mxu0 %v11866_v2 }
 0xc27   :  { %11019 = vmatprep.subr.bf16.mxu0 %v11625_v52 }
 0xc28   :  { %10046 = vmatmul.mubr.f32.vlgmr.msra.gmra.mrb[20].mxu1 %v3989_v0 }
 0xc29   :  { %10979 = vmatpush3.bf16.msra.mxu1 %v11923_v58  ;;  %10067 = vmatprep.mubr.msk.f32.mxu1 %vm11626_vm6, %v11622_v1 }
 0xc2a   :  { %10980 = vmatprep.subr.bf16.mxu1 %v11625_v52 }
 0xc2d   :  { %10982 = vmatpush3.bf16.msra.mxu1 %v11927_v25 }
 0xc2e   :  { %10983 = vmatprep.subr.bf16.mxu1 %v11625_v52 }
 0xc34   :  { %v4435_v42 = vpop.permute.xlu1 %4434 }
 0xc35   :  { %v4436_v39 = vsel %vm784_vm7, %v4435_v42, 0 }
 0xc36   :  { %v4507_v40 = vand.u32 4294901760, %v4436_v39 }
 0xc38   :  { %v4508_v56 = vsub.f32 %v4436_v39, %v4507_v40  ;;  %v4414_v39 = vrot.slane %v12179_v18, 6 }
 0xc3a   :  { %v4509_v60 = vand.u32 4294901760, %v4508_v56 }
 0xc3c   :  { %v4510_v38 = vsub.f32 %v4508_v56, %v4509_v60 }
 0xc3e   :  { %v4511_v22 = vand.u32 4294901760, %v4510_v38 }
 0xc40   :  { %10068 = vmatmul.mubr.f32.vlgmr.msra.gmra.mrb[22].mxu1 %v4511_v22  ;;  %v4935_v22 = vrot.slane %v12184_v32, 2 }
 0xc41   :  { %10985 = vmatpush3.bf16.msra.mxu1 %v11934_v44  ;;  %10078 = vmatprep.mubr.msk.f32.mxu1 %vm11626_vm6, %v11622_v1 }
 0xc42   :  { %10986 = vmatprep.subr.bf16.mxu1 %v11625_v52 }
 0xc45   :  { %10988 = vmatpush3.bf16.msra.mxu1 %v11938_v45 }
 0xc46   :  { %10989 = vmatprep.subr.bf16.mxu1 %v11625_v52 }
 0xc48   :  { %10079 = vmatmul.mubr.f32.vlgmr.msra.gmra.mrb[22].mxu1 %v4507_v40 }
 0xc49   :  { %10991 = vmatpush3.bf16.msra.mxu1 %v11944_v46  ;;  %10089 = vmatprep.mubr.msk.f32.mxu1 %vm11626_vm6, %v11622_v1 }
 0xc4a   :  { %10992 = vmatprep.subr.bf16.mxu1 %v11625_v52 }
 0xc4d   :  { %10994 = vmatpush3.bf16.msra.mxu1 %v11949_v50 }
 0xc4e   :  { %10995 = vmatprep.subr.bf16.mxu1 %v11625_v52 }
 0xc50   :  { %10090 = vmatmul.mubr.f32.vlgmr.msra.gmra.mrb[22].mxu1 %v4508_v56 }
 0xc51   :  { %10997 = vmatpush3.bf16.msra.mxu1 %v11923_v58  ;;  %10100 = vmatprep.mubr.msk.f32.mxu1 %vm11626_vm6, %v11622_v1 }
 0xc52   :  { %10998 = vmatprep.subr.bf16.mxu1 %v11625_v52 }
 0xc55   :  { %11000 = vmatpush3.bf16.msra.mxu1 %v11927_v25 }
 0xc56   :  { %11001 = vmatprep.subr.bf16.mxu1 %v11625_v52 }
 0xc58   :  { %10101 = vmatmul.mubr.f32.vlgmr.msra.gmra.mrb[22].mxu1 %v4509_v60 }
 0xc59   :  { %11003 = vmatpush3.bf16.msra.mxu1 %v11961_v53  ;;  %10111 = vmatprep.mubr.msk.f32.mxu1 %vm11626_vm6, %v11622_v1 }
 0xc5a   :  { %11004 = vmatprep.subr.bf16.mxu1 %v11625_v52 }
 0xc5d   :  { %11006 = vmatpush3.bf16.msra.mxu1 %v11965_v55 }
 0xc5e   :  { %11007 = vmatprep.subr.bf16.mxu1 %v11625_v52 }
 0xc60   :  { %10112 = vmatmul.mubr.f32.vlgmr.msra.gmra.mrb[22].mxu1 %v4507_v40 }
 0xc61   :  { %11009 = vmatpush3.bf16.msra.mxu1 %v11923_v58  ;;  %10122 = vmatprep.mubr.msk.f32.mxu1 %vm11626_vm6, %v11622_v1 }
 0xc62   :  { %11010 = vmatprep.subr.bf16.mxu1 %v11625_v52 }
 0xc65   :  { %11012 = vmatpush3.bf16.msra.mxu1 %v11927_v25 }
 0xc66   :  { %11049 = vmatprep.subr.bf16.mxu1 %v11625_v52 }
 0xc68   :  { %10123 = vmatmul.mubr.f32.vlgmr.msra.gmra.mrb[22].mxu1 %v4507_v40 }
 0xc69   :  { %11051 = vmatpush3.bf16.msra.mxu1 %v11923_v58  ;;  %10199 = vmatprep.mubr.msk.f32.mxu1 %vm11626_vm6, %v11622_v1 }
 0xc6a   :  { %11052 = vmatprep.subr.bf16.mxu1 %v11625_v52 }
 0xc6d   :  { %11054 = vmatpush3.bf16.msra.mxu1 %v11927_v25 }
 0xc6e   :  { %11055 = vmatprep.subr.bf16.mxu1 %v11625_v52 }
 0xce3   :  { %v4086_v37 = vpop.f32.mrb[10].mxu0 }
 0xce4   :  { %v10014_v8 = vpop.f32.mrb[11].mxu0 }
 0xceb   :  { %v4243_v9 = vpop.f32.mrb[12].mxu0  ;;  %v3995_v48 = vpop.f32.mrb[16].mxu1 }
 0xcec   :  { %v4087_v43 = vadd.f32 %v4086_v37, %v3995_v48  ;;  %v10036_v47 = vpop.f32.mrb[13].mxu0  ;;  %v10003_v63 = vpop.f32.mrb[17].mxu1 }
 0xcf3   :  { %v4166_v49 = vpop.f32.mrb[18].mxu1  ;;  %v4401_v57 = vpop.f32.mrb[14].mxu0 }
 0xcf4   :  { %v4167_v10 = vadd.f32 %v4166_v49, %v4087_v43  ;;  %v10025_v11 = vpop.f32.mrb[19].mxu1  ;;  %v10058_v12 = vpop.f32.mrb[15].mxu0 }
 0xcf6   :  { %v4244_v41 = vadd.f32 %v4243_v9, %v4167_v10 }
 0xcfb   :  { %v4326_v13 = vpop.f32.mrb[20].mxu1 }
 0xcfc   :  { %v4327_v17 = vadd.f32 %v4326_v13, %v4244_v41  ;;  %v10047_v14 = vpop.f32.mrb[21].mxu1 }
 0xcfe   :  { %v4402_v16 = vadd.f32 %v4401_v57, %v4327_v17 }
 0xd00   :  { %v4405_v20 = vadd.f32 %v4402_v16, %v11841_v29 }
 0xd02   :  { %11506 = vtanh.f32 %v4405_v20  ;;  %v9108_v35 = vmul.f32 -1.442695, %v4405_v20 }
 0xd0c   :  { %v11507_v19 = vpop.eup %11506 }
 0xd0d   :  { %4418 = vrot.lane.b32.xlu0 %v11507_v19, %s11623_s0 }
 0xd3b   :  { %v4919_v21 = vpop.f32.mrb[22].mxu1 }
 0xd3c   :  { %v4924_v26 = vrot.slane %v4919_v21, 2  ;;  %v10124_v27 = vpop.f32.mrb[23].mxu1 }
 0xd3e   :  { %v4926_v34 = vadd.f32 %v4924_v26, %v11839_v24 }
 0xd40   :  { %11508 = vtanh.f32 %v4926_v34  ;;  %v9109_v0 = vmul.f32 -1.442695, %v4926_v34 }
 0xd41   :  { %11510 = vpow2.f32 %v9108_v35 }
 0xd4a   :  { %v11509_v15 = vpop.eup %11508 }
 0xd4b   :  { %4939 = vrot.lane.b32.xlu1 %v11509_v15, %s11623_s0  ;;  %v11511_v51 = vpop.eup %11510 }
 0xd4c   :  { %v4409_v59 = vadd.f32 1.0, %v11511_v51 }
 0xd4e   :  { %11512 = vrcp.f32 %v4409_v59 }
 0xd4f   :  { %11514 = vpow2.f32 %v9109_v0 }
 0xd58   :  { %v11513_v61 = vpop.eup %11512 }
 0xd59   :  { %v11515_v28 = vpop.eup %11514  ;;  %v4416_v40 = vmul.f32 %v11513_v61, %v4414_v39 }
 0xd5a   :  { %v4930_v30 = vadd.f32 1.0, %v11515_v28 }
 0xd5c   :  { %11516 = vrcp.f32 %v4930_v30 }
 0xd66   :  { %v11517_v31 = vpop.eup %11516 }
 0xd67   :  { %v4937_v37 = vmul.f32 %v11517_v31, %v4935_v22 }
 0xd7f   :  { %v4419_v62 = vpop.permute.xlu0 %4418 }
 0xd80   :  { %v4421_v7 = vmul.f32 %v11513_v61, %v4419_v62 }
 0xd82   :  { %4423 = vrot.lane.b32.xlu0 %v4421_v7, %s11623_s0 }
 0xdbd   :  { %v4940_v33 = vpop.permute.xlu1 %4939 }
 0xdbe   :  { %v4942_v42 = vmul.f32 %v11517_v31, %v4940_v33 }
 0xdc0   :  { %4944 = vrot.lane.b32.xlu1 %v4942_v42, %s11623_s0 }
 0xdf4   :  { %v4424_v56 = vpop.permute.xlu0 %4423 }
 0xdf5   :  { %v12271_v60 = vadd.f32 %v4424_v56, %v4416_v40 }
 0xdf7   :  { %11518 = vtanh.f32 %v12271_v60 }
 0xe01   :  { %v11519_v38 = vpop.eup %11518 }
 0xe02   :  { %4429 = vrot.lane.b32.xlu0 %v11519_v38, %s11623_s0 }
 0xe32   :  { %v4945_v8 = vpop.permute.xlu1 %4944 }
 0xe33   :  { %v12276_v9 = vadd.f32 %v4945_v8, %v4937_v37 }
 0xe35   :  { %11520 = vtanh.f32 %v12276_v9 }
 0xe3f   :  { %v11521_v48 = vpop.eup %11520 }
 0xe40   :  { %4950 = vrot.lane.b32.xlu1 %v11521_v48, %s11623_s0  ;;  %v5456_v48 = vrot.slane %v12271_v60, 6 }
 0xe74   :  { %v4430_v18 = vpop.permute.xlu0 %4429 }
 0xe75   :  { %v4432_v43 = vmul.f32 %v11513_v61, %v4430_v18 }
 0xe77   :  { %4955 = vrot.lane.b32.xlu0 %v4432_v43, %s11624_s1 }
 0xeb2   :  { %v4951_v47 = vpop.permute.xlu1 %4950 }
 0xeb3   :  { %v4953_v63 = vmul.f32 %v11517_v31, %v4951_v47 }
 0xeb5   :  { %v5476_v49 = vrot.slane %v4953_v63, 6 }
 0xeb7   :  { %5477 = vrot.lane.b32.xlu1 %v5476_v49, %s11624_s1  ;;  %v5978_v49 = vrot.slane %v12276_v9, 2 }
 0xee9   :  { %v4956_v57 = vpop.permute.xlu0 %4955 }
 0xeea   :  { %v4957_v32 = vsel %vm784_vm7, %v4956_v57, 0 }
 0xeeb   :  { %v5028_v10 = vand.u32 4294901760, %v4957_v32 }
 0xeed   :  { %v5029_v11 = vsub.f32 %v4957_v32, %v5028_v10 }
 0xeef   :  { %v5030_v12 = vand.u32 4294901760, %v5029_v11 }
 0xef1   :  { %v5031_v41 = vsub.f32 %v5029_v11, %v5030_v12 }
 0xef3   :  { %v5032_v13 = vand.u32 4294901760, %v5031_v41 }
 0xef5   :  { %10134 = vmatmul.mubr.f32.vlgmr.msra.gmra.mrb[16].mxu0 %v5032_v13 }
 0xef6   :  { %11021 = vmatpush3.bf16.msra.mxu0 %v11872_v23  ;;  %10144 = vmatprep.mubr.msk.f32.mxu0 %vm11626_vm6, %v11622_v1 }
 0xef7   :  { %11022 = vmatprep.subr.bf16.mxu0 %v11625_v52 }
 0xefa   :  { %11024 = vmatpush3.bf16.msra.mxu0 %v11879_v54 }
 0xefb   :  { %11025 = vmatprep.subr.bf16.mxu0 %v11625_v52 }
 0xefd   :  { %10145 = vmatmul.mubr.f32.vlgmr.msra.gmra.mrb[16].mxu0 %v5028_v10 }
 0xefe   :  { %11027 = vmatpush3.bf16.msra.mxu0 %v11881_v3  ;;  %10155 = vmatprep.mubr.msk.f32.mxu0 %vm11626_vm6, %v11622_v1 }
 0xeff   :  { %11028 = vmatprep.subr.bf16.mxu0 %v11625_v52 }
 0xf02   :  { %11030 = vmatpush3.bf16.msra.mxu0 %v11884_v4 }
 0xf03   :  { %11031 = vmatprep.subr.bf16.mxu0 %v11625_v52 }
 0xf05   :  { %10156 = vmatmul.mubr.f32.vlgmr.msra.gmra.mrb[16].mxu0 %v5029_v11 }
 0xf06   :  { %11033 = vmatpush3.bf16.msra.mxu0 %v11858_v36  ;;  %10166 = vmatprep.mubr.msk.f32.mxu0 %vm11626_vm6, %v11622_v1 }
 0xf07   :  { %11034 = vmatprep.subr.bf16.mxu0 %v11625_v52 }
 0xf0a   :  { %11036 = vmatpush3.bf16.msra.mxu0 %v11866_v2 }
 0xf0b   :  { %11037 = vmatprep.subr.bf16.mxu0 %v11625_v52 }
 0xf0d   :  { %10167 = vmatmul.mubr.f32.vlgmr.msra.gmra.mrb[16].mxu0 %v5030_v12 }
 0xf0e   :  { %11039 = vmatpush3.bf16.msra.mxu0 %v11886_v5  ;;  %10177 = vmatprep.mubr.msk.f32.mxu0 %vm11626_vm6, %v11622_v1 }
 0xf0f   :  { %11040 = vmatprep.subr.bf16.mxu0 %v11625_v52 }
 0xf12   :  { %11042 = vmatpush3.bf16.msra.mxu0 %v11888_v6 }
 0xf13   :  { %11043 = vmatprep.subr.bf16.mxu0 %v11625_v52 }
 0xf15   :  { %10178 = vmatmul.mubr.f32.vlgmr.msra.gmra.mrb[16].mxu0 %v5028_v10 }
 0xf16   :  { %11045 = vmatpush3.bf16.msra.mxu0 %v11858_v36  ;;  %10188 = vmatprep.mubr.msk.f32.mxu0 %vm11626_vm6, %v11622_v1 }
 0xf17   :  { %11046 = vmatprep.subr.bf16.mxu0 %v11625_v52 }
 0xf1a   :  { %11048 = vmatpush3.bf16.msra.mxu0 %v11866_v2 }
 0xf1b   :  { %11085 = vmatprep.subr.bf16.mxu0 %v11625_v52 }
 0xf1d   :  { %10189 = vmatmul.mubr.f32.vlgmr.msra.gmra.mrb[16].mxu0 %v5028_v10 }
 0xf1e   :  { %11087 = vmatpush3.bf16.msra.mxu0 %v11858_v36  ;;  %10265 = vmatprep.mubr.msk.f32.mxu0 %vm11626_vm6, %v11622_v1 }
 0xf1f   :  { %11088 = vmatprep.subr.bf16.mxu0 %v11625_v52 }
 0xf22   :  { %11090 = vmatpush3.bf16.msra.mxu0 %v11866_v2 }
 0xf23   :  { %11091 = vmatprep.subr.bf16.mxu0 %v11625_v52 }
 0xf29   :  { %v5478_v17 = vpop.permute.xlu1 %5477 }
 0xf2a   :  { %v5479_v14 = vsel %vm784_vm7, %v5478_v17, 0 }
 0xf2b   :  { %v5550_v16 = vand.u32 4294901760, %v5479_v14 }
 0xf2d   :  { %v5551_v20 = vsub.f32 %v5479_v14, %v5550_v16 }
 0xf2f   :  { %v5552_v19 = vand.u32 4294901760, %v5551_v20 }
 0xf31   :  { %v5553_v21 = vsub.f32 %v5551_v20, %v5552_v19 }
 0xf33   :  { %v5554_v26 = vand.u32 4294901760, %v5553_v21 }
 0xf35   :  { %10200 = vmatmul.mubr.f32.vlgmr.msra.gmra.mrb[24].mxu1 %v5554_v26 }
 0xf36   :  { %11057 = vmatpush3.bf16.msra.mxu1 %v11934_v44  ;;  %10210 = vmatprep.mubr.msk.f32.mxu1 %vm11626_vm6, %v11622_v1 }
 0xf37   :  { %11058 = vmatprep.subr.bf16.mxu1 %v11625_v52 }
 0xf3a   :  { %11060 = vmatpush3.bf16.msra.mxu1 %v11938_v45 }
 0xf3b   :  { %11061 = vmatprep.subr.bf16.mxu1 %v11625_v52 }
 0xf3d   :  { %10211 = vmatmul.mubr.f32.vlgmr.msra.gmra.mrb[24].mxu1 %v5550_v16 }
 0xf3e   :  { %11063 = vmatpush3.bf16.msra.mxu1 %v11944_v46  ;;  %10221 = vmatprep.mubr.msk.f32.mxu1 %vm11626_vm6, %v11622_v1 }
 0xf3f   :  { %11064 = vmatprep.subr.bf16.mxu1 %v11625_v52 }
 0xf42   :  { %11066 = vmatpush3.bf16.msra.mxu1 %v11949_v50 }
 0xf43   :  { %11067 = vmatprep.subr.bf16.mxu1 %v11625_v52 }
 0xf45   :  { %10222 = vmatmul.mubr.f32.vlgmr.msra.gmra.mrb[24].mxu1 %v5551_v20 }
 0xf46   :  { %11069 = vmatpush3.bf16.msra.mxu1 %v11923_v58  ;;  %10232 = vmatprep.mubr.msk.f32.mxu1 %vm11626_vm6, %v11622_v1 }
 0xf47   :  { %11070 = vmatprep.subr.bf16.mxu1 %v11625_v52 }
 0xf4a   :  { %11072 = vmatpush3.bf16.msra.mxu1 %v11927_v25 }
 0xf4b   :  { %11073 = vmatprep.subr.bf16.mxu1 %v11625_v52 }
 0xf4d   :  { %10233 = vmatmul.mubr.f32.vlgmr.msra.gmra.mrb[24].mxu1 %v5552_v19 }
 0xf4e   :  { %11075 = vmatpush3.bf16.msra.mxu1 %v11961_v53  ;;  %10243 = vmatprep.mubr.msk.f32.mxu1 %vm11626_vm6, %v11622_v1 }
 0xf4f   :  { %11076 = vmatprep.subr.bf16.mxu1 %v11625_v52 }
 0xf52   :  { %11078 = vmatpush3.bf16.msra.mxu1 %v11965_v55 }
 0xf53   :  { %11079 = vmatprep.subr.bf16.mxu1 %v11625_v52 }
 0xf55   :  { %10244 = vmatmul.mubr.f32.vlgmr.msra.gmra.mrb[24].mxu1 %v5550_v16 }
 0xf56   :  { %11081 = vmatpush3.bf16.msra.mxu1 %v11923_v58  ;;  %10254 = vmatprep.mubr.msk.f32.mxu1 %vm11626_vm6, %v11622_v1 }
 0xf57   :  { %11082 = vmatprep.subr.bf16.mxu1 %v11625_v52 }
 0xf5a   :  { %11084 = vmatpush3.bf16.msra.mxu1 %v11927_v25 }
 0xf5b   :  { %11121 = vmatprep.subr.bf16.mxu1 %v11625_v52 }
 0xf5d   :  { %10255 = vmatmul.mubr.f32.vlgmr.msra.gmra.mrb[24].mxu1 %v5550_v16 }
 0xf5e   :  { %11123 = vmatpush3.bf16.msra.mxu1 %v11923_v58  ;;  %10331 = vmatprep.mubr.msk.f32.mxu1 %vm11626_vm6, %v11622_v1 }
 0xf5f   :  { %11124 = vmatprep.subr.bf16.mxu1 %v11625_v52 }
 0xf62   :  { %11126 = vmatpush3.bf16.msra.mxu1 %v11927_v25 }
 0xf63   :  { %11127 = vmatprep.subr.bf16.mxu1 %v11625_v52 }
 0xff0   :  { %v5440_v27 = vpop.f32.mrb[16].mxu0 }
 0xff1   :  { %v5445_v34 = vrot.slane %v5440_v27, 6  ;;  %v10190_v15 = vpop.f32.mrb[17].mxu0 }
 0xff3   :  { %v5447_v35 = vadd.f32 %v5445_v34, %v11841_v29 }
 0xff5   :  { %11522 = vtanh.f32 %v5447_v35  ;;  %v9110_v28 = vmul.f32 -1.442695, %v5447_v35 }
 0xfff   :  { %v11523_v51 = vpop.eup %11522 }
0x1000   :  { %5460 = vrot.lane.b32.xlu0 %v11523_v51, %s11623_s0 }
0x1030   :  { %v5962_v59 = vpop.f32.mrb[24].mxu1 }
0x1031   :  { %v5967_v61 = vrot.slane %v5962_v59, 4  ;;  %v10256_v62 = vpop.f32.mrb[25].mxu1 }
0x1033   :  { %v5969_v7 = vadd.f32 %v5967_v61, %v11839_v24 }
0x1035   :  { %11524 = vtanh.f32 %v5969_v7  ;;  %v9111_v40 = vmul.f32 -1.442695, %v5969_v7 }
0x1036   :  { %11526 = vpow2.f32 %v9110_v28 }
0x103f   :  { %v11525_v0 = vpop.eup %11524 }
0x1040   :  { %5982 = vrot.lane.b32.xlu1 %v11525_v0, %s11623_s0  ;;  %v11527_v30 = vpop.eup %11526 }
0x1041   :  { %v5451_v31 = vadd.f32 1.0, %v11527_v30 }
0x1043   :  { %11528 = vrcp.f32 %v5451_v31 }
0x1044   :  { %11530 = vpow2.f32 %v9111_v40 }
0x104d   :  { %v11529_v33 = vpop.eup %11528 }
0x104e   :  { %v11531_v56 = vpop.eup %11530  ;;  %v5458_v18 = vmul.f32 %v11529_v33, %v5456_v48 }
0x104f   :  { %v5973_v38 = vadd.f32 1.0, %v11531_v56 }
0x1051   :  { %11532 = vrcp.f32 %v5973_v38 }
0x105b   :  { %v11533_v22 = vpop.eup %11532 }
0x105c   :  { %v5980_v57 = vmul.f32 %v11533_v22, %v5978_v49 }
0x1072   :  { %v5461_v42 = vpop.permute.xlu0 %5460 }
0x1073   :  { %v5463_v39 = vmul.f32 %v11529_v33, %v5461_v42 }
0x1075   :  { %5465 = vrot.lane.b32.xlu0 %v5463_v39, %s11623_s0 }
0x10b2   :  { %v5983_v37 = vpop.permute.xlu1 %5982 }
0x10b3   :  { %v5985_v8 = vmul.f32 %v11533_v22, %v5983_v37 }
0x10b5   :  { %5987 = vrot.lane.b32.xlu1 %v5985_v8, %s11623_s0 }
0x10e7   :  { %v5466_v43 = vpop.permute.xlu0 %5465 }
0x10e8   :  { %v12363_v47 = vadd.f32 %v5466_v43, %v5458_v18 }
0x10ea   :  { %11534 = vtanh.f32 %v12363_v47 }
0x10f4   :  { %v11535_v63 = vpop.eup %11534 }
0x10f5   :  { %5471 = vrot.lane.b32.xlu0 %v11535_v63, %s11623_s0 }
0x1127   :  { %v5988_v32 = vpop.permute.xlu1 %5987 }
0x1128   :  { %v12368_v10 = vadd.f32 %v5988_v32, %v5980_v57 }
0x112a   :  { %11536 = vtanh.f32 %v12368_v10 }
0x1134   :  { %v11537_v11 = vpop.eup %11536 }
0x1135   :  { %5993 = vrot.lane.b32.xlu1 %v11537_v11, %s11623_s0 }
0x1167   :  { %v5472_v60 = vpop.permute.xlu0 %5471 }
0x1168   :  { %v5474_v12 = vmul.f32 %v11529_v33, %v5472_v60  ;;  %v6500_v60 = vrot.slane %v12363_v47, 6 }
0x116a   :  { %v5998_v41 = vrot.slane %v5474_v12, 2 }
0x116c   :  { %5999 = vrot.lane.b32.xlu0 %v5998_v41, %s11624_s1 }
0x11a7   :  { %v5994_v13 = vpop.permute.xlu1 %5993 }
0x11a8   :  { %v5996_v17 = vmul.f32 %v11533_v22, %v5994_v13 }
0x11aa   :  { %v6520_v14 = vrot.slane %v5996_v17, 4 }
0x11ac   :  { %6521 = vrot.lane.b32.xlu1 %v6520_v14, %s11624_s1  ;;  %v7022_v14 = vrot.slane %v12368_v10, 2 }
0x11de   :  { %v6000_v9 = vpop.permute.xlu0 %5999 }
0x11df   :  { %v6001_v16 = vsel %vm784_vm7, %v6000_v9, 0 }
0x11e0   :  { %v6072_v20 = vand.u32 4294901760, %v6001_v16 }
0x11e2   :  { %v6073_v19 = vsub.f32 %v6001_v16, %v6072_v20 }
0x11e4   :  { %v6074_v21 = vand.u32 4294901760, %v6073_v19 }
0x11e6   :  { %v6075_v26 = vsub.f32 %v6073_v19, %v6074_v21 }
0x11e8   :  { %v6076_v27 = vand.u32 4294901760, %v6075_v26 }
0x11ea   :  { %10266 = vmatmul.mubr.f32.vlgmr.msra.gmra.mrb[18].mxu0 %v6076_v27 }
0x11eb   :  { %11093 = vmatpush3.bf16.msra.mxu0 %v11872_v23  ;;  %10276 = vmatprep.mubr.msk.f32.mxu0 %vm11626_vm6, %v11622_v1 }
0x11ec   :  { %11094 = vmatprep.subr.bf16.mxu0 %v11625_v52 }
0x11ef   :  { %11096 = vmatpush3.bf16.msra.mxu0 %v11879_v54 }
0x11f0   :  { %11097 = vmatprep.subr.bf16.mxu0 %v11625_v52 }
0x11f2   :  { %10277 = vmatmul.mubr.f32.vlgmr.msra.gmra.mrb[18].mxu0 %v6072_v20 }
0x11f3   :  { %11099 = vmatpush3.bf16.msra.mxu0 %v11881_v3  ;;  %10287 = vmatprep.mubr.msk.f32.mxu0 %vm11626_vm6, %v11622_v1 }
0x11f4   :  { %11100 = vmatprep.subr.bf16.mxu0 %v11625_v52 }
0x11f7   :  { %11102 = vmatpush3.bf16.msra.mxu0 %v11884_v4 }
0x11f8   :  { %11103 = vmatprep.subr.bf16.mxu0 %v11625_v52 }
0x11fa   :  { %10288 = vmatmul.mubr.f32.vlgmr.msra.gmra.mrb[18].mxu0 %v6073_v19 }
0x11fb   :  { %11105 = vmatpush3.bf16.msra.mxu0 %v11858_v36  ;;  %10298 = vmatprep.mubr.msk.f32.mxu0 %vm11626_vm6, %v11622_v1 }
0x11fc   :  { %11106 = vmatprep.subr.bf16.mxu0 %v11625_v52 }
0x11ff   :  { %11108 = vmatpush3.bf16.msra.mxu0 %v11866_v2 }
0x1200   :  { %11109 = vmatprep.subr.bf16.mxu0 %v11625_v52 }
0x1202   :  { %10299 = vmatmul.mubr.f32.vlgmr.msra.gmra.mrb[18].mxu0 %v6074_v21 }
0x1203   :  { %11111 = vmatpush3.bf16.msra.mxu0 %v11886_v5  ;;  %10309 = vmatprep.mubr.msk.f32.mxu0 %vm11626_vm6, %v11622_v1 }
0x1204   :  { %11112 = vmatprep.subr.bf16.mxu0 %v11625_v52 }
0x1207   :  { %11114 = vmatpush3.bf16.msra.mxu0 %v11888_v6 }
0x1208   :  { %11115 = vmatprep.subr.bf16.mxu0 %v11625_v52 }
0x120a   :  { %10310 = vmatmul.mubr.f32.vlgmr.msra.gmra.mrb[18].mxu0 %v6072_v20 }
0x120b   :  { %11117 = vmatpush3.bf16.msra.mxu0 %v11858_v36  ;;  %10320 = vmatprep.mubr.msk.f32.mxu0 %vm11626_vm6, %v11622_v1 }
0x120c   :  { %11118 = vmatprep.subr.bf16.mxu0 %v11625_v52 }
0x120f   :  { %11120 = vmatpush3.bf16.msra.mxu0 %v11866_v2 }
0x1210   :  { %11157 = vmatprep.subr.bf16.mxu0 %v11625_v52 }
0x1212   :  { %10321 = vmatmul.mubr.f32.vlgmr.msra.gmra.mrb[18].mxu0 %v6072_v20 }
0x1213   :  { %11159 = vmatpush3.bf16.msra.mxu0 %v11858_v36  ;;  %10397 = vmatprep.mubr.msk.f32.mxu0 %vm11626_vm6, %v11622_v1 }
0x1214   :  { %11160 = vmatprep.subr.bf16.mxu0 %v11625_v52 }
0x1217   :  { %11162 = vmatpush3.bf16.msra.mxu0 %v11866_v2 }
0x1218   :  { %11163 = vmatprep.subr.bf16.mxu0 %v11625_v52 }
0x121e   :  { %v6522_v34 = vpop.permute.xlu1 %6521 }
0x121f   :  { %v6523_v15 = vsel %vm784_vm7, %v6522_v34, 0 }
0x1220   :  { %v6594_v35 = vand.u32 4294901760, %v6523_v15 }
0x1222   :  { %v6595_v51 = vsub.f32 %v6523_v15, %v6594_v35 }
0x1224   :  { %v6596_v59 = vand.u32 4294901760, %v6595_v51 }
0x1226   :  { %v6597_v61 = vsub.f32 %v6595_v51, %v6596_v59 }
0x1228   :  { %v6598_v62 = vand.u32 4294901760, %v6597_v61 }
0x122a   :  { %10332 = vmatmul.mubr.f32.vlgmr.msra.gmra.mrb[26].mxu1 %v6598_v62 }
0x122b   :  { %11129 = vmatpush3.bf16.msra.mxu1 %v11934_v44  ;;  %10342 = vmatprep.mubr.msk.f32.mxu1 %vm11626_vm6, %v11622_v1 }
0x122c   :  { %11130 = vmatprep.subr.bf16.mxu1 %v11625_v52 }
0x122f   :  { %11132 = vmatpush3.bf16.msra.mxu1 %v11938_v45 }
0x1230   :  { %11133 = vmatprep.subr.bf16.mxu1 %v11625_v52 }
0x1232   :  { %10343 = vmatmul.mubr.f32.vlgmr.msra.gmra.mrb[26].mxu1 %v6594_v35 }
0x1233   :  { %11135 = vmatpush3.bf16.msra.mxu1 %v11944_v46  ;;  %10353 = vmatprep.mubr.msk.f32.mxu1 %vm11626_vm6, %v11622_v1 }
0x1234   :  { %11136 = vmatprep.subr.bf16.mxu1 %v11625_v52 }
0x1237   :  { %11138 = vmatpush3.bf16.msra.mxu1 %v11949_v50 }
0x1238   :  { %11139 = vmatprep.subr.bf16.mxu1 %v11625_v52 }
0x123a   :  { %10354 = vmatmul.mubr.f32.vlgmr.msra.gmra.mrb[26].mxu1 %v6595_v51 }
0x123b   :  { %11141 = vmatpush3.bf16.msra.mxu1 %v11923_v58  ;;  %10364 = vmatprep.mubr.msk.f32.mxu1 %vm11626_vm6, %v11622_v1 }
0x123c   :  { %11142 = vmatprep.subr.bf16.mxu1 %v11625_v52 }
0x123f   :  { %11144 = vmatpush3.bf16.msra.mxu1 %v11927_v25 }
0x1240   :  { %11145 = vmatprep.subr.bf16.mxu1 %v11625_v52 }
0x1242   :  { %10365 = vmatmul.mubr.f32.vlgmr.msra.gmra.mrb[26].mxu1 %v6596_v59 }
0x1243   :  { %11147 = vmatpush3.bf16.msra.mxu1 %v11961_v53  ;;  %10375 = vmatprep.mubr.msk.f32.mxu1 %vm11626_vm6, %v11622_v1 }
0x1244   :  { %11148 = vmatprep.subr.bf16.mxu1 %v11625_v52 }
0x1247   :  { %11150 = vmatpush3.bf16.msra.mxu1 %v11965_v55 }
0x1248   :  { %11151 = vmatprep.subr.bf16.mxu1 %v11625_v52 }
0x124a   :  { %10376 = vmatmul.mubr.f32.vlgmr.msra.gmra.mrb[26].mxu1 %v6594_v35 }
0x124b   :  { %11153 = vmatpush3.bf16.msra.mxu1 %v11923_v58  ;;  %10386 = vmatprep.mubr.msk.f32.mxu1 %vm11626_vm6, %v11622_v1 }
0x124c   :  { %11154 = vmatprep.subr.bf16.mxu1 %v11625_v52 }
0x124f   :  { %11156 = vmatpush3.bf16.msra.mxu1 %v11927_v25 }
0x1250   :  { %11193 = vmatprep.subr.bf16.mxu1 %v11625_v52 }
0x1252   :  { %10387 = vmatmul.mubr.f32.vlgmr.msra.gmra.mrb[26].mxu1 %v6594_v35 }
0x1253   :  { %11195 = vmatpush3.bf16.msra.mxu1 %v11923_v58  ;;  %10463 = vmatprep.mubr.msk.f32.mxu1 %vm11626_vm6, %v11622_v1 }
0x1254   :  { %11196 = vmatprep.subr.bf16.mxu1 %v11625_v52 }
0x1257   :  { %11198 = vmatpush3.bf16.msra.mxu1 %v11927_v25 }
0x1258   :  { %11205 = vmatprep.subr.bf16.mxu1 %v11625_v52 }
0x12e5   :  { %v6484_v7 = vpop.f32.mrb[18].mxu0 }
0x12e6   :  { %v6489_v0 = vrot.slane %v6484_v7, 4  ;;  %v10322_v28 = vpop.f32.mrb[19].mxu0 }
0x12e8   :  { %v6491_v30 = vadd.f32 %v6489_v0, %v11841_v29 }
0x12ea   :  { %11538 = vtanh.f32 %v6491_v30  ;;  %v9112_v38 = vmul.f32 -1.442695, %v6491_v30 }
0x12f4   :  { %v11539_v31 = vpop.eup %11538 }
0x12f5   :  { %6504 = vrot.lane.b32.xlu0 %v11539_v31, %s11623_s0 }
0x1325   :  { %v7006_v33 = vpop.f32.mrb[26].mxu1 }
0x1326   :  { %v7011_v42 = vrot.slane %v7006_v33, 6  ;;  %v10388_v39 = vpop.f32.mrb[27].mxu1 }
0x1328   :  { %v7013_v40 = vadd.f32 %v7011_v42, %v11839_v24 }
0x132a   :  { %11540 = vtanh.f32 %v7013_v40  ;;  %v9113_v43 = vmul.f32 -1.442695, %v7013_v40 }
0x132b   :  { %11542 = vpow2.f32 %v9112_v38 }
0x1334   :  { %v11541_v56 = vpop.eup %11540 }
0x1335   :  { %7026 = vrot.lane.b32.xlu1 %v11541_v56, %s11623_s0  ;;  %v11543_v22 = vpop.eup %11542 }
0x1336   :  { %v6495_v37 = vadd.f32 1.0, %v11543_v22 }
0x1338   :  { %11544 = vrcp.f32 %v6495_v37 }
0x1339   :  { %11546 = vpow2.f32 %v9113_v43 }
0x1342   :  { %v11545_v8 = vpop.eup %11544 }
0x1343   :  { %v11547_v63 = vpop.eup %11546  ;;  %v6502_v12 = vmul.f32 %v11545_v8, %v6500_v60 }
0x1344   :  { %v7017_v49 = vadd.f32 1.0, %v11547_v63 }
0x1346   :  { %11548 = vrcp.f32 %v7017_v49 }
0x1350   :  { %v11549_v57 = vpop.eup %11548 }
0x1351   :  { %v7024_v9 = vmul.f32 %v11549_v57, %v7022_v14 }
0x1367   :  { %v6505_v48 = vpop.permute.xlu0 %6504 }
0x1368   :  { %v6507_v18 = vmul.f32 %v11545_v8, %v6505_v48 }
0x136a   :  { %6509 = vrot.lane.b32.xlu0 %v6507_v18, %s11623_s0 }
0x13a7   :  { %v7027_v32 = vpop.permute.xlu1 %7026 }
0x13a8   :  { %v7029_v11 = vmul.f32 %v11549_v57, %v7027_v32 }
0x13aa   :  { %7031 = vrot.lane.b32.xlu1 %v7029_v11, %s11623_s0 }
0x13dc   :  { %v6510_v41 = vpop.permute.xlu0 %6509 }
0x13dd   :  { %v12455_v13 = vadd.f32 %v6510_v41, %v6502_v12 }
0x13df   :  { %11550 = vtanh.f32 %v12455_v13  ;;  %v7544_v14 = vrot.slane %v12455_v13, 6  ;;  %v8086_v13 = vld [vmem:[%s12712_s2 + $0x20] sm:$0xff] }
0x13e9   :  { %v11551_v17 = vpop.eup %11550 }
0x13ea   :  { %6515 = vrot.lane.b32.xlu0 %v11551_v17, %s11623_s0 }
0x141c   :  { %v7032_v16 = vpop.permute.xlu1 %7031 }
0x141d   :  { %v12460_v20 = vadd.f32 %v7032_v16, %v7024_v9 }
0x141f   :  { %11552 = vtanh.f32 %v12460_v20 }
0x1429   :  { %v11553_v19 = vpop.eup %11552 }
0x142a   :  { %7037 = vrot.lane.b32.xlu1 %v11553_v19, %s11623_s0 }
0x145c   :  { %v6516_v47 = vpop.permute.xlu0 %6515 }
0x145d   :  { %v6518_v21 = vmul.f32 %v11545_v8, %v6516_v47 }
0x145f   :  { %v7042_v26 = vrot.slane %v6518_v21, 4  ;;  %v8063_v21 = vrot.slane %v12460_v20, 2  ;;  %v8088_v20 = vld [vmem:[%s12712_s2 + $0x30] sm:$0xff] }
0x1461   :  { %7043 = vrot.lane.b32.xlu0 %v7042_v26, %s11624_s1 }
0x149c   :  { %v7038_v27 = vpop.permute.xlu1 %7037 }
0x149d   :  { %v7040_v34 = vmul.f32 %v11549_v57, %v7038_v27 }
0x149f   :  { %v7564_v15 = vrot.slane %v7040_v34, 2 }
0x14a1   :  { %7565 = vrot.lane.b32.xlu1 %v7564_v15, %s11624_s1 }
0x14d3   :  { %v7044_v10 = vpop.permute.xlu0 %7043 }
0x14d4   :  { %v7045_v35 = vsel %vm784_vm7, %v7044_v10, 0 }
0x14d5   :  { %v7116_v51 = vand.u32 4294901760, %v7045_v35 }
0x14d7   :  { %v7117_v59 = vsub.f32 %v7045_v35, %v7116_v51 }
0x14d9   :  { %v7118_v61 = vand.u32 4294901760, %v7117_v59 }
0x14db   :  { %v7119_v62 = vsub.f32 %v7117_v59, %v7118_v61 }
0x14dd   :  { %v7120_v7 = vand.u32 4294901760, %v7119_v62  ;;  %v8089_v62 = vld [vmem:[%s12712_s2 + $0x38] sm:$0xff] }
0x14df   :  { %10398 = vmatmul.mubr.f32.vlgmr.msra.gmra.mrb[20].mxu0 %v7120_v7  ;;  %v8102_v7 = vand.u32 4294901760, %v8088_v20 }
0x14e0   :  { %11165 = vmatpush3.bf16.msra.mxu0 %v11872_v23  ;;  %10408 = vmatprep.mubr.msk.f32.mxu0 %vm11626_vm6, %v11622_v1 }
0x14e1   :  { %11166 = vmatprep.subr.bf16.mxu0 %v11625_v52 }
0x14e4   :  { %11168 = vmatpush3.bf16.msra.mxu0 %v11879_v54 }
0x14e5   :  { %11169 = vmatprep.subr.bf16.mxu0 %v11625_v52 }
0x14e7   :  { %10409 = vmatmul.mubr.f32.vlgmr.msra.gmra.mrb[20].mxu0 %v7116_v51 }
0x14e8   :  { %11171 = vmatpush3.bf16.msra.mxu0 %v11881_v3  ;;  %10419 = vmatprep.mubr.msk.f32.mxu0 %vm11626_vm6, %v11622_v1 }
0x14e9   :  { %11172 = vmatprep.subr.bf16.mxu0 %v11625_v52 }
0x14ec   :  { %11174 = vmatpush3.bf16.msra.mxu0 %v11884_v4 }
0x14ed   :  { %11175 = vmatprep.subr.bf16.mxu0 %v11625_v52 }
0x14ef   :  { %10420 = vmatmul.mubr.f32.vlgmr.msra.gmra.mrb[20].mxu0 %v7117_v59  ;;  %v8096_v59 = vand.u32 4294901760, %v8086_v13 }
0x14f0   :  { %11177 = vmatpush3.bf16.msra.mxu0 %v11858_v36  ;;  %10430 = vmatprep.mubr.msk.f32.mxu0 %vm11626_vm6, %v11622_v1 }
0x14f1   :  { %11178 = vmatprep.subr.bf16.mxu0 %v11625_v52 }
0x14f4   :  { %11180 = vmatpush3.bf16.msra.mxu0 %v11866_v2 }
0x14f5   :  { %11181 = vmatprep.subr.bf16.mxu0 %v11625_v52 }
0x14f7   :  { %10431 = vmatmul.mubr.f32.vlgmr.msra.gmra.mrb[20].mxu0 %v7118_v61 }
0x14f8   :  { %11183 = vmatpush3.bf16.msra.mxu0 %v11886_v5  ;;  %10441 = vmatprep.mubr.msk.f32.mxu0 %vm11626_vm6, %v11622_v1 }
0x14f9   :  { %11184 = vmatprep.subr.bf16.mxu0 %v11625_v52 }
0x14fc   :  { %11186 = vmatpush3.bf16.msra.mxu0 %v11888_v6 }
0x14fd   :  { %11187 = vmatprep.subr.bf16.mxu0 %v11625_v52 }
0x14ff   :  { %10442 = vmatmul.mubr.f32.vlgmr.msra.gmra.mrb[20].mxu0 %v7116_v51 }
0x1500   :  { %11189 = vmatpush3.bf16.msra.mxu0 %v11858_v36  ;;  %10452 = vmatprep.mubr.msk.f32.mxu0 %vm11626_vm6, %v11622_v1 }
0x1501   :  { %11190 = vmatprep.subr.bf16.mxu0 %v11625_v52 }
0x1504   :  { %11192 = vmatpush3.bf16.msra.mxu0 %v11866_v2 }
0x1505   :  { %11199 = vmatprep.subr.bf16.mxu0 %v11625_v52 }
0x1507   :  { %10453 = vmatmul.mubr.f32.vlgmr.msra.gmra.mrb[20].mxu0 %v7116_v51  ;;  %v8087_v51 = vld [vmem:[%s12712_s2 + $0x28] sm:$0xff] }
0x1508   :  { %11201 = vmatpush3.bf16.msra.mxu0 %v11934_v44  ;;  %10474 = vmatprep.mubr.msk.f32.mxu0 %vm11626_vm6, %v11622_v1  ;;  %v8099_v61 = vand.u32 4294901760, %v8087_v51 }
0x1509   :  { %11202 = vmatprep.subr.bf16.mxu0 %v11625_v52 }
0x150c   :  { %11204 = vmatpush3.bf16.msra.mxu0 %v11938_v45 }
0x150d   :  { %11211 = vmatprep.subr.bf16.mxu0 %v11625_v52 }
0x1513   :  { %v7566_v36 = vpop.permute.xlu1 %7565 }
0x1514   :  { %v7567_v23 = vsel %vm784_vm7, %v7566_v36, 0 }
0x1515   :  { %v7638_v54 = vand.u32 4294901760, %v7567_v23 }
0x1517   :  { %v7639_v3 = vsub.f32 %v7567_v23, %v7638_v54  ;;  %10475 = vmatmul.mubr.f32.vlgmr.msra.gmra.mrb[22].mxu0 %v7638_v54  ;;  %v8105_v23 = vand.u32 4294901760, %v8089_v62 }
0x1518   :  { %11213 = vmatpush3.bf16.msra.mxu0 %v11923_v58  ;;  %10496 = vmatprep.mubr.msk.f32.mxu0 %vm11626_vm6, %v11622_v1 }
0x1519   :  { %v7640_v2 = vand.u32 4294901760, %v7639_v3  ;;  %11214 = vmatprep.subr.bf16.mxu0 %v11625_v52 }
0x151b   :  { %v7641_v4 = vsub.f32 %v7639_v3, %v7640_v2 }
0x151c   :  { %11216 = vmatpush3.bf16.msra.mxu0 %v11927_v25 }
0x151d   :  { %v7642_v5 = vand.u32 4294901760, %v7641_v4  ;;  %11223 = vmatprep.subr.bf16.mxu0 %v11625_v52  ;;  %v12561_v4 = vsub.f32 %v8089_v62, %v8105_v23 }
0x151f   :  { %10497 = vmatmul.mubr.f32.vlgmr.msra.gmra.mrb[24].mxu0 %v7640_v2  ;;  %10464 = vmatmul.mubr.f32.vlgmr.msra.gmra.mrb[28].mxu1 %v7642_v5  ;;  %v12558_v2 = vsub.f32 %v8088_v20, %v8102_v7 }
0x1520   :  { %11207 = vmatpush3.bf16.msra.mxu1 %v11944_v46  ;;  %11225 = vmatpush3.bf16.msra.mxu0 %v11923_v58 }
0x1521   :  { %11208 = vmatprep.subr.bf16.mxu1 %v11625_v52  ;;  %11226 = vmatprep.subr.bf16.mxu0 %v11625_v52 }
0x1522   :  { %10485 = vmatprep.mubr.msk.f32.mxu1 %vm11626_vm6, %v11622_v1  ;;  %10518 = vmatprep.mubr.msk.f32.mxu0 %vm11626_vm6, %v11622_v1 }
0x1524   :  { %11210 = vmatpush3.bf16.msra.mxu1 %v11949_v50  ;;  %11228 = vmatpush3.bf16.msra.mxu0 %v11927_v25 }
0x1525   :  { %11217 = vmatprep.subr.bf16.mxu1 %v11625_v52  ;;  %11235 = vmatprep.subr.bf16.mxu0 %v11625_v52 }
0x1527   :  { %10486 = vmatmul.mubr.f32.vlgmr.msra.gmra.mrb[30].mxu1 %v7639_v3  ;;  %10519 = vmatmul.mubr.f32.vlgmr.msra.gmra.mrb[26].mxu0 %v7638_v54  ;;  %v12556_v3 = vsub.f32 %v8087_v51, %v8099_v61 }
0x1528   :  { %11219 = vmatpush3.bf16.msra.mxu1 %v11961_v53  ;;  %10507 = vmatprep.mubr.msk.f32.mxu1 %vm11626_vm6, %v11622_v1 }
0x1529   :  { %11220 = vmatprep.subr.bf16.mxu1 %v11625_v52  ;;  %10540 = vmatprep.mubr.msk.f32.mxu0 %vm11626_vm6, %v11622_v1 }
0x152c   :  { %11222 = vmatpush3.bf16.msra.mxu1 %v11965_v55 }
0x152d   :  { %11229 = vmatprep.subr.bf16.mxu1 %v11625_v52 }
0x152f   :  { %10508 = vmatmul.mubr.f32.vlgmr.msra.gmra.mrb[32].mxu1 %v7638_v54  ;;  %v12554_v54 = vsub.f32 %v8086_v13, %v8096_v59 }
0x1530   :  { %10529 = vmatprep.mubr.msk.f32.mxu1 %vm11626_vm6, %v11622_v1 }
0x1531   :  { %v8177_v5 = vand.u32 4294901760, %v12554_v54 }
0x15da   :  { %v7528_v6 = vpop.f32.mrb[20].mxu0 }
0x15db   :  { %v7533_v58 = vrot.slane %v7528_v6, 2  ;;  %v10454_v25 = vpop.f32.mrb[21].mxu0  ;;  %v8184_v6 = vand.u32 4294901760, %v12556_v3 }
0x15dc   :  { %v8198_v25 = vand.u32 4294901760, %v12561_v4 }
0x15dd   :  { %v7535_v44 = vadd.f32 %v7533_v58, %v11841_v29  ;;  %v8191_v58 = vand.u32 4294901760, %v12558_v2 }
0x15df   :  { %11554 = vtanh.f32 %v7535_v44  ;;  %v9114_v18 = vmul.f32 -1.442695, %v7535_v44  ;;  %v8178_v44 = vsub.f32 %v12554_v54, %v8177_v5 }
0x15e9   :  { %v11555_v45 = vpop.eup %11554 }
0x15ea   :  { %v7735_v46 = vpop.f32.mrb[22].mxu0  ;;  %7548 = vrot.lane.b32.xlu1 %v11555_v45, %s11623_s0  ;;  %v8185_v45 = vsub.f32 %v12556_v3, %v8184_v6 }
0x15eb   :  { %v10476_v50 = vpop.f32.mrb[23].mxu0 }
0x15ec   :  { %v8199_v50 = vsub.f32 %v12561_v4, %v8198_v25 }
0x15f2   :  { %v7892_v53 = vpop.f32.mrb[24].mxu0  ;;  %v7644_v0 = vpop.f32.mrb[28].mxu1 }
0x15f3   :  { %v7736_v55 = vadd.f32 %v7735_v46, %v7644_v0  ;;  %v10498_v28 = vpop.f32.mrb[25].mxu0  ;;  %v10465_v30 = vpop.f32.mrb[29].mxu1  ;;  %v8192_v46 = vsub.f32 %v12558_v2, %v8191_v58  ;;  %v8186_v0 = vand.u32 4294901760, %v8185_v45 }
0x15f4   :  { %v8200_v28 = vand.u32 4294901760, %v8199_v50 }
0x15fa   :  { %v7815_v31 = vpop.f32.mrb[30].mxu1  ;;  %v8050_v33 = vpop.f32.mrb[26].mxu0 }
0x15fb   :  { %v7816_v42 = vadd.f32 %v7815_v31, %v7736_v55  ;;  %v10487_v39 = vpop.f32.mrb[31].mxu1  ;;  %v10520_v40 = vpop.f32.mrb[27].mxu0  ;;  %v8193_v55 = vand.u32 4294901760, %v8192_v46 }
0x15fc   :  { %v11242_v40 = vpack.c.bf16 %v12556_v3, %v12554_v54 }
0x15fd   :  { %v7893_v56 = vadd.f32 %v7892_v53, %v7816_v42  ;;  %v8179_v53 = vand.u32 4294901760, %v8178_v44  ;;  %v11239_v31 = vpack.c.bf16 %v8200_v28, %v8193_v55  ;;  %v11233_v42 = vpack.c.bf16 %v8105_v23, %v8102_v7 }
0x15ff   :  { %v11236_v30 = vpack.c.bf16 %v8186_v0, %v8179_v53 }
0x1601   :  { %11237 = vmatpush3.bf16.msra.mxu0 %v11236_v30 }
0x1602   :  { %v7975_v38 = vpop.f32.mrb[32].mxu1  ;;  %11238 = vmatprep.subr.bf16.mxu0 %v11625_v52 }
0x1603   :  { %v7976_v22 = vadd.f32 %v7975_v38, %v7893_v56  ;;  %v10509_v29 = vpop.f32.mrb[33].mxu1  ;;  %v11245_v38 = vpack.c.bf16 %v12561_v4, %v12558_v2 }
0x1604   :  { %v12580_v29 = vpack.c.bf16 %v8198_v25, %v8191_v58 }
0x1605   :  { %v8051_v37 = vadd.f32 %v8050_v33, %v7976_v22  ;;  %11240 = vmatpush3.bf16.msra.mxu0 %v11239_v31  ;;  %v11230_v33 = vpack.c.bf16 %v8099_v61, %v8096_v59  ;;  %v11254_v22 = vpack.c.bf16 %v8184_v6, %v8177_v5 }
0x1606   :  { %11247 = vmatprep.subr.bf16.mxu0 %v11625_v52 }
0x1607   :  { %v8054_v8 = vadd.f32 %v8051_v37, %v11839_v24  ;;  %11231 = vmatpush3.bf16.msra.mxu1 %v11230_v33  ;;  %v12585_v37 = vld [vmem:[%s12712_s2] sm:$0xff] }
0x1608   :  { %11232 = vmatprep.subr.bf16.mxu1 %v11625_v52 }
0x1609   :  { %11556 = vtanh.f32 %v8054_v8  ;;  %v9115_v11 = vmul.f32 -1.442695, %v8054_v8  ;;  %v12590_v8 = vld [vmem:[%s12712_s2 + $0x8] sm:$0xff] }
0x160a   :  { %11558 = vpow2.f32 %v9114_v18  ;;  %v8590_v18 = vand.u32 4294901760, %v12590_v8 }
0x160b   :  { %11234 = vmatpush3.bf16.msra.mxu1 %v11233_v42 }
0x160c   :  { %11241 = vmatprep.subr.bf16.mxu1 %v11625_v52 }
0x1613   :  { %v11557_v48 = vpop.eup %11556 }
0x1614   :  { %8067 = vrot.lane.b32.xlu0 %v11557_v48, %s11623_s0  ;;  %v11559_v43 = vpop.eup %11558  ;;  %v8587_v48 = vand.u32 4294901760, %v12585_v37 }
0x1615   :  { %v7539_v63 = vadd.f32 1.0, %v11559_v43  ;;  %v12597_v43 = vld [vmem:[%s12712_s2 + $0x10] sm:$0xff] }
0x1616   :  { %v11266_v3 = vpack.c.bf16 %v8590_v18, %v8587_v48 }
0x1617   :  { %11560 = vrcp.f32 %v7539_v63  ;;  %v12602_v63 = vld [vmem:[%s12712_s2 + $0x18] sm:$0xff] }
0x1618   :  { %11562 = vpow2.f32 %v9115_v11  ;;  %v12611_v11 = vsub.f32 %v12590_v8, %v8590_v18 }
0x1621   :  { %v11561_v49 = vpop.eup %11560 }
0x1622   :  { %v11563_v60 = vpop.eup %11562  ;;  %v7546_v9 = vmul.f32 %v11561_v49, %v7544_v14  ;;  %v8675_v14 = vand.u32 4294901760, %v12611_v11 }
0x1623   :  { %v8058_v12 = vadd.f32 1.0, %v11563_v60  ;;  %v8593_v60 = vand.u32 4294901760, %v12597_v43 }
0x1625   :  { %11564 = vrcp.f32 %v8058_v12  ;;  %v8596_v12 = vand.u32 4294901760, %v12602_v63 }
0x1627   :  { %v11269_v4 = vpack.c.bf16 %v8596_v12, %v8593_v60 }
0x162f   :  { %v11565_v24 = vpop.eup %11564 }
0x1630   :  { %v8065_v26 = vmul.f32 %v11565_v24, %v8063_v21 }
0x165c   :  { %v7549_v57 = vpop.permute.xlu1 %7548 }
0x165d   :  { %v7551_v32 = vmul.f32 %v11561_v49, %v7549_v57  ;;  %v12607_v57 = vsub.f32 %v12585_v37, %v8587_v48 }
0x165f   :  { %7553 = vrot.lane.b32.xlu1 %v7551_v32, %s11623_s0  ;;  %v11278_v6 = vpack.c.bf16 %v12611_v11, %v12607_v57 }
0x1686   :  { %v8068_v41 = vpop.permute.xlu0 %8067 }
0x1687   :  { %v8070_v17 = vmul.f32 %v11565_v24, %v8068_v41 }
0x1689   :  { %8072 = vrot.lane.b32.xlu0 %v8070_v17, %s11623_s0  ;;  %v8668_v17 = vand.u32 4294901760, %v12607_v57 }
0x168b   :  { %v8669_v21 = vsub.f32 %v12607_v57, %v8668_v17  ;;  %v11290_v44 = vpack.c.bf16 %v8675_v14, %v8668_v17 }
0x16d1   :  { %v7554_v16 = vpop.permute.xlu1 %7553 }
0x16d2   :  { %v7556_v19 = vadd.f32 %v7554_v16, %v7546_v9  ;;  %v12622_v9 = vsub.f32 %v12597_v43, %v8593_v60  ;;  %v12625_v16 = vsub.f32 %v12602_v63, %v8596_v12 }
0x16d4   :  { %11566 = vtanh.f32 %v7556_v19  ;;  %v11281_v25 = vpack.c.bf16 %v12625_v16, %v12622_v9 }
0x16de   :  { %v11567_v47 = vpop.eup %11566 }
0x16df   :  { %7559 = vrot.lane.b32.xlu1 %v11567_v47, %s11623_s0 }
0x16fb   :  { %v8073_v27 = vpop.permute.xlu0 %8072 }
0x16fc   :  { %v8075_v34 = vadd.f32 %v8073_v27, %v8065_v26  ;;  %v8676_v26 = vsub.f32 %v12611_v11, %v8675_v14  ;;  %v8682_v27 = vand.u32 4294901760, %v12622_v9 }
0x16fe   :  { %11568 = vtanh.f32 %v8075_v34  ;;  %v8689_v34 = vand.u32 4294901760, %v12625_v16  ;;  %v8677_v13 = vand.u32 4294901760, %v8676_v26  ;;  %v8683_v51 = vsub.f32 %v12622_v9, %v8682_v27  ;;  %v9116_v9 = vld [vmem:[%s12712_s2 + $0x40] ss:$0 sm:$0xff] }
0x1700   :  { %v8690_v20 = vsub.f32 %v12625_v16, %v8689_v34  ;;  %v8684_v62 = vand.u32 4294901760, %v8683_v51  ;;  %v11293_v45 = vpack.c.bf16 %v8689_v34, %v8682_v27 }
0x1702   :  { %v8691_v7 = vand.u32 4294901760, %v8690_v20 }
0x1704   :  { %v11275_v23 = vpack.c.bf16 %v8691_v7, %v8684_v62 }
0x1708   :  { %v11569_v15 = vpop.eup %11568 }
0x1709   :  { %8078 = vrot.lane.b32.xlu0 %v11569_v15, %s11623_s0 }
0x1751   :  { %v7560_v10 = vpop.permute.xlu1 %7559 }
0x1752   :  { %v7562_v35 = vmul.f32 %v11561_v49, %v7560_v10 }
0x1754   :  { %v8581_v36 = vrot.slane %v7562_v35, 6  ;;  %v8670_v35 = vand.u32 4294901760, %v8669_v21 }
0x1756   :  { %8582 = vrot.lane.b32.xlu1 %v8581_v36, %s11624_s1  ;;  %v11272_v61 = vpack.c.bf16 %v8677_v13, %v8670_v35 }
0x177b   :  { %v8079_v39 = vpop.permute.xlu0 %8078 }
0x177c   :  { %v8081_v56 = vmul.f32 %v11565_v24, %v8079_v39 }
0x177e   :  { %8091 = vrot.lane.b32.xlu0 %v8081_v56, %s11624_s1 }
0x17c8   :  { %v8583_v10 = vpop.permute.xlu1 %8582 }
0x17c9   :  { %v8584_v59 = vsel %vm784_vm7, %v8583_v10, 0 }
0x17ca   :  { %v8655_v36 = vand.u32 4294901760, %v8584_v59 }
0x17cc   :  { %v8656_v54 = vsub.f32 %v8584_v59, %v8655_v36 }
0x17ce   :  { %v8657_v2 = vand.u32 4294901760, %v8656_v54 }
0x17d0   :  { %v8658_v5 = vsub.f32 %v8656_v54, %v8657_v2 }
0x17d2   :  { %v8659_v58 = vand.u32 4294901760, %v8658_v5 }
0x17f0   :  { %v8092_v49 = vpop.permute.xlu0 %8091 }
0x17f1   :  { %v8093_v32 = vsel %vm784_vm7, %v8092_v49, 0 }
0x17f2   :  { %v8164_v24 = vand.u32 4294901760, %v8093_v32 }
0x17f4   :  { %v8165_v41 = vsub.f32 %v8093_v32, %v8164_v24  ;;  %10541 = vmatmul.mubr.f32.vlgmr.msra.gmra.mrb[28].mxu0 %v8164_v24 }
0x17f5   :  { %11249 = vmatpush3.bf16.msra.mxu0 %v11230_v33  ;;  %10562 = vmatprep.mubr.msk.f32.mxu0 %vm11626_vm6, %v11622_v1 }
0x17f6   :  { %v8166_v19 = vand.u32 4294901760, %v8165_v41  ;;  %11250 = vmatprep.subr.bf16.mxu0 %v11625_v52 }
0x17f8   :  { %v8167_v47 = vsub.f32 %v8165_v41, %v8166_v19 }
0x17f9   :  { %11252 = vmatpush3.bf16.msra.mxu0 %v11233_v42 }
0x17fa   :  { %v8168_v15 = vand.u32 4294901760, %v8167_v47  ;;  %11259 = vmatprep.subr.bf16.mxu0 %v11625_v52 }
0x17fc   :  { %10563 = vmatmul.mubr.f32.vlgmr.msra.gmra.mrb[30].mxu0 %v8166_v19  ;;  %10530 = vmatmul.mubr.f32.vlgmr.msra.gmra.mrb[34].mxu1 %v8168_v15 }
0x17fd   :  { %11243 = vmatpush3.bf16.msra.mxu1 %v11242_v40  ;;  %11261 = vmatpush3.bf16.msra.mxu0 %v11230_v33 }
0x17fe   :  { %11244 = vmatprep.subr.bf16.mxu1 %v11625_v52  ;;  %11262 = vmatprep.subr.bf16.mxu0 %v11625_v52 }
0x17ff   :  { %10551 = vmatprep.mubr.msk.f32.mxu1 %vm11626_vm6, %v11622_v1  ;;  %10584 = vmatprep.mubr.msk.f32.mxu0 %vm11626_vm6, %v11622_v1 }
0x1801   :  { %11246 = vmatpush3.bf16.msra.mxu1 %v11245_v38  ;;  %11264 = vmatpush3.bf16.msra.mxu0 %v11233_v42 }
0x1802   :  { %11253 = vmatprep.subr.bf16.mxu1 %v11625_v52  ;;  %11271 = vmatprep.subr.bf16.mxu0 %v11625_v52 }
0x1804   :  { %10552 = vmatmul.mubr.f32.vlgmr.msra.gmra.mrb[36].mxu1 %v8165_v41  ;;  %10585 = vmatmul.mubr.f32.vlgmr.msra.gmra.mrb[32].mxu0 %v8164_v24 }
0x1805   :  { %11255 = vmatpush3.bf16.msra.mxu1 %v11254_v22  ;;  %11273 = vmatpush3.bf16.msra.mxu0 %v11272_v61 }
0x1806   :  { %11256 = vmatprep.subr.bf16.mxu1 %v11625_v52  ;;  %11274 = vmatprep.subr.bf16.mxu0 %v11625_v52 }
0x1807   :  { %10573 = vmatprep.mubr.msk.f32.mxu1 %vm11626_vm6, %v11622_v1  ;;  %10606 = vmatprep.mubr.msk.f32.mxu0 %vm11626_vm6, %v11622_v1 }
0x1809   :  { %11258 = vmatpush3.bf16.msra.mxu1 %v12580_v29  ;;  %11276 = vmatpush3.bf16.msra.mxu0 %v11275_v23 }
0x180a   :  { %11265 = vmatprep.subr.bf16.mxu1 %v11625_v52  ;;  %11283 = vmatprep.subr.bf16.mxu0 %v11625_v52 }
0x180c   :  { %10574 = vmatmul.mubr.f32.vlgmr.msra.gmra.mrb[38].mxu1 %v8164_v24  ;;  %10607 = vmatmul.mubr.f32.vlgmr.msra.gmra.mrb[34].mxu0 %v8655_v36 }
0x180d   :  { %11267 = vmatpush3.bf16.msra.mxu1 %v11266_v3  ;;  %11285 = vmatpush3.bf16.msra.mxu0 %v11266_v3 }
0x180e   :  { %11268 = vmatprep.subr.bf16.mxu1 %v11625_v52  ;;  %11286 = vmatprep.subr.bf16.mxu0 %v11625_v52 }
0x180f   :  { %10595 = vmatprep.mubr.msk.f32.mxu1 %vm11626_vm6, %v11622_v1  ;;  %10628 = vmatprep.mubr.msk.f32.mxu0 %vm11626_vm6, %v11622_v1 }
0x1811   :  { %11270 = vmatpush3.bf16.msra.mxu1 %v11269_v4  ;;  %11288 = vmatpush3.bf16.msra.mxu0 %v11269_v4 }
0x1812   :  { %11277 = vmatprep.subr.bf16.mxu1 %v11625_v52  ;;  %11295 = vmatprep.subr.bf16.mxu0 %v11625_v52 }
0x1814   :  { %10596 = vmatmul.mubr.f32.vlgmr.msra.gmra.mrb[40].mxu1 %v8659_v58  ;;  %10629 = vmatmul.mubr.f32.vlgmr.msra.gmra.mrb[36].mxu0 %v8657_v2 }
0x1815   :  { %11279 = vmatpush3.bf16.msra.mxu1 %v11278_v6  ;;  %11297 = vmatpush3.bf16.msra.mxu0 %v11266_v3 }
0x1816   :  { %11280 = vmatprep.subr.bf16.mxu1 %v11625_v52  ;;  %11298 = vmatprep.subr.bf16.mxu0 %v11625_v52 }
0x1817   :  { %10617 = vmatprep.mubr.msk.f32.mxu1 %vm11626_vm6, %v11622_v1  ;;  %10650 = vmatprep.mubr.msk.f32.mxu0 %vm11626_vm6, %v11622_v1 }
0x1819   :  { %11282 = vmatpush3.bf16.msra.mxu1 %v11281_v25  ;;  %11300 = vmatpush3.bf16.msra.mxu0 %v11269_v4 }
0x181a   :  { %11289 = vmatprep.subr.bf16.mxu1 %v11625_v52 }
0x181c   :  { %10618 = vmatmul.mubr.f32.vlgmr.msra.gmra.mrb[42].mxu1 %v8656_v54  ;;  %10651 = vmatmul.mubr.f32.vlgmr.msra.gmra.mrb[38].mxu0 %v8655_v36 }
0x181d   :  { %11291 = vmatpush3.bf16.msra.mxu1 %v11290_v44  ;;  %10639 = vmatprep.mubr.msk.f32.mxu1 %vm11626_vm6, %v11622_v1 }
0x181e   :  { %11292 = vmatprep.subr.bf16.mxu1 %v11625_v52 }
0x1821   :  { %11294 = vmatpush3.bf16.msra.mxu1 %v11293_v45 }
0x1824   :  { %10640 = vmatmul.mubr.f32.vlgmr.msra.gmra.mrb[44].mxu1 %v8655_v36 }
0x18c7   :  { %v8261_v46 = vpop.f32.mrb[28].mxu0 }
0x18c8   :  { %v10542_v50 = vpop.f32.mrb[29].mxu0 }
0x18cf   :  { %v8418_v53 = vpop.f32.mrb[30].mxu0  ;;  %v8170_v0 = vpop.f32.mrb[34].mxu1 }
0x18d0   :  { %v8262_v55 = vadd.f32 %v8261_v46, %v8170_v0  ;;  %v10564_v28 = vpop.f32.mrb[31].mxu0  ;;  %v10531_v30 = vpop.f32.mrb[35].mxu1 }
0x18d7   :  { %v8341_v31 = vpop.f32.mrb[36].mxu1  ;;  %v8576_v33 = vpop.f32.mrb[32].mxu0 }
0x18d8   :  { %v8342_v42 = vadd.f32 %v8341_v31, %v8262_v55  ;;  %v10553_v39 = vpop.f32.mrb[37].mxu1  ;;  %v10586_v40 = vpop.f32.mrb[33].mxu0 }
0x18da   :  { %v8419_v56 = vadd.f32 %v8418_v53, %v8342_v42 }
0x18df   :  { %v8501_v38 = vpop.f32.mrb[38].mxu1  ;;  %v8752_v22 = vpop.f32.mrb[34].mxu0 }
0x18e0   :  { %v8502_v1 = vadd.f32 %v8501_v38, %v8419_v56  ;;  %v10575_v29 = vpop.f32.mrb[39].mxu1  ;;  %v10608_v52 = vpop.f32.mrb[35].mxu0 }
0x18e2   :  { %v8577_v37 = vadd.f32 %v8576_v33, %v8502_v1 }
0x18e7   :  { %v8661_v8 = vpop.f32.mrb[40].mxu1  ;;  %v8909_v48 = vpop.f32.mrb[36].mxu0 }
0x18e8   :  { %v8662_v18 = vadd.f32 %v8661_v8, %v8577_v37  ;;  %v10597_v43 = vpop.f32.mrb[41].mxu1  ;;  %v10630_v63 = vpop.f32.mrb[37].mxu0 }
0x18ea   :  { %v8753_v49 = vadd.f32 %v8752_v22, %v8662_v18 }
0x18ef   :  { %v8832_v57 = vpop.f32.mrb[42].mxu1  ;;  %v9067_v32 = vpop.f32.mrb[38].mxu0 }
0x18f0   :  { %v8833_v11 = vadd.f32 %v8832_v57, %v8753_v49  ;;  %v10619_v60 = vpop.f32.mrb[43].mxu1  ;;  %v10652_v12 = vpop.f32.mrb[39].mxu0 }
0x18f2   :  { %v8910_v24 = vadd.f32 %v8909_v48, %v8833_v11 }
0x18f7   :  { %v8992_v41 = vpop.f32.mrb[44].mxu1 }
0x18f8   :  { %v8993_v17 = vadd.f32 %v8992_v41, %v8910_v24  ;;  %v10641_v14 = vpop.f32.mrb[45].mxu1 }
0x18fa   :  { %v9068_v16 = vadd.f32 %v9067_v32, %v8993_v17 }
0x18fc   :  { %v9076_v19 = vadd.f32 %v9116_v9, %v9068_v16 }
0x18fe   :  { %9078 = vst.msk [vmem:[#allocation5] sm:$0x3] %vm9077_vm8, %v9076_v19 }
0x18ff   :  { %11603 = shalt.err (!%p11600_p12)
}
0x1900   :  { %s11604_s26 = scalar_lea.hbm %s12713_s3, 32 }
0x1901   :  { %p11605_p13 = scmp.ne.s32.totalorder %s12713_s3, %s11604_s26  ;;  %p11608_p0 = scmp.lt.u32.totalorder %s11604_s26, %s12713_s3 }
0x1903   :  { %p11610_p1 = pnand %p11608_p0, %p11605_p13 }
0x1905   :  { %11613 = shalt.err (!%p11610_p1)
}
0x1906   :  { %9088 = dma.vmem_to_hbm [thread:$0]  %s9086_s22, 32, %s12713_s3, [#allocation4]  }
0x1907   :  { %11616 = dma.done.wait [#allocation4], 32  }
0x1908   :  { %11617 = vsyncadd [#allocation4], 4294967264 }
0x1909   :  { %9092 = vsyncpa [#allocation3], 1 }
0x190a   :  { %9093 = vsyncpa [#allocation4], 1 }

</bundles_post_ra>
